<compile_context>
chip_gen: v5e
topology: v5e:2x2
jax: 0.10.0
libtpu: 0.0.40
codegen_flags: <defaults>
</compile_context>

<pallas_src>
import functools
import numpy as np

import jax
import jax.numpy as jnp
from jax.experimental import pallas as pl
from jax.experimental.pallas import tpu as pltpu


# ----------------------------------------------------------------------------
# Feature probe: single-buffered (grid-constant) weight blocks.
# Falls back to default double-buffering if this JAX/Mosaic build rejects it.
# ----------------------------------------------------------------------------
def _probe_single_buffered_weights():
    if not hasattr(pl, "Buffered"):
        return False
    try:
        def k(w_ref, x_ref, o_ref):
            o_ref[...] = x_ref[...] + w_ref[...]

        f = pl.pallas_call(
            k,
            out_shape=jax.ShapeDtypeStruct((2, 8, 128), jnp.float32),
            grid=(2,),
            in_specs=[
                pl.BlockSpec((8, 128), lambda i: (0, 0),
                             pipeline_mode=pl.Buffered(1)),
                pl.BlockSpec((1, 8, 128), lambda i: (i, 0, 0)),
            ],
            out_specs=pl.BlockSpec((1, 8, 128), lambda i: (i, 0, 0)),
        )
        jax.block_until_ready(
            f(jnp.ones((8, 128), jnp.float32), jnp.ones((2, 8, 128), jnp.float32)))
        return True
    except Exception:
        return False


_SINGLE_BUFFER_WEIGHTS = _probe_single_buffered_weights()


# ----------------------------------------------------------------------------
# Pallas kernel: one full encoder layer for a single batch element
# ----------------------------------------------------------------------------
def encoder_layer_kernel(
    x_ref, maskb_ref,
    wqkv_ref, bqkv_ref, wo_ref, bo_ref,
    g1_ref, beta1_ref,
    w1_ref, b1_ref, w2_ref, b2_ref,
    g2_ref, beta2_ref,
    out_ref, *aw_refs,
    n_heads, d_k,
):
    D = n_heads * d_k
    x_bf = x_ref[0]                       # (S, D) bf16 activations
    x = x_bf.astype(jnp.float32)          # f32 copy for residual / LayerNorm math
    mask_bias = maskb_ref[0]              # (1, S) f32 additive mask: 0.0 or -1e9

    # --- fused QKV projection: one MXU pass, bf16 operands, f32 accumulate ---
    # 1/sqrt(d_k) is already folded into WQ / bQ by the wrapper.
    qkv = jnp.dot(x_bf, wqkv_ref[...],
                  preferred_element_type=jnp.float32) + bqkv_ref[...]   # (S, 3D)

    # --- multi-head attention (small static head count -> unrolled) ---------
    head_outs = []
    for h in range(n_heads):
        lo = h * d_k
        qs = qkv[:, lo:lo + d_k].astype(jnp.bfloat16)
        ks = qkv[:, D + lo:D + lo + d_k].astype(jnp.bfloat16)
        vs = qkv[:, 2 * D + lo:2 * D + lo + d_k].astype(jnp.bfloat16)

        # scores = (q/sqrt(d_k)) @ k^T + additive pad mask  (f32)
        scores = jax.lax.dot_general(
            qs, ks, (((1,), (1,)), ((), ())),
            preferred_element_type=jnp.float32) + mask_bias
        m = jnp.max(scores, axis=-1, keepdims=True)
        e = jnp.exp(scores - m)
        w = e * pl.reciprocal(jnp.sum(e, axis=-1, keepdims=True), approx=True)
        if aw_refs:                               # optional attention-weights out (bf16)
            aw_refs[0][0, h] = w.astype(aw_refs[0].dtype)

        head_outs.append(
            jnp.dot(w.astype(jnp.bfloat16), vs,
                    preferred_element_type=jnp.float32).astype(jnp.bfloat16))

    # Single K=D output projection: concat heads (S, D) then one MXU pass.
    ctx = jnp.concatenate(head_outs, axis=-1)                           # (S, D) bf16
    attn = jnp.dot(ctx, wo_ref[...],
                   preferred_element_type=jnp.float32) + bo_ref[...]    # (S, D) f32

    # dropout1 -> identity (eval); residual + LayerNorm (eps=1e-6, f32)
    h1 = x + attn
    mu1 = jnp.mean(h1, axis=-1, keepdims=True)
    var1 = jnp.mean((h1 - mu1) ** 2, axis=-1, keepdims=True)
    h1n = (h1 - mu1) * jax.lax.rsqrt(var1 + 1e-6) * g1_ref[...] + beta1_ref[...]

    # --- position-wise FFN (bf16 matmuls, f32 elementwise) -------------------
    f = jnp.dot(h1n.astype(jnp.bfloat16), w1_ref[...],
                preferred_element_type=jnp.float32) + b1_ref[...]
    f = jnp.maximum(f, 0.0)                                   # ReLU
    f = jnp.dot(f.astype(jnp.bfloat16), w2_ref[...],
                preferred_element_type=jnp.float32) + b2_ref[...]

    # dropout2 -> identity (eval); residual + LayerNorm (eps=1e-6, f32)
    h2 = h1n + f
    mu2 = jnp.mean(h2, axis=-1, keepdims=True)
    var2 = jnp.mean((h2 - mu2) ** 2, axis=-1, keepdims=True)
    out_ref[0] = ((h2 - mu2) * jax.lax.rsqrt(var2 + 1e-6)
                  * g2_ref[...] + beta2_ref[...]).astype(out_ref.dtype)


# ----------------------------------------------------------------------------
# VMEM budget computed from actual shapes (padded to (8,128) tiles, + headroom)
# ----------------------------------------------------------------------------
def _round_up(x, m):
    return (x + m - 1) // m * m


def _tile_bytes(shape, itemsize):
    shape = tuple(int(s) for s in shape)
    if len(shape) == 1:
        shape = (1,) + shape
    lead = 1
    for s in shape[:-2]:
        lead *= s
    return lead * _round_up(shape[-2], 8) * _round_up(shape[-1], 128) * itemsize


def _estimate_vmem_bytes(S, D, d_ff, n_heads, collect_attn, single_buffer_weights):
    nbuf_w = 1 if single_buffer_weights else 2
    est = 0
    # pipelined per-batch-element blocks (double-buffered)
    est += 2 * _tile_bytes((S, D), 2)                 # x block (bf16)
    est += 2 * _tile_bytes((1, S), 4)                 # additive mask block
    est += 2 * _tile_bytes((S, D), 2)                 # out block (bf16)
    if collect_attn:
        est += 2 * _tile_bytes((n_heads, S, S), 2)    # attn-weights block (bf16)
    # grid-constant weights / params
    for shp, isz in (
        ((D, 3 * D), 2), ((1, 3 * D), 4),
        ((D, D), 2), ((1, D), 4),
        ((1, D), 4), ((1, D), 4),
        ((D, d_ff), 2), ((1, d_ff), 4),
        ((d_ff, D), 2), ((1, D), 4),
        ((1, D), 4), ((1, D), 4),
    ):
        est += nbuf_w * _tile_bytes(shp, isz)
    # in-kernel temporaries (qkv, scores, ffn intermediate, residuals)
    est += 4 * (_tile_bytes((S, 3 * D), 4) + _tile_bytes((S, S), 4)
                + _tile_bytes((S, d_ff), 4) + 3 * _tile_bytes((S, D), 4))
    return int(min(max(2 * est, 32 * 1024 * 1024), 100 * 1024 * 1024))


# ----------------------------------------------------------------------------
# Wrapper: one pallas_call per encoder layer, grid over batch
# ----------------------------------------------------------------------------
def encoder_layer(x, mask_bias, params, n_heads, collect_attn=False):
    """x: (B, S, D) bf16; mask_bias: (B, 1, S) f32 additive (0 or -1e9)."""
    B, S, D = x.shape
    d_k = D // n_heads
    d_ff = params["w1"].shape[1]

    if _SINGLE_BUFFER_WEIGHTS:
        const2 = lambda shp: pl.BlockSpec(shp, lambda b: (0, 0),
                                          pipeline_mode=pl.Buffered(1))
    else:
        const2 = lambda shp: pl.BlockSpec(shp, lambda b: (0, 0))

    in_specs = [
        pl.BlockSpec((1, S, D), lambda b: (b, 0, 0)),     # x (bf16)
        pl.BlockSpec((1, 1, S), lambda b: (b, 0, 0)),     # additive pad mask
        const2((D, 3 * D)), const2((1, 3 * D)),           # fused Wqkv (bf16), bqkv
        const2((D, D)), const2((1, D)),                   # Wo (bf16), bo
        const2((1, D)), const2((1, D)),                   # ln1 gamma, beta
        const2((D, d_ff)), const2((1, d_ff)),             # ffn W1 (bf16), b1
        const2((d_ff, D)), const2((1, D)),                # ffn W2 (bf16), b2
        const2((1, D)), const2((1, D)),                   # ln2 gamma, beta
    ]

    out_shape = [jax.ShapeDtypeStruct((B, S, D), jnp.bfloat16)]
    out_specs = [pl.BlockSpec((1, S, D), lambda b: (b, 0, 0))]
    if collect_attn:
        out_shape.append(jax.ShapeDtypeStruct((B, n_heads, S, S), jnp.bfloat16))
        out_specs.append(pl.BlockSpec((1, n_heads, S, S), lambda b: (b, 0, 0, 0)))

    kernel = functools.partial(encoder_layer_kernel, n_heads=n_heads, d_k=d_k)

    results = pl.pallas_call(
        kernel,
        out_shape=tuple(out_shape),
        grid_spec=pltpu.PrefetchScalarGridSpec(
            num_scalar_prefetch=0,
            grid=(B,),
            in_specs=in_specs,
            out_specs=tuple(out_specs),
        ),
        input_output_aliases={0: 0},   # layer output re-uses the x HBM buffer
        compiler_params=pltpu.CompilerParams(
            dimension_semantics=("parallel",),
            vmem_limit_bytes=_estimate_vmem_bytes(
                S, D, d_ff, n_heads, collect_attn, _SINGLE_BUFFER_WEIGHTS),
        ),
    )(
        x, mask_bias,
        params["wqkv"], params["bqkv"], params["wo"], params["bo"],
        params["ln1_g"], params["ln1_b"],
        params["w1"], params["b1"], params["w2"], params["b2"],
        params["ln2_g"], params["ln2_b"],
    )
    out = results[0]
    aw = results[1] if collect_attn else None
    return out, aw


# ----------------------------------------------------------------------------
# Parameter init (PyTorch-like) + kernel-friendly preparation
# ----------------------------------------------------------------------------
def init_linear(key, d_in, d_out):
    k1, k2 = jax.random.split(key)
    bound = 1.0 / np.sqrt(d_in)
    # stored as (in, out) so the kernel does x @ W + b  (== PyTorch x @ W.T + b)
    w = jax.random.uniform(k1, (d_in, d_out), jnp.float32, -bound, bound)
    b = jax.random.uniform(k2, (1, d_out), jnp.float32, -bound, bound)
    return w, b


def init_layer(key, d_model, d_ff):
    ks = jax.random.split(key, 6)
    wq, bq = init_linear(ks[0], d_model, d_model)
    wk, bk = init_linear(ks[1], d_model, d_model)
    wv, bv = init_linear(ks[2], d_model, d_model)
    wo, bo = init_linear(ks[3], d_model, d_model)
    w1, b1 = init_linear(ks[4], d_model, d_ff)
    w2, b2 = init_linear(ks[5], d_ff, d_model)
    ones = jnp.ones((1, d_model), jnp.float32)
    zeros = jnp.zeros((1, d_model), jnp.float32)
    return dict(wq=wq, bq=bq, wk=wk, bk=bk, wv=wv, bv=bv, wo=wo, bo=bo,
                ln1_g=ones, ln1_b=zeros,
                w1=w1, b1=b1, w2=w2, b2=b2,
                ln2_g=ones, ln2_b=zeros)


def prepare_layer(p, n_heads):
    """Fuse QKV, fold 1/sqrt(d_k) into WQ/bQ, cast matmul weights to bf16
    (halves weight DMA; MXU accumulates in f32)."""
    d_model = p["wq"].shape[0]
    d_k = d_model // n_heads
    scale = float(1.0 / np.sqrt(d_k))
    wqkv = jnp.concatenate([p["wq"] * scale, p["wk"], p["wv"]], axis=1)
    bqkv = jnp.concatenate([p["bq"] * scale, p["bk"], p["bv"]], axis=1)
    return dict(
        wqkv=wqkv.astype(jnp.bfloat16),
        bqkv=bqkv.astype(jnp.float32),
        wo=p["wo"].astype(jnp.bfloat16),
        bo=p["bo"],
        ln1_g=p["ln1_g"], ln1_b=p["ln1_b"],
        w1=p["w1"].astype(jnp.bfloat16), b1=p["b1"],
        w2=p["w2"].astype(jnp.bfloat16), b2=p["b2"],
        ln2_g=p["ln2_g"], ln2_b=p["ln2_b"],
    )


def get_sinusoid_table(n_positions, d_model):
    pos = np.arange(n_positions, dtype=np.float32)[:, None]
    i = np.arange(d_model, dtype=np.float32)[None, :]
    angle = pos / np.power(10000.0, 2.0 * np.floor(i / 2.0) / d_model)
    table = np.zeros((n_positions, d_model), dtype=np.float32)
    table[:, 0::2] = np.sin(angle[:, 0::2])
    table[:, 1::2] = np.cos(angle[:, 1::2])
    return jnp.asarray(table)


# ----------------------------------------------------------------------------
# Full TransformerEncoder forward
# ----------------------------------------------------------------------------
@functools.partial(jax.jit, static_argnames=("pad_id", "n_heads", "collect_attn"))
def transformer_encoder(inputs, embedding, sinusoid_table, layers, *,
                        pad_id, n_heads, collect_attn=False):
    B, S = inputs.shape
    positions = jnp.tile(jnp.arange(S, dtype=inputs.dtype), (B, 1)) + 1
    positions = jnp.where(inputs == pad_id, 0, positions)

    # activations flow through the layers in bf16 (halves activation DMA)
    x = (embedding[inputs] + sinusoid_table[positions]).astype(jnp.bfloat16)

    # additive key-padding mask (B, 1, S): 0 for real tokens, -1e9 for PAD keys
    mask_bias = jnp.where(inputs == pad_id, -1e9, 0.0).astype(jnp.float32)[:, None, :]

    attention_weights = []
    for layer_params in layers:
        x, aw = encoder_layer(x, mask_bias, layer_params, n_heads, collect_attn)
        if collect_attn:
            attention_weights.append(aw)
    return x.astype(jnp.float32), attention_weights


# ----------------------------------------------------------------------------
if __name__ == "__main__":
    vocab_size = 50
    d_model = 128          # multiple of 128 lanes (no masked partial vregs)
    n_layers = 2
    n_heads = 4            # d_k = 32
    d_ff = 256
    pad_id = 0
    B, S = 2, 8            # S is a multiple of 8 sublanes

    key = jax.random.PRNGKey(0)
    k_emb, k_inp, *k_layers = jax.random.split(key, 2 + n_layers)

    embedding = jax.random.normal(k_emb, (vocab_size, d_model), jnp.float32)
    sinusoid_table = get_sinusoid_table(S + 1, d_model)
    raw_layers = [init_layer(k, d_model, d_ff) for k in k_layers]
    layers = [prepare_layer(p, n_heads) for p in raw_layers]

    inputs = jax.random.randint(k_inp, (B, S), 1, vocab_size, dtype=jnp.int32)
    # add some padding tokens
    inputs = inputs.at[0, -2:].set(pad_id)
    inputs = inputs.at[1, -1:].set(pad_id)

    outputs, attn_ws = transformer_encoder(
        inputs, embedding, sinusoid_table, layers,
        pad_id=pad_id, n_heads=n_heads, collect_attn=True)

    outputs = jax.block_until_ready(outputs)
    attn_ws = [jax.block_until_ready(a) for a in attn_ws]

    assert outputs.shape == (B, S, d_model)
    assert outputs.dtype == jnp.float32
    assert all(a.shape == (B, n_heads, S, S) for a in attn_ws)
    assert bool(jnp.all(jnp.isfinite(outputs)))
    # attention rows should sum to ~1 (bf16 storage + approx reciprocal tolerance)
    row_sums = jnp.sum(attn_ws[0].astype(jnp.float32), axis=-1)
    assert bool(jnp.all(jnp.abs(row_sums - 1.0) < 2e-2))
    print("KERNEL_OK")
</pallas_src>

<mosaic_0001>
module attributes {stable_mosaic.version = 11 : i64} {
  func.func @k(%arg0: i32, %arg1: memref<8x128xf32, #tpu.memory_space<vmem>>, %arg2: memref<1x8x128xf32, #tpu.memory_space<vmem>>, %arg3: memref<1x8x128xf32, #tpu.memory_space<vmem>>) attributes {dimension_semantics = [#tpu.dimension_semantics<arbitrary>], iteration_bounds = array<i64: 2>, scalar_prefetch = 0 : i64, scratch_operands = 0 : i64, tpu.core_type = #tpu.core_type<tc>, window_params = [{pipeline_mode = #tpu.pipeline_mode<synchronous>, transform_indices = @transform_0, window_bounds = array<i64: 8, 128>}, {transform_indices = @transform_1, window_bounds = array<i64: 1, 8, 128>}, {transform_indices = @transform_2, window_bounds = array<i64: 1, 8, 128>}]} {
    %c0 = arith.constant 0 : index
    %c0_0 = arith.constant 0 : index
    %c0_1 = arith.constant 0 : index
    %0 = vector.load %arg2[%c0, %c0_0, %c0_1] : memref<1x8x128xf32, #tpu.memory_space<vmem>>, vector<1x8x128xf32>
    %c0_2 = arith.constant 0 : index
    %c0_3 = arith.constant 0 : index
    %1 = vector.load %arg1[%c0_2, %c0_3] : memref<8x128xf32, #tpu.memory_space<vmem>>, vector<8x128xf32>
    %2 = vector.shape_cast %1 : vector<8x128xf32> to vector<1x8x128xf32>
    %3 = arith.addf %0, %2 : vector<1x8x128xf32>
    %c0_4 = arith.constant 0 : index
    %c0_5 = arith.constant 0 : index
    %c0_6 = arith.constant 0 : index
    %4 = vector.load %arg3[%c0_4, %c0_5, %c0_6] : memref<1x8x128xf32, #tpu.memory_space<vmem>>, vector<1x8x128xf32>
    tpu.vector_store %arg3[%c0_4, %c0_5, %c0_6], %3 {strides = array<i32>} : memref<1x8x128xf32, #tpu.memory_space<vmem>>, vector<1x8x128xf32>,
    return
  }
  func.func @transform_0(%arg0: i32) -> (i32, i32) {
    %c0_i32 = arith.constant 0 : i32
    %c0_i32_0 = arith.constant 0 : i32
    %c0_i32_1 = arith.constant 0 : i32
    return %c0_i32, %c0_i32_0 : i32, i32
  }
  func.func @transform_1(%arg0: i32) -> (i32, i32, i32) {
    %c0_i32 = arith.constant 0 : i32
    %c0_i32_0 = arith.constant 0 : i32
    %c0_i32_1 = arith.constant 0 : i32
    return %arg0, %c0_i32, %c0_i32_0 : i32, i32, i32
  }
  func.func @transform_2(%arg0: i32) -> (i32, i32, i32) {
    %c0_i32 = arith.constant 0 : i32
    %c0_i32_0 = arith.constant 0 : i32
    %c0_i32_1 = arith.constant 0 : i32
    return %arg0, %c0_i32, %c0_i32_0 : i32, i32, i32
  }
}

module attributes {stable_mosaic.version = 11 : i64} {
  func.func @encoder_layer_kernel(%arg0: i32, %arg1: memref<1x8x128xbf16, #tpu.memory_space<vmem>>, %arg2: memref<1x1x8xf32, #tpu.memory_space<vmem>>, %arg3: memref<128x384xbf16, #tpu.memory_space<vmem>>, %arg4: memref<1x384xf32, #tpu.memory_space<vmem>>, %arg5: memref<128x128xbf16, #tpu.memory_space<vmem>>, %arg6: memref<1x128xf32, #tpu.memory_space<vmem>>, %arg7: memref<1x128xf32, #tpu.memory_space<vmem>>, %arg8: memref<1x128xf32, #tpu.memory_space<vmem>>, %arg9: memref<128x256xbf16, #tpu.memory_space<vmem>>, %arg10: memref<1x256xf32, #tpu.memory_space<vmem>>, %arg11: memref<256x128xbf16, #tpu.memory_space<vmem>>, %arg12: memref<1x128xf32, #tpu.memory_space<vmem>>, %arg13: memref<1x128xf32, #tpu.memory_space<vmem>>, %arg14: memref<1x128xf32, #tpu.memory_space<vmem>>, %arg15: memref<1x8x128xbf16, #tpu.memory_space<vmem>>, %arg16: memref<1x4x8x8xbf16, #tpu.memory_space<vmem>>) attributes {dimension_semantics = [#tpu.dimension_semantics<parallel>], iteration_bounds = array<i64: 2>, scalar_prefetch = 0 : i64, scratch_operands = 0 : i64, tpu.core_type = #tpu.core_type<tc>, window_params = [{transform_indices = @transform_0, window_bounds = array<i64: 1, 8, 128>}, {transform_indices = @transform_1, window_bounds = array<i64: 1, 1, 8>}, {pipeline_mode = #tpu.pipeline_mode<synchronous>, transform_indices = @transform_2, window_bounds = array<i64: 128, 384>}, {pipeline_mode = #tpu.pipeline_mode<synchronous>, transform_indices = @transform_3, window_bounds = array<i64: 1, 384>}, {pipeline_mode = #tpu.pipeline_mode<synchronous>, transform_indices = @transform_4, window_bounds = array<i64: 128, 128>}, {pipeline_mode = #tpu.pipeline_mode<synchronous>, transform_indices = @transform_5, window_bounds = array<i64: 1, 128>}, {pipeline_mode = #tpu.pipeline_mode<synchronous>, transform_indices = @transform_6, window_bounds = array<i64: 1, 128>}, {pipeline_mode = #tpu.pipeline_mode<synchronous>, transform_indices = @transform_7, window_bounds = array<i64: 1, 128>}, {pipeline_mode = #tpu.pipeline_mode<synchronous>, transform_indices = @transform_8, window_bounds = array<i64: 128, 256>}, {pipeline_mode = #tpu.pipeline_mode<synchronous>, transform_indices = @transform_9, window_bounds = array<i64: 1, 256>}, {pipeline_mode = #tpu.pipeline_mode<synchronous>, transform_indices = @transform_10, window_bounds = array<i64: 256, 128>}, {pipeline_mode = #tpu.pipeline_mode<synchronous>, transform_indices = @transform_11, window_bounds = array<i64: 1, 128>}, {pipeline_mode = #tpu.pipeline_mode<synchronous>, transform_indices = @transform_12, window_bounds = array<i64: 1, 128>}, {pipeline_mode = #tpu.pipeline_mode<synchronous>, transform_indices = @transform_13, window_bounds = array<i64: 1, 128>}, {transform_indices = @transform_14, window_bounds = array<i64: 1, 8, 128>}, {transform_indices = @transform_15, window_bounds = array<i64: 1, 4, 8, 8>}]} {
    %c0 = arith.constant 0 : index
    %c0_0 = arith.constant 0 : index
    %c0_1 = arith.constant 0 : index
    %0 = vector.load %arg1[%c0, %c0_0, %c0_1] : memref<1x8x128xbf16, #tpu.memory_space<vmem>>, vector<1x8x128xbf16>
    %1 = vector.shape_cast %0 : vector<1x8x128xbf16> to vector<8x128xbf16>
    %2 = arith.extf %1 : vector<8x128xbf16> to vector<8x128xf32>
    %c0_2 = arith.constant 0 : index
    %c0_3 = arith.constant 0 : index
    %c0_4 = arith.constant 0 : index
    %3 = vector.load %arg2[%c0_2, %c0_3, %c0_4] : memref<1x1x8xf32, #tpu.memory_space<vmem>>, vector<1x1x8xf32>
    %4 = vector.shape_cast %3 : vector<1x1x8xf32> to vector<1x8xf32>
    %c0_5 = arith.constant 0 : index
    %c0_6 = arith.constant 0 : index
    %5 = vector.load %arg3[%c0_5, %c0_6] : memref<128x384xbf16, #tpu.memory_space<vmem>>, vector<128x384xbf16>
    %cst = arith.constant dense<0.000000e+00> : vector<8x384xf32>
    %6 = tpu.matmul %1, %5, %cst {dimension_numbers = #tpu.dot_dimension_numbers<[1], [0], [0], [1], [0, 0, 1, 1], [], []>} : vector<8x128xbf16>, vector<128x384xbf16>, vector<8x384xf32> -> vector<8x384xf32>
    %c0_7 = arith.constant 0 : index
    %c0_8 = arith.constant 0 : index
    %7 = vector.load %arg4[%c0_7, %c0_8] : memref<1x384xf32, #tpu.memory_space<vmem>>, vector<1x384xf32>
    %8 = vector.broadcast %7 : vector<1x384xf32> to vector<8x384xf32>
    %9 = arith.addf %6, %8 : vector<8x384xf32>
    %10 = vector.extract_strided_slice %9 {offsets = [0, 0], sizes = [8, 32], strides = [1, 1]} : vector<8x384xf32> to vector<8x32xf32>
    %11 = arith.truncf %10 : vector<8x32xf32> to vector<8x32xbf16>
    %12 = vector.extract_strided_slice %9 {offsets = [0, 128], sizes = [8, 32], strides = [1, 1]} : vector<8x384xf32> to vector<8x32xf32>
    %13 = arith.truncf %12 : vector<8x32xf32> to vector<8x32xbf16>
    %14 = vector.extract_strided_slice %9 {offsets = [0, 256], sizes = [8, 32], strides = [1, 1]} : vector<8x384xf32> to vector<8x32xf32>
    %15 = arith.truncf %14 : vector<8x32xf32> to vector<8x32xbf16>
    %cst_9 = arith.constant dense<0.000000e+00> : vector<8x8xf32>
    %16 = tpu.matmul %11, %13, %cst_9 {dimension_numbers = #tpu.dot_dimension_numbers<[1], [1], [0], [0], [0, 0, 1, 0], [], []>} : vector<8x32xbf16>, vector<8x32xbf16>, vector<8x8xf32> -> vector<8x8xf32>
    %17 = vector.broadcast %4 : vector<1x8xf32> to vector<8x8xf32>
    %18 = arith.addf %16, %17 : vector<8x8xf32>
    %cst_10 = arith.constant dense<0xFF800000> : vector<8xf32>
    %19 = vector.multi_reduction <maximumf>, %18, %cst_10 [1] : vector<8x8xf32> to vector<8xf32>
    %20 = vector.shape_cast %19 : vector<8xf32> to vector<8x1xf32>
    %21 = vector.broadcast %20 : vector<8x1xf32> to vector<8x8xf32>
    %22 = arith.subf %18, %21 : vector<8x8xf32>
    %23 = math.exp %22 : vector<8x8xf32>
    %cst_11 = arith.constant dense<0.000000e+00> : vector<8xf32>
    %24 = vector.multi_reduction <add>, %23, %cst_11 [1] : vector<8x8xf32> to vector<8xf32>
    %25 = vector.shape_cast %24 : vector<8xf32> to vector<8x1xf32>
    %26 = tpu.reciprocal %25 {approx = true} : vector<8x1xf32> -> vector<8x1xf32>
    %27 = vector.broadcast %26 : vector<8x1xf32> to vector<8x8xf32>
    %28 = arith.mulf %23, %27 : vector<8x8xf32>
    %29 = arith.truncf %28 : vector<8x8xf32> to vector<8x8xbf16>
    %c0_12 = arith.constant 0 : index
    %c0_13 = arith.constant 0 : index
    %c0_14 = arith.constant 0 : index
    %c0_15 = arith.constant 0 : index
    %30 = vector.load %arg16[%c0_12, %c0_13, %c0_14, %c0_15] : memref<1x4x8x8xbf16, #tpu.memory_space<vmem>>, vector<1x1x8x8xbf16>
    %31 = vector.shape_cast %30 : vector<1x1x8x8xbf16> to vector<8x8xbf16>
    %32 = vector.shape_cast %29 : vector<8x8xbf16> to vector<1x1x8x8xbf16>
    tpu.vector_store %arg16[%c0_12, %c0_13, %c0_14, %c0_15], %32 {strides = array<i32>} : memref<1x4x8x8xbf16, #tpu.memory_space<vmem>>, vector<1x1x8x8xbf16>,
    %33 = arith.truncf %28 : vector<8x8xf32> to vector<8x8xbf16>
    %cst_16 = arith.constant dense<0.000000e+00> : vector<8x32xf32>
    %34 = tpu.matmul %33, %15, %cst_16 {dimension_numbers = #tpu.dot_dimension_numbers<[1], [0], [0], [1], [0, 0, 1, 1], [], []>} : vector<8x8xbf16>, vector<8x32xbf16>, vector<8x32xf32> -> vector<8x32xf32>
    %35 = arith.truncf %34 : vector<8x32xf32> to vector<8x32xbf16>
    %36 = vector.extract_strided_slice %9 {offsets = [0, 32], sizes = [8, 32], strides = [1, 1]} : vector<8x384xf32> to vector<8x32xf32>
    %37 = arith.truncf %36 : vector<8x32xf32> to vector<8x32xbf16>
    %38 = vector.extract_strided_slice %9 {offsets = [0, 160], sizes = [8, 32], strides = [1, 1]} : vector<8x384xf32> to vector<8x32xf32>
    %39 = arith.truncf %38 : vector<8x32xf32> to vector<8x32xbf16>
    %40 = vector.extract_strided_slice %9 {offsets = [0, 288], sizes = [8, 32], strides = [1, 1]} : vector<8x384xf32> to vector<8x32xf32>
    %41 = arith.truncf %40 : vector<8x32xf32> to vector<8x32xbf16>
    %cst_17 = arith.constant dense<0.000000e+00> : vector<8x8xf32>
    %42 = tpu.matmul %37, %39, %cst_17 {dimension_numbers = #tpu.dot_dimension_numbers<[1], [1], [0], [0], [0, 0, 1, 0], [], []>} : vector<8x32xbf16>, vector<8x32xbf16>, vector<8x8xf32> -> vector<8x8xf32>
    %43 = vector.broadcast %4 : vector<1x8xf32> to vector<8x8xf32>
    %44 = arith.addf %42, %43 : vector<8x8xf32>
    %cst_18 = arith.constant dense<0xFF800000> : vector<8xf32>
    %45 = vector.multi_reduction <maximumf>, %44, %cst_18 [1] : vector<8x8xf32> to vector<8xf32>
    %46 = vector.shape_cast %45 : vector<8xf32> to vector<8x1xf32>
    %47 = vector.broadcast %46 : vector<8x1xf32> to vector<8x8xf32>
    %48 = arith.subf %44, %47 : vector<8x8xf32>
    %49 = math.exp %48 : vector<8x8xf32>
    %cst_19 = arith.constant dense<0.000000e+00> : vector<8xf32>
    %50 = vector.multi_reduction <add>, %49, %cst_19 [1] : vector<8x8xf32> to vector<8xf32>
    %51 = vector.shape_cast %50 : vector<8xf32> to vector<8x1xf32>
    %52 = tpu.reciprocal %51 {approx = true} : vector<8x1xf32> -> vector<8x1xf32>
    %53 = vector.broadcast %52 : vector<8x1xf32> to vector<8x8xf32>
    %54 = arith.mulf %49, %53 : vector<8x8xf32>
    %55 = arith.truncf %54 : vector<8x8xf32> to vector<8x8xbf16>
    %c0_20 = arith.constant 0 : index
    %c1 = arith.constant 1 : index
    %c0_21 = arith.constant 0 : index
    %c0_22 = arith.constant 0 : index
    %56 = vector.load %arg16[%c0_20, %c1, %c0_21, %c0_22] : memref<1x4x8x8xbf16, #tpu.memory_space<vmem>>, vector<1x1x8x8xbf16>
    %57 = vector.shape_cast %56 : vector<1x1x8x8xbf16> to vector<8x8xbf16>
    %58 = vector.shape_cast %55 : vector<8x8xbf16> to vector<1x1x8x8xbf16>
    tpu.vector_store %arg16[%c0_20, %c1, %c0_21, %c0_22], %58 {strides = array<i32>} : memref<1x4x8x8xbf16, #tpu.memory_space<vmem>>, vector<1x1x8x8xbf16>,
    %59 = arith.truncf %54 : vector<8x8xf32> to vector<8x8xbf16>
    %cst_23 = arith.constant dense<0.000000e+00> : vector<8x32xf32>
    %60 = tpu.matmul %59, %41, %cst_23 {dimension_numbers = #tpu.dot_dimension_numbers<[1], [0], [0], [1], [0, 0, 1, 1], [], []>} : vector<8x8xbf16>, vector<8x32xbf16>, vector<8x32xf32> -> vector<8x32xf32>
    %61 = arith.truncf %60 : vector<8x32xf32> to vector<8x32xbf16>
    %62 = vector.extract_strided_slice %9 {offsets = [0, 64], sizes = [8, 32], strides = [1, 1]} : vector<8x384xf32> to vector<8x32xf32>
    %63 = arith.truncf %62 : vector<8x32xf32> to vector<8x32xbf16>
    %64 = vector.extract_strided_slice %9 {offsets = [0, 192], sizes = [8, 32], strides = [1, 1]} : vector<8x384xf32> to vector<8x32xf32>
    %65 = arith.truncf %64 : vector<8x32xf32> to vector<8x32xbf16>
    %66 = vector.extract_strided_slice %9 {offsets = [0, 320], sizes = [8, 32], strides = [1, 1]} : vector<8x384xf32> to vector<8x32xf32>
    %67 = arith.truncf %66 : vector<8x32xf32> to vector<8x32xbf16>
    %cst_24 = arith.constant dense<0.000000e+00> : vector<8x8xf32>
    %68 = tpu.matmul %63, %65, %cst_24 {dimension_numbers = #tpu.dot_dimension_numbers<[1], [1], [0], [0], [0, 0, 1, 0], [], []>} : vector<8x32xbf16>, vector<8x32xbf16>, vector<8x8xf32> -> vector<8x8xf32>
    %69 = vector.broadcast %4 : vector<1x8xf32> to vector<8x8xf32>
    %70 = arith.addf %68, %69 : vector<8x8xf32>
    %cst_25 = arith.constant dense<0xFF800000> : vector<8xf32>
    %71 = vector.multi_reduction <maximumf>, %70, %cst_25 [1] : vector<8x8xf32> to vector<8xf32>
    %72 = vector.shape_cast %71 : vector<8xf32> to vector<8x1xf32>
    %73 = vector.broadcast %72 : vector<8x1xf32> to vector<8x8xf32>
    %74 = arith.subf %70, %73 : vector<8x8xf32>
    %75 = math.exp %74 : vector<8x8xf32>
    %cst_26 = arith.constant dense<0.000000e+00> : vector<8xf32>
    %76 = vector.multi_reduction <add>, %75, %cst_26 [1] : vector<8x8xf32> to vector<8xf32>
    %77 = vector.shape_cast %76 : vector<8xf32> to vector<8x1xf32>
    %78 = tpu.reciprocal %77 {approx = true} : vector<8x1xf32> -> vector<8x1xf32>
    %79 = vector.broadcast %78 : vector<8x1xf32> to vector<8x8xf32>
    %80 = arith.mulf %75, %79 : vector<8x8xf32>
    %81 = arith.truncf %80 : vector<8x8xf32> to vector<8x8xbf16>
    %c0_27 = arith.constant 0 : index
    %c2 = arith.constant 2 : index
    %c0_28 = arith.constant 0 : index
    %c0_29 = arith.constant 0 : index
    %82 = vector.load %arg16[%c0_27, %c2, %c0_28, %c0_29] : memref<1x4x8x8xbf16, #tpu.memory_space<vmem>>, vector<1x1x8x8xbf16>
    %83 = vector.shape_cast %82 : vector<1x1x8x8xbf16> to vector<8x8xbf16>
    %84 = vector.shape_cast %81 : vector<8x8xbf16> to vector<1x1x8x8xbf16>
    tpu.vector_store %arg16[%c0_27, %c2, %c0_28, %c0_29], %84 {strides = array<i32>} : memref<1x4x8x8xbf16, #tpu.memory_space<vmem>>, vector<1x1x8x8xbf16>,
    %85 = arith.truncf %80 : vector<8x8xf32> to vector<8x8xbf16>
    %cst_30 = arith.constant dense<0.000000e+00> : vector<8x32xf32>
    %86 = tpu.matmul %85, %67, %cst_30 {dimension_numbers = #tpu.dot_dimension_numbers<[1], [0], [0], [1], [0, 0, 1, 1], [], []>} : vector<8x8xbf16>, vector<8x32xbf16>, vector<8x32xf32> -> vector<8x32xf32>
    %87 = arith.truncf %86 : vector<8x32xf32> to vector<8x32xbf16>
    %88 = vector.extract_strided_slice %9 {offsets = [0, 96], sizes = [8, 32], strides = [1, 1]} : vector<8x384xf32> to vector<8x32xf32>
    %89 = arith.truncf %88 : vector<8x32xf32> to vector<8x32xbf16>
    %90 = vector.extract_strided_slice %9 {offsets = [0, 224], sizes = [8, 32], strides = [1, 1]} : vector<8x384xf32> to vector<8x32xf32>
    %91 = arith.truncf %90 : vector<8x32xf32> to vector<8x32xbf16>
    %92 = vector.extract_strided_slice %9 {offsets = [0, 352], sizes = [8, 32], strides = [1, 1]} : vector<8x384xf32> to vector<8x32xf32>
    %93 = arith.truncf %92 : vector<8x32xf32> to vector<8x32xbf16>
    %cst_31 = arith.constant dense<0.000000e+00> : vector<8x8xf32>
    %94 = tpu.matmul %89, %91, %cst_31 {dimension_numbers = #tpu.dot_dimension_numbers<[1], [1], [0], [0], [0, 0, 1, 0], [], []>} : vector<8x32xbf16>, vector<8x32xbf16>, vector<8x8xf32> -> vector<8x8xf32>
    %95 = vector.broadcast %4 : vector<1x8xf32> to vector<8x8xf32>
    %96 = arith.addf %94, %95 : vector<8x8xf32>
    %cst_32 = arith.constant dense<0xFF800000> : vector<8xf32>
    %97 = vector.multi_reduction <maximumf>, %96, %cst_32 [1] : vector<8x8xf32> to vector<8xf32>
    %98 = vector.shape_cast %97 : vector<8xf32> to vector<8x1xf32>
    %99 = vector.broadcast %98 : vector<8x1xf32> to vector<8x8xf32>
    %100 = arith.subf %96, %99 : vector<8x8xf32>
    %101 = math.exp %100 : vector<8x8xf32>
    %cst_33 = arith.constant dense<0.000000e+00> : vector<8xf32>
    %102 = vector.multi_reduction <add>, %101, %cst_33 [1] : vector<8x8xf32> to vector<8xf32>
    %103 = vector.shape_cast %102 : vector<8xf32> to vector<8x1xf32>
    %104 = tpu.reciprocal %103 {approx = true} : vector<8x1xf32> -> vector<8x1xf32>
    %105 = vector.broadcast %104 : vector<8x1xf32> to vector<8x8xf32>
    %106 = arith.mulf %101, %105 : vector<8x8xf32>
    %107 = arith.truncf %106 : vector<8x8xf32> to vector<8x8xbf16>
    %c0_34 = arith.constant 0 : index
    %c3 = arith.constant 3 : index
    %c0_35 = arith.constant 0 : index
    %c0_36 = arith.constant 0 : index
    %108 = vector.load %arg16[%c0_34, %c3, %c0_35, %c0_36] : memref<1x4x8x8xbf16, #tpu.memory_space<vmem>>, vector<1x1x8x8xbf16>
    %109 = vector.shape_cast %108 : vector<1x1x8x8xbf16> to vector<8x8xbf16>
    %110 = vector.shape_cast %107 : vector<8x8xbf16> to vector<1x1x8x8xbf16>
    tpu.vector_store %arg16[%c0_34, %c3, %c0_35, %c0_36], %110 {strides = array<i32>} : memref<1x4x8x8xbf16, #tpu.memory_space<vmem>>, vector<1x1x8x8xbf16>,
    %111 = arith.truncf %106 : vector<8x8xf32> to vector<8x8xbf16>
    %cst_37 = arith.constant dense<0.000000e+00> : vector<8x32xf32>
    %112 = tpu.matmul %111, %93, %cst_37 {dimension_numbers = #tpu.dot_dimension_numbers<[1], [0], [0], [1], [0, 0, 1, 1], [], []>} : vector<8x8xbf16>, vector<8x32xbf16>, vector<8x32xf32> -> vector<8x32xf32>
    %113 = arith.truncf %112 : vector<8x32xf32> to vector<8x32xbf16>
    %114 = tpu.concatenate %35, %61, %87, %113 in 1 : vector<8x32xbf16>, vector<8x32xbf16>, vector<8x32xbf16>, vector<8x32xbf16> -> vector<8x128xbf16>
    %c0_38 = arith.constant 0 : index
    %c0_39 = arith.constant 0 : index
    %115 = vector.load %arg5[%c0_38, %c0_39] : memref<128x128xbf16, #tpu.memory_space<vmem>>, vector<128x128xbf16>
    %cst_40 = arith.constant dense<0.000000e+00> : vector<8x128xf32>
    %116 = tpu.matmul %114, %115, %cst_40 {dimension_numbers = #tpu.dot_dimension_numbers<[1], [0], [0], [1], [0, 0, 1, 1], [], []>} : vector<8x128xbf16>, vector<128x128xbf16>, vector<8x128xf32> -> vector<8x128xf32>
    %c0_41 = arith.constant 0 : index
    %c0_42 = arith.constant 0 : index
    %117 = vector.load %arg6[%c0_41, %c0_42] : memref<1x128xf32, #tpu.memory_space<vmem>>, vector<1x128xf32>
    %118 = vector.broadcast %117 : vector<1x128xf32> to vector<8x128xf32>
    %119 = arith.addf %116, %118 : vector<8x128xf32>
    %120 = arith.addf %2, %119 : vector<8x128xf32>
    %cst_43 = arith.constant dense<0.000000e+00> : vector<8xf32>
    %121 = vector.multi_reduction <add>, %120, %cst_43 [1] : vector<8x128xf32> to vector<8xf32>
    %122 = vector.shape_cast %121 : vector<8xf32> to vector<8x1xf32>
    %cst_44 = arith.constant 1.280000e+02 : f32
    %123 = vector.broadcast %cst_44 : f32 to vector<8x1xf32>
    %124 = arith.divf %122, %123 : vector<8x1xf32>
    %125 = vector.broadcast %124 : vector<8x1xf32> to vector<8x128xf32>
    %126 = arith.subf %120, %125 : vector<8x128xf32>
    %127 = arith.mulf %126, %126 : vector<8x128xf32>
    %cst_45 = arith.constant dense<0.000000e+00> : vector<8xf32>
    %128 = vector.multi_reduction <add>, %127, %cst_45 [1] : vector<8x128xf32> to vector<8xf32>
    %129 = vector.shape_cast %128 : vector<8xf32> to vector<8x1xf32>
    %cst_46 = arith.constant 1.280000e+02 : f32
    %130 = vector.broadcast %cst_46 : f32 to vector<8x1xf32>
    %131 = arith.divf %129, %130 : vector<8x1xf32>
    %132 = vector.broadcast %124 : vector<8x1xf32> to vector<8x128xf32>
    %133 = arith.subf %120, %132 : vector<8x128xf32>
    %cst_47 = arith.constant 9.99999997E-7 : f32
    %134 = vector.broadcast %cst_47 : f32 to vector<8x1xf32>
    %135 = arith.addf %131, %134 : vector<8x1xf32>
    %136 = math.rsqrt %135 : vector<8x1xf32>
    %137 = vector.broadcast %136 : vector<8x1xf32> to vector<8x128xf32>
    %138 = arith.mulf %133, %137 : vector<8x128xf32>
    %c0_48 = arith.constant 0 : index
    %c0_49 = arith.constant 0 : index
    %139 = vector.load %arg7[%c0_48, %c0_49] : memref<1x128xf32, #tpu.memory_space<vmem>>, vector<1x128xf32>
    %140 = vector.broadcast %139 : vector<1x128xf32> to vector<8x128xf32>
    %141 = arith.mulf %138, %140 : vector<8x128xf32>
    %c0_50 = arith.constant 0 : index
    %c0_51 = arith.constant 0 : index
    %142 = vector.load %arg8[%c0_50, %c0_51] : memref<1x128xf32, #tpu.memory_space<vmem>>, vector<1x128xf32>
    %143 = vector.broadcast %142 : vector<1x128xf32> to vector<8x128xf32>
    %144 = arith.addf %141, %143 : vector<8x128xf32>
    %145 = arith.truncf %144 : vector<8x128xf32> to vector<8x128xbf16>
    %c0_52 = arith.constant 0 : index
    %c0_53 = arith.constant 0 : index
    %146 = vector.load %arg9[%c0_52, %c0_53] : memref<128x256xbf16, #tpu.memory_space<vmem>>, vector<128x256xbf16>
    %cst_54 = arith.constant dense<0.000000e+00> : vector<8x256xf32>
    %147 = tpu.matmul %145, %146, %cst_54 {dimension_numbers = #tpu.dot_dimension_numbers<[1], [0], [0], [1], [0, 0, 1, 1], [], []>} : vector<8x128xbf16>, vector<128x256xbf16>, vector<8x256xf32> -> vector<8x256xf32>
    %c0_55 = arith.constant 0 : index
    %c0_56 = arith.constant 0 : index
    %148 = vector.load %arg10[%c0_55, %c0_56] : memref<1x256xf32, #tpu.memory_space<vmem>>, vector<1x256xf32>
    %149 = vector.broadcast %148 : vector<1x256xf32> to vector<8x256xf32>
    %150 = arith.addf %147, %149 : vector<8x256xf32>
    %cst_57 = arith.constant 0.000000e+00 : f32
    %151 = vector.broadcast %cst_57 : f32 to vector<8x256xf32>
    %152 = arith.maximumf %150, %151 : vector<8x256xf32>
    %153 = arith.truncf %152 : vector<8x256xf32> to vector<8x256xbf16>
    %c0_58 = arith.constant 0 : index
    %c0_59 = arith.constant 0 : index
    %154 = vector.load %arg11[%c0_58, %c0_59] : memref<256x128xbf16, #tpu.memory_space<vmem>>, vector<256x128xbf16>
    %cst_60 = arith.constant dense<0.000000e+00> : vector<8x128xf32>
    %155 = tpu.matmul %153, %154, %cst_60 {dimension_numbers = #tpu.dot_dimension_numbers<[1], [0], [0], [1], [0, 0, 1, 1], [], []>} : vector<8x256xbf16>, vector<256x128xbf16>, vector<8x128xf32> -> vector<8x128xf32>
    %c0_61 = arith.constant 0 : index
    %c0_62 = arith.constant 0 : index
    %156 = vector.load %arg12[%c0_61, %c0_62] : memref<1x128xf32, #tpu.memory_space<vmem>>, vector<1x128xf32>
    %157 = vector.broadcast %156 : vector<1x128xf32> to vector<8x128xf32>
    %158 = arith.addf %155, %157 : vector<8x128xf32>
    %159 = arith.addf %144, %158 : vector<8x128xf32>
    %cst_63 = arith.constant dense<0.000000e+00> : vector<8xf32>
    %160 = vector.multi_reduction <add>, %159, %cst_63 [1] : vector<8x128xf32> to vector<8xf32>
    %161 = vector.shape_cast %160 : vector<8xf32> to vector<8x1xf32>
    %cst_64 = arith.constant 1.280000e+02 : f32
    %162 = vector.broadcast %cst_64 : f32 to vector<8x1xf32>
    %163 = arith.divf %161, %162 : vector<8x1xf32>
    %164 = vector.broadcast %163 : vector<8x1xf32> to vector<8x128xf32>
    %165 = arith.subf %159, %164 : vector<8x128xf32>
    %166 = arith.mulf %165, %165 : vector<8x128xf32>
    %cst_65 = arith.constant dense<0.000000e+00> : vector<8xf32>
    %167 = vector.multi_reduction <add>, %166, %cst_65 [1] : vector<8x128xf32> to vector<8xf32>
    %168 = vector.shape_cast %167 : vector<8xf32> to vector<8x1xf32>
    %cst_66 = arith.constant 1.280000e+02 : f32
    %169 = vector.broadcast %cst_66 : f32 to vector<8x1xf32>
    %170 = arith.divf %168, %169 : vector<8x1xf32>
    %171 = vector.broadcast %163 : vector<8x1xf32> to vector<8x128xf32>
    %172 = arith.subf %159, %171 : vector<8x128xf32>
    %cst_67 = arith.constant 9.99999997E-7 : f32
    %173 = vector.broadcast %cst_67 : f32 to vector<8x1xf32>
    %174 = arith.addf %170, %173 : vector<8x1xf32>
    %175 = math.rsqrt %174 : vector<8x1xf32>
    %176 = vector.broadcast %175 : vector<8x1xf32> to vector<8x128xf32>
    %177 = arith.mulf %172, %176 : vector<8x128xf32>
    %c0_68 = arith.constant 0 : index
    %c0_69 = arith.constant 0 : index
    %178 = vector.load %arg13[%c0_68, %c0_69] : memref<1x128xf32, #tpu.memory_space<vmem>>, vector<1x128xf32>
    %179 = vector.broadcast %178 : vector<1x128xf32> to vector<8x128xf32>
    %180 = arith.mulf %177, %179 : vector<8x128xf32>
    %c0_70 = arith.constant 0 : index
    %c0_71 = arith.constant 0 : index
    %181 = vector.load %arg14[%c0_70, %c0_71] : memref<1x128xf32, #tpu.memory_space<vmem>>, vector<1x128xf32>
    %182 = vector.broadcast %181 : vector<1x128xf32> to vector<8x128xf32>
    %183 = arith.addf %180, %182 : vector<8x128xf32>
    %184 = arith.truncf %183 : vector<8x128xf32> to vector<8x128xbf16>
    %c0_72 = arith.constant 0 : index
    %c0_73 = arith.constant 0 : index
    %c0_74 = arith.constant 0 : index
    %185 = vector.load %arg15[%c0_72, %c0_73, %c0_74] : memref<1x8x128xbf16, #tpu.memory_space<vmem>>, vector<1x8x128xbf16>
    %186 = vector.shape_cast %185 : vector<1x8x128xbf16> to vector<8x128xbf16>
    %187 = vector.shape_cast %184 : vector<8x128xbf16> to vector<1x8x128xbf16>
    tpu.vector_store %arg15[%c0_72, %c0_73, %c0_74], %187 {strides = array<i32>} : memref<1x8x128xbf16, #tpu.memory_space<vmem>>, vector<1x8x128xbf16>,
    return
  }
  func.func @transform_0(%arg0: i32) -> (i32, i32, i32) {
    %c0_i32 = arith.constant 0 : i32
    %c0_i32_0 = arith.constant 0 : i32
    %c0_i32_1 = arith.constant 0 : i32
    return %arg0, %c0_i32, %c0_i32_0 : i32, i32, i32
  }
  func.func @transform_1(%arg0: i32) -> (i32, i32, i32) {
    %c0_i32 = arith.constant 0 : i32
    %c0_i32_0 = arith.constant 0 : i32
    %c0_i32_1 = arith.constant 0 : i32
    return %arg0, %c0_i32, %c0_i32_0 : i32, i32, i32
  }
  func.func @transform_2(%arg0: i32) -> (i32, i32) {
    %c0_i32 = arith.constant 0 : i32
    %c0_i32_0 = arith.constant 0 : i32
    %c0_i32_1 = arith.constant 0 : i32
    return %c0_i32, %c0_i32_0 : i32, i32
  }
  func.func @transform_3(%arg0: i32) -> (i32, i32) {
    %c0_i32 = arith.constant 0 : i32
    %c0_i32_0 = arith.constant 0 : i32
    %c0_i32_1 = arith.constant 0 : i32
    return %c0_i32, %c0_i32_0 : i32, i32
  }
  func.func @transform_4(%arg0: i32) -> (i32, i32) {
    %c0_i32 = arith.constant 0 : i32
    %c0_i32_0 = arith.constant 0 : i32
    %c0_i32_1 = arith.constant 0 : i32
    return %c0_i32, %c0_i32_0 : i32, i32
  }
  func.func @transform_5(%arg0: i32) -> (i32, i32) {
    %c0_i32 = arith.constant 0 : i32
    %c0_i32_0 = arith.constant 0 : i32
    %c0_i32_1 = arith.constant 0 : i32
    return %c0_i32, %c0_i32_0 : i32, i32
  }
  func.func @transform_6(%arg0: i32) -> (i32, i32) {
    %c0_i32 = arith.constant 0 : i32
    %c0_i32_0 = arith.constant 0 : i32
    %c0_i32_1 = arith.constant 0 : i32
    return %c0_i32, %c0_i32_0 : i32, i32
  }
  func.func @transform_7(%arg0: i32) -> (i32, i32) {
    %c0_i32 = arith.constant 0 : i32
    %c0_i32_0 = arith.constant 0 : i32
    %c0_i32_1 = arith.constant 0 : i32
    return %c0_i32, %c0_i32_0 : i32, i32
  }
  func.func @transform_8(%arg0: i32) -> (i32, i32) {
    %c0_i32 = arith.constant 0 : i32
    %c0_i32_0 = arith.constant 0 : i32
    %c0_i32_1 = arith.constant 0 : i32
    return %c0_i32, %c0_i32_0 : i32, i32
  }
  func.func @transform_9(%arg0: i32) -> (i32, i32) {
    %c0_i32 = arith.constant 0 : i32
    %c0_i32_0 = arith.constant 0 : i32
    %c0_i32_1 = arith.constant 0 : i32
    return %c0_i32, %c0_i32_0 : i32, i32
  }
  func.func @transform_10(%arg0: i32) -> (i32, i32) {
    %c0_i32 = arith.constant 0 : i32
    %c0_i32_0 = arith.constant 0 : i32
    %c0_i32_1 = arith.constant 0 : i32
    return %c0_i32, %c0_i32_0 : i32, i32
  }
  func.func @transform_11(%arg0: i32) -> (i32, i32) {
    %c0_i32 = arith.constant 0 : i32
    %c0_i32_0 = arith.constant 0 : i32
    %c0_i32_1 = arith.constant 0 : i32
    return %c0_i32, %c0_i32_0 : i32, i32
  }
  func.func @transform_12(%arg0: i32) -> (i32, i32) {
    %c0_i32 = arith.constant 0 : i32
    %c0_i32_0 = arith.constant 0 : i32
    %c0_i32_1 = arith.constant 0 : i32
    return %c0_i32, %c0_i32_0 : i32, i32
  }
  func.func @transform_13(%arg0: i32) -> (i32, i32) {
    %c0_i32 = arith.constant 0 : i32
    %c0_i32_0 = arith.constant 0 : i32
    %c0_i32_1 = arith.constant 0 : i32
    return %c0_i32, %c0_i32_0 : i32, i32
  }
  func.func @transform_14(%arg0: i32) -> (i32, i32, i32) {
    %c0_i32 = arith.constant 0 : i32
    %c0_i32_0 = arith.constant 0 : i32
    %c0_i32_1 = arith.constant 0 : i32
    return %arg0, %c0_i32, %c0_i32_0 : i32, i32, i32
  }
  func.func @transform_15(%arg0: i32) -> (i32, i32, i32, i32) {
    %c0_i32 = arith.constant 0 : i32
    %c0_i32_0 = arith.constant 0 : i32
    %c0_i32_1 = arith.constant 0 : i32
    %c0_i32_2 = arith.constant 0 : i32
    return %arg0, %c0_i32, %c0_i32_0, %c0_i32_1 : i32, i32, i32, i32
  }
}

module attributes {stable_mosaic.version = 11 : i64} {
  func.func @encoder_layer_kernel(%arg0: i32, %arg1: memref<1x8x128xbf16, #tpu.memory_space<vmem>>, %arg2: memref<1x1x8xf32, #tpu.memory_space<vmem>>, %arg3: memref<128x384xbf16, #tpu.memory_space<vmem>>, %arg4: memref<1x384xf32, #tpu.memory_space<vmem>>, %arg5: memref<128x128xbf16, #tpu.memory_space<vmem>>, %arg6: memref<1x128xf32, #tpu.memory_space<vmem>>, %arg7: memref<1x128xf32, #tpu.memory_space<vmem>>, %arg8: memref<1x128xf32, #tpu.memory_space<vmem>>, %arg9: memref<128x256xbf16, #tpu.memory_space<vmem>>, %arg10: memref<1x256xf32, #tpu.memory_space<vmem>>, %arg11: memref<256x128xbf16, #tpu.memory_space<vmem>>, %arg12: memref<1x128xf32, #tpu.memory_space<vmem>>, %arg13: memref<1x128xf32, #tpu.memory_space<vmem>>, %arg14: memref<1x128xf32, #tpu.memory_space<vmem>>, %arg15: memref<1x8x128xbf16, #tpu.memory_space<vmem>>, %arg16: memref<1x4x8x8xbf16, #tpu.memory_space<vmem>>) attributes {dimension_semantics = [#tpu.dimension_semantics<parallel>], iteration_bounds = array<i64: 2>, scalar_prefetch = 0 : i64, scratch_operands = 0 : i64, tpu.core_type = #tpu.core_type<tc>, window_params = [{transform_indices = @transform_0, window_bounds = array<i64: 1, 8, 128>}, {transform_indices = @transform_1, window_bounds = array<i64: 1, 1, 8>}, {pipeline_mode = #tpu.pipeline_mode<synchronous>, transform_indices = @transform_2, window_bounds = array<i64: 128, 384>}, {pipeline_mode = #tpu.pipeline_mode<synchronous>, transform_indices = @transform_3, window_bounds = array<i64: 1, 384>}, {pipeline_mode = #tpu.pipeline_mode<synchronous>, transform_indices = @transform_4, window_bounds = array<i64: 128, 128>}, {pipeline_mode = #tpu.pipeline_mode<synchronous>, transform_indices = @transform_5, window_bounds = array<i64: 1, 128>}, {pipeline_mode = #tpu.pipeline_mode<synchronous>, transform_indices = @transform_6, window_bounds = array<i64: 1, 128>}, {pipeline_mode = #tpu.pipeline_mode<synchronous>, transform_indices = @transform_7, window_bounds = array<i64: 1, 128>}, {pipeline_mode = #tpu.pipeline_mode<synchronous>, transform_indices = @transform_8, window_bounds = array<i64: 128, 256>}, {pipeline_mode = #tpu.pipeline_mode<synchronous>, transform_indices = @transform_9, window_bounds = array<i64: 1, 256>}, {pipeline_mode = #tpu.pipeline_mode<synchronous>, transform_indices = @transform_10, window_bounds = array<i64: 256, 128>}, {pipeline_mode = #tpu.pipeline_mode<synchronous>, transform_indices = @transform_11, window_bounds = array<i64: 1, 128>}, {pipeline_mode = #tpu.pipeline_mode<synchronous>, transform_indices = @transform_12, window_bounds = array<i64: 1, 128>}, {pipeline_mode = #tpu.pipeline_mode<synchronous>, transform_indices = @transform_13, window_bounds = array<i64: 1, 128>}, {transform_indices = @transform_14, window_bounds = array<i64: 1, 8, 128>}, {transform_indices = @transform_15, window_bounds = array<i64: 1, 4, 8, 8>}]} {
    %c0 = arith.constant 0 : index
    %c0_0 = arith.constant 0 : index
    %c0_1 = arith.constant 0 : index
    %0 = vector.load %arg1[%c0, %c0_0, %c0_1] : memref<1x8x128xbf16, #tpu.memory_space<vmem>>, vector<1x8x128xbf16>
    %1 = vector.shape_cast %0 : vector<1x8x128xbf16> to vector<8x128xbf16>
    %2 = arith.extf %1 : vector<8x128xbf16> to vector<8x128xf32>
    %c0_2 = arith.constant 0 : index
    %c0_3 = arith.constant 0 : index
    %c0_4 = arith.constant 0 : index
    %3 = vector.load %arg2[%c0_2, %c0_3, %c0_4] : memref<1x1x8xf32, #tpu.memory_space<vmem>>, vector<1x1x8xf32>
    %4 = vector.shape_cast %3 : vector<1x1x8xf32> to vector<1x8xf32>
    %c0_5 = arith.constant 0 : index
    %c0_6 = arith.constant 0 : index
    %5 = vector.load %arg3[%c0_5, %c0_6] : memref<128x384xbf16, #tpu.memory_space<vmem>>, vector<128x384xbf16>
    %cst = arith.constant dense<0.000000e+00> : vector<8x384xf32>
    %6 = tpu.matmul %1, %5, %cst {dimension_numbers = #tpu.dot_dimension_numbers<[1], [0], [0], [1], [0, 0, 1, 1], [], []>} : vector<8x128xbf16>, vector<128x384xbf16>, vector<8x384xf32> -> vector<8x384xf32>
    %c0_7 = arith.constant 0 : index
    %c0_8 = arith.constant 0 : index
    %7 = vector.load %arg4[%c0_7, %c0_8] : memref<1x384xf32, #tpu.memory_space<vmem>>, vector<1x384xf32>
    %8 = vector.broadcast %7 : vector<1x384xf32> to vector<8x384xf32>
    %9 = arith.addf %6, %8 : vector<8x384xf32>
    %10 = vector.extract_strided_slice %9 {offsets = [0, 0], sizes = [8, 32], strides = [1, 1]} : vector<8x384xf32> to vector<8x32xf32>
    %11 = arith.truncf %10 : vector<8x32xf32> to vector<8x32xbf16>
    %12 = vector.extract_strided_slice %9 {offsets = [0, 128], sizes = [8, 32], strides = [1, 1]} : vector<8x384xf32> to vector<8x32xf32>
    %13 = arith.truncf %12 : vector<8x32xf32> to vector<8x32xbf16>
    %14 = vector.extract_strided_slice %9 {offsets = [0, 256], sizes = [8, 32], strides = [1, 1]} : vector<8x384xf32> to vector<8x32xf32>
    %15 = arith.truncf %14 : vector<8x32xf32> to vector<8x32xbf16>
    %cst_9 = arith.constant dense<0.000000e+00> : vector<8x8xf32>
    %16 = tpu.matmul %11, %13, %cst_9 {dimension_numbers = #tpu.dot_dimension_numbers<[1], [1], [0], [0], [0, 0, 1, 0], [], []>} : vector<8x32xbf16>, vector<8x32xbf16>, vector<8x8xf32> -> vector<8x8xf32>
    %17 = vector.broadcast %4 : vector<1x8xf32> to vector<8x8xf32>
    %18 = arith.addf %16, %17 : vector<8x8xf32>
    %cst_10 = arith.constant dense<0xFF800000> : vector<8xf32>
    %19 = vector.multi_reduction <maximumf>, %18, %cst_10 [1] : vector<8x8xf32> to vector<8xf32>
    %20 = vector.shape_cast %19 : vector<8xf32> to vector<8x1xf32>
    %21 = vector.broadcast %20 : vector<8x1xf32> to vector<8x8xf32>
    %22 = arith.subf %18, %21 : vector<8x8xf32>
    %23 = math.exp %22 : vector<8x8xf32>
    %cst_11 = arith.constant dense<0.000000e+00> : vector<8xf32>
    %24 = vector.multi_reduction <add>, %23, %cst_11 [1] : vector<8x8xf32> to vector<8xf32>
    %25 = vector.shape_cast %24 : vector<8xf32> to vector<8x1xf32>
    %26 = tpu.reciprocal %25 {approx = true} : vector<8x1xf32> -> vector<8x1xf32>
    %27 = vector.broadcast %26 : vector<8x1xf32> to vector<8x8xf32>
    %28 = arith.mulf %23, %27 : vector<8x8xf32>
    %29 = arith.truncf %28 : vector<8x8xf32> to vector<8x8xbf16>
    %c0_12 = arith.constant 0 : index
    %c0_13 = arith.constant 0 : index
    %c0_14 = arith.constant 0 : index
    %c0_15 = arith.constant 0 : index
    %30 = vector.load %arg16[%c0_12, %c0_13, %c0_14, %c0_15] : memref<1x4x8x8xbf16, #tpu.memory_space<vmem>>, vector<1x1x8x8xbf16>
    %31 = vector.shape_cast %30 : vector<1x1x8x8xbf16> to vector<8x8xbf16>
    %32 = vector.shape_cast %29 : vector<8x8xbf16> to vector<1x1x8x8xbf16>
    tpu.vector_store %arg16[%c0_12, %c0_13, %c0_14, %c0_15], %32 {strides = array<i32>} : memref<1x4x8x8xbf16, #tpu.memory_space<vmem>>, vector<1x1x8x8xbf16>,
    %33 = arith.truncf %28 : vector<8x8xf32> to vector<8x8xbf16>
    %cst_16 = arith.constant dense<0.000000e+00> : vector<8x32xf32>
    %34 = tpu.matmul %33, %15, %cst_16 {dimension_numbers = #tpu.dot_dimension_numbers<[1], [0], [0], [1], [0, 0, 1, 1], [], []>} : vector<8x8xbf16>, vector<8x32xbf16>, vector<8x32xf32> -> vector<8x32xf32>
    %35 = arith.truncf %34 : vector<8x32xf32> to vector<8x32xbf16>
    %36 = vector.extract_strided_slice %9 {offsets = [0, 32], sizes = [8, 32], strides = [1, 1]} : vector<8x384xf32> to vector<8x32xf32>
    %37 = arith.truncf %36 : vector<8x32xf32> to vector<8x32xbf16>
    %38 = vector.extract_strided_slice %9 {offsets = [0, 160], sizes = [8, 32], strides = [1, 1]} : vector<8x384xf32> to vector<8x32xf32>
    %39 = arith.truncf %38 : vector<8x32xf32> to vector<8x32xbf16>
    %40 = vector.extract_strided_slice %9 {offsets = [0, 288], sizes = [8, 32], strides = [1, 1]} : vector<8x384xf32> to vector<8x32xf32>
    %41 = arith.truncf %40 : vector<8x32xf32> to vector<8x32xbf16>
    %cst_17 = arith.constant dense<0.000000e+00> : vector<8x8xf32>
    %42 = tpu.matmul %37, %39, %cst_17 {dimension_numbers = #tpu.dot_dimension_numbers<[1], [1], [0], [0], [0, 0, 1, 0], [], []>} : vector<8x32xbf16>, vector<8x32xbf16>, vector<8x8xf32> -> vector<8x8xf32>
    %43 = vector.broadcast %4 : vector<1x8xf32> to vector<8x8xf32>
    %44 = arith.addf %42, %43 : vector<8x8xf32>
    %cst_18 = arith.constant dense<0xFF800000> : vector<8xf32>
    %45 = vector.multi_reduction <maximumf>, %44, %cst_18 [1] : vector<8x8xf32> to vector<8xf32>
    %46 = vector.shape_cast %45 : vector<8xf32> to vector<8x1xf32>
    %47 = vector.broadcast %46 : vector<8x1xf32> to vector<8x8xf32>
    %48 = arith.subf %44, %47 : vector<8x8xf32>
    %49 = math.exp %48 : vector<8x8xf32>
    %cst_19 = arith.constant dense<0.000000e+00> : vector<8xf32>
    %50 = vector.multi_reduction <add>, %49, %cst_19 [1] : vector<8x8xf32> to vector<8xf32>
    %51 = vector.shape_cast %50 : vector<8xf32> to vector<8x1xf32>
    %52 = tpu.reciprocal %51 {approx = true} : vector<8x1xf32> -> vector<8x1xf32>
    %53 = vector.broadcast %52 : vector<8x1xf32> to vector<8x8xf32>
    %54 = arith.mulf %49, %53 : vector<8x8xf32>
    %55 = arith.truncf %54 : vector<8x8xf32> to vector<8x8xbf16>
    %c0_20 = arith.constant 0 : index
    %c1 = arith.constant 1 : index
    %c0_21 = arith.constant 0 : index
    %c0_22 = arith.constant 0 : index
    %56 = vector.load %arg16[%c0_20, %c1, %c0_21, %c0_22] : memref<1x4x8x8xbf16, #tpu.memory_space<vmem>>, vector<1x1x8x8xbf16>
    %57 = vector.shape_cast %56 : vector<1x1x8x8xbf16> to vector<8x8xbf16>
    %58 = vector.shape_cast %55 : vector<8x8xbf16> to vector<1x1x8x8xbf16>
    tpu.vector_store %arg16[%c0_20, %c1, %c0_21, %c0_22], %58 {strides = array<i32>} : memref<1x4x8x8xbf16, #tpu.memory_space<vmem>>, vector<1x1x8x8xbf16>,
    %59 = arith.truncf %54 : vector<8x8xf32> to vector<8x8xbf16>
    %cst_23 = arith.constant dense<0.000000e+00> : vector<8x32xf32>
    %60 = tpu.matmul %59, %41, %cst_23 {dimension_numbers = #tpu.dot_dimension_numbers<[1], [0], [0], [1], [0, 0, 1, 1], [], []>} : vector<8x8xbf16>, vector<8x32xbf16>, vector<8x32xf32> -> vector<8x32xf32>
    %61 = arith.truncf %60 : vector<8x32xf32> to vector<8x32xbf16>
    %62 = vector.extract_strided_slice %9 {offsets = [0, 64], sizes = [8, 32], strides = [1, 1]} : vector<8x384xf32> to vector<8x32xf32>
    %63 = arith.truncf %62 : vector<8x32xf32> to vector<8x32xbf16>
    %64 = vector.extract_strided_slice %9 {offsets = [0, 192], sizes = [8, 32], strides = [1, 1]} : vector<8x384xf32> to vector<8x32xf32>
    %65 = arith.truncf %64 : vector<8x32xf32> to vector<8x32xbf16>
    %66 = vector.extract_strided_slice %9 {offsets = [0, 320], sizes = [8, 32], strides = [1, 1]} : vector<8x384xf32> to vector<8x32xf32>
    %67 = arith.truncf %66 : vector<8x32xf32> to vector<8x32xbf16>
    %cst_24 = arith.constant dense<0.000000e+00> : vector<8x8xf32>
    %68 = tpu.matmul %63, %65, %cst_24 {dimension_numbers = #tpu.dot_dimension_numbers<[1], [1], [0], [0], [0, 0, 1, 0], [], []>} : vector<8x32xbf16>, vector<8x32xbf16>, vector<8x8xf32> -> vector<8x8xf32>
    %69 = vector.broadcast %4 : vector<1x8xf32> to vector<8x8xf32>
    %70 = arith.addf %68, %69 : vector<8x8xf32>
    %cst_25 = arith.constant dense<0xFF800000> : vector<8xf32>
    %71 = vector.multi_reduction <maximumf>, %70, %cst_25 [1] : vector<8x8xf32> to vector<8xf32>
    %72 = vector.shape_cast %71 : vector<8xf32> to vector<8x1xf32>
    %73 = vector.broadcast %72 : vector<8x1xf32> to vector<8x8xf32>
    %74 = arith.subf %70, %73 : vector<8x8xf32>
    %75 = math.exp %74 : vector<8x8xf32>
    %cst_26 = arith.constant dense<0.000000e+00> : vector<8xf32>
    %76 = vector.multi_reduction <add>, %75, %cst_26 [1] : vector<8x8xf32> to vector<8xf32>
    %77 = vector.shape_cast %76 : vector<8xf32> to vector<8x1xf32>
    %78 = tpu.reciprocal %77 {approx = true} : vector<8x1xf32> -> vector<8x1xf32>
    %79 = vector.broadcast %78 : vector<8x1xf32> to vector<8x8xf32>
    %80 = arith.mulf %75, %79 : vector<8x8xf32>
    %81 = arith.truncf %80 : vector<8x8xf32> to vector<8x8xbf16>
    %c0_27 = arith.constant 0 : index
    %c2 = arith.constant 2 : index
    %c0_28 = arith.constant 0 : index
    %c0_29 = arith.constant 0 : index
    %82 = vector.load %arg16[%c0_27, %c2, %c0_28, %c0_29] : memref<1x4x8x8xbf16, #tpu.memory_space<vmem>>, vector<1x1x8x8xbf16>
    %83 = vector.shape_cast %82 : vector<1x1x8x8xbf16> to vector<8x8xbf16>
    %84 = vector.shape_cast %81 : vector<8x8xbf16> to vector<1x1x8x8xbf16>
    tpu.vector_store %arg16[%c0_27, %c2, %c0_28, %c0_29], %84 {strides = array<i32>} : memref<1x4x8x8xbf16, #tpu.memory_space<vmem>>, vector<1x1x8x8xbf16>,
    %85 = arith.truncf %80 : vector<8x8xf32> to vector<8x8xbf16>
    %cst_30 = arith.constant dense<0.000000e+00> : vector<8x32xf32>
    %86 = tpu.matmul %85, %67, %cst_30 {dimension_numbers = #tpu.dot_dimension_numbers<[1], [0], [0], [1], [0, 0, 1, 1], [], []>} : vector<8x8xbf16>, vector<8x32xbf16>, vector<8x32xf32> -> vector<8x32xf32>
    %87 = arith.truncf %86 : vector<8x32xf32> to vector<8x32xbf16>
    %88 = vector.extract_strided_slice %9 {offsets = [0, 96], sizes = [8, 32], strides = [1, 1]} : vector<8x384xf32> to vector<8x32xf32>
    %89 = arith.truncf %88 : vector<8x32xf32> to vector<8x32xbf16>
    %90 = vector.extract_strided_slice %9 {offsets = [0, 224], sizes = [8, 32], strides = [1, 1]} : vector<8x384xf32> to vector<8x32xf32>
    %91 = arith.truncf %90 : vector<8x32xf32> to vector<8x32xbf16>
    %92 = vector.extract_strided_slice %9 {offsets = [0, 352], sizes = [8, 32], strides = [1, 1]} : vector<8x384xf32> to vector<8x32xf32>
    %93 = arith.truncf %92 : vector<8x32xf32> to vector<8x32xbf16>
    %cst_31 = arith.constant dense<0.000000e+00> : vector<8x8xf32>
    %94 = tpu.matmul %89, %91, %cst_31 {dimension_numbers = #tpu.dot_dimension_numbers<[1], [1], [0], [0], [0, 0, 1, 0], [], []>} : vector<8x32xbf16>, vector<8x32xbf16>, vector<8x8xf32> -> vector<8x8xf32>
    %95 = vector.broadcast %4 : vector<1x8xf32> to vector<8x8xf32>
    %96 = arith.addf %94, %95 : vector<8x8xf32>
    %cst_32 = arith.constant dense<0xFF800000> : vector<8xf32>
    %97 = vector.multi_reduction <maximumf>, %96, %cst_32 [1] : vector<8x8xf32> to vector<8xf32>
    %98 = vector.shape_cast %97 : vector<8xf32> to vector<8x1xf32>
    %99 = vector.broadcast %98 : vector<8x1xf32> to vector<8x8xf32>
    %100 = arith.subf %96, %99 : vector<8x8xf32>
    %101 = math.exp %100 : vector<8x8xf32>
    %cst_33 = arith.constant dense<0.000000e+00> : vector<8xf32>
    %102 = vector.multi_reduction <add>, %101, %cst_33 [1] : vector<8x8xf32> to vector<8xf32>
    %103 = vector.shape_cast %102 : vector<8xf32> to vector<8x1xf32>
    %104 = tpu.reciprocal %103 {approx = true} : vector<8x1xf32> -> vector<8x1xf32>
    %105 = vector.broadcast %104 : vector<8x1xf32> to vector<8x8xf32>
    %106 = arith.mulf %101, %105 : vector<8x8xf32>
    %107 = arith.truncf %106 : vector<8x8xf32> to vector<8x8xbf16>
    %c0_34 = arith.constant 0 : index
    %c3 = arith.constant 3 : index
    %c0_35 = arith.constant 0 : index
    %c0_36 = arith.constant 0 : index
    %108 = vector.load %arg16[%c0_34, %c3, %c0_35, %c0_36] : memref<1x4x8x8xbf16, #tpu.memory_space<vmem>>, vector<1x1x8x8xbf16>
    %109 = vector.shape_cast %108 : vector<1x1x8x8xbf16> to vector<8x8xbf16>
    %110 = vector.shape_cast %107 : vector<8x8xbf16> to vector<1x1x8x8xbf16>
    tpu.vector_store %arg16[%c0_34, %c3, %c0_35, %c0_36], %110 {strides = array<i32>} : memref<1x4x8x8xbf16, #tpu.memory_space<vmem>>, vector<1x1x8x8xbf16>,
    %111 = arith.truncf %106 : vector<8x8xf32> to vector<8x8xbf16>
    %cst_37 = arith.constant dense<0.000000e+00> : vector<8x32xf32>
    %112 = tpu.matmul %111, %93, %cst_37 {dimension_numbers = #tpu.dot_dimension_numbers<[1], [0], [0], [1], [0, 0, 1, 1], [], []>} : vector<8x8xbf16>, vector<8x32xbf16>, vector<8x32xf32> -> vector<8x32xf32>
    %113 = arith.truncf %112 : vector<8x32xf32> to vector<8x32xbf16>
    %114 = tpu.concatenate %35, %61, %87, %113 in 1 : vector<8x32xbf16>, vector<8x32xbf16>, vector<8x32xbf16>, vector<8x32xbf16> -> vector<8x128xbf16>
    %c0_38 = arith.constant 0 : index
    %c0_39 = arith.constant 0 : index
    %115 = vector.load %arg5[%c0_38, %c0_39] : memref<128x128xbf16, #tpu.memory_space<vmem>>, vector<128x128xbf16>
    %cst_40 = arith.constant dense<0.000000e+00> : vector<8x128xf32>
    %116 = tpu.matmul %114, %115, %cst_40 {dimension_numbers = #tpu.dot_dimension_numbers<[1], [0], [0], [1], [0, 0, 1, 1], [], []>} : vector<8x128xbf16>, vector<128x128xbf16>, vector<8x128xf32> -> vector<8x128xf32>
    %c0_41 = arith.constant 0 : index
    %c0_42 = arith.constant 0 : index
    %117 = vector.load %arg6[%c0_41, %c0_42] : memref<1x128xf32, #tpu.memory_space<vmem>>, vector<1x128xf32>
    %118 = vector.broadcast %117 : vector<1x128xf32> to vector<8x128xf32>
    %119 = arith.addf %116, %118 : vector<8x128xf32>
    %120 = arith.addf %2, %119 : vector<8x128xf32>
    %cst_43 = arith.constant dense<0.000000e+00> : vector<8xf32>
    %121 = vector.multi_reduction <add>, %120, %cst_43 [1] : vector<8x128xf32> to vector<8xf32>
    %122 = vector.shape_cast %121 : vector<8xf32> to vector<8x1xf32>
    %cst_44 = arith.constant 1.280000e+02 : f32
    %123 = vector.broadcast %cst_44 : f32 to vector<8x1xf32>
    %124 = arith.divf %122, %123 : vector<8x1xf32>
    %125 = vector.broadcast %124 : vector<8x1xf32> to vector<8x128xf32>
    %126 = arith.subf %120, %125 : vector<8x128xf32>
    %127 = arith.mulf %126, %126 : vector<8x128xf32>
    %cst_45 = arith.constant dense<0.000000e+00> : vector<8xf32>
    %128 = vector.multi_reduction <add>, %127, %cst_45 [1] : vector<8x128xf32> to vector<8xf32>
    %129 = vector.shape_cast %128 : vector<8xf32> to vector<8x1xf32>
    %cst_46 = arith.constant 1.280000e+02 : f32
    %130 = vector.broadcast %cst_46 : f32 to vector<8x1xf32>
    %131 = arith.divf %129, %130 : vector<8x1xf32>
    %132 = vector.broadcast %124 : vector<8x1xf32> to vector<8x128xf32>
    %133 = arith.subf %120, %132 : vector<8x128xf32>
    %cst_47 = arith.constant 9.99999997E-7 : f32
    %134 = vector.broadcast %cst_47 : f32 to vector<8x1xf32>
    %135 = arith.addf %131, %134 : vector<8x1xf32>
    %136 = math.rsqrt %135 : vector<8x1xf32>
    %137 = vector.broadcast %136 : vector<8x1xf32> to vector<8x128xf32>
    %138 = arith.mulf %133, %137 : vector<8x128xf32>
    %c0_48 = arith.constant 0 : index
    %c0_49 = arith.constant 0 : index
    %139 = vector.load %arg7[%c0_48, %c0_49] : memref<1x128xf32, #tpu.memory_space<vmem>>, vector<1x128xf32>
    %140 = vector.broadcast %139 : vector<1x128xf32> to vector<8x128xf32>
    %141 = arith.mulf %138, %140 : vector<8x128xf32>
    %c0_50 = arith.constant 0 : index
    %c0_51 = arith.constant 0 : index
    %142 = vector.load %arg8[%c0_50, %c0_51] : memref<1x128xf32, #tpu.memory_space<vmem>>, vector<1x128xf32>
    %143 = vector.broadcast %142 : vector<1x128xf32> to vector<8x128xf32>
    %144 = arith.addf %141, %143 : vector<8x128xf32>
    %145 = arith.truncf %144 : vector<8x128xf32> to vector<8x128xbf16>
    %c0_52 = arith.constant 0 : index
    %c0_53 = arith.constant 0 : index
    %146 = vector.load %arg9[%c0_52, %c0_53] : memref<128x256xbf16, #tpu.memory_space<vmem>>, vector<128x256xbf16>
    %cst_54 = arith.constant dense<0.000000e+00> : vector<8x256xf32>
    %147 = tpu.matmul %145, %146, %cst_54 {dimension_numbers = #tpu.dot_dimension_numbers<[1], [0], [0], [1], [0, 0, 1, 1], [], []>} : vector<8x128xbf16>, vector<128x256xbf16>, vector<8x256xf32> -> vector<8x256xf32>
    %c0_55 = arith.constant 0 : index
    %c0_56 = arith.constant 0 : index
    %148 = vector.load %arg10[%c0_55, %c0_56] : memref<1x256xf32, #tpu.memory_space<vmem>>, vector<1x256xf32>
    %149 = vector.broadcast %148 : vector<1x256xf32> to vector<8x256xf32>
    %150 = arith.addf %147, %149 : vector<8x256xf32>
    %cst_57 = arith.constant 0.000000e+00 : f32
    %151 = vector.broadcast %cst_57 : f32 to vector<8x256xf32>
    %152 = arith.maximumf %150, %151 : vector<8x256xf32>
    %153 = arith.truncf %152 : vector<8x256xf32> to vector<8x256xbf16>
    %c0_58 = arith.constant 0 : index
    %c0_59 = arith.constant 0 : index
    %154 = vector.load %arg11[%c0_58, %c0_59] : memref<256x128xbf16, #tpu.memory_space<vmem>>, vector<256x128xbf16>
    %cst_60 = arith.constant dense<0.000000e+00> : vector<8x128xf32>
    %155 = tpu.matmul %153, %154, %cst_60 {dimension_numbers = #tpu.dot_dimension_numbers<[1], [0], [0], [1], [0, 0, 1, 1], [], []>} : vector<8x256xbf16>, vector<256x128xbf16>, vector<8x128xf32> -> vector<8x128xf32>
    %c0_61 = arith.constant 0 : index
    %c0_62 = arith.constant 0 : index
    %156 = vector.load %arg12[%c0_61, %c0_62] : memref<1x128xf32, #tpu.memory_space<vmem>>, vector<1x128xf32>
    %157 = vector.broadcast %156 : vector<1x128xf32> to vector<8x128xf32>
    %158 = arith.addf %155, %157 : vector<8x128xf32>
    %159 = arith.addf %144, %158 : vector<8x128xf32>
    %cst_63 = arith.constant dense<0.000000e+00> : vector<8xf32>
    %160 = vector.multi_reduction <add>, %159, %cst_63 [1] : vector<8x128xf32> to vector<8xf32>
    %161 = vector.shape_cast %160 : vector<8xf32> to vector<8x1xf32>
    %cst_64 = arith.constant 1.280000e+02 : f32
    %162 = vector.broadcast %cst_64 : f32 to vector<8x1xf32>
    %163 = arith.divf %161, %162 : vector<8x1xf32>
    %164 = vector.broadcast %163 : vector<8x1xf32> to vector<8x128xf32>
    %165 = arith.subf %159, %164 : vector<8x128xf32>
    %166 = arith.mulf %165, %165 : vector<8x128xf32>
    %cst_65 = arith.constant dense<0.000000e+00> : vector<8xf32>
    %167 = vector.multi_reduction <add>, %166, %cst_65 [1] : vector<8x128xf32> to vector<8xf32>
    %168 = vector.shape_cast %167 : vector<8xf32> to vector<8x1xf32>
    %cst_66 = arith.constant 1.280000e+02 : f32
    %169 = vector.broadcast %cst_66 : f32 to vector<8x1xf32>
    %170 = arith.divf %168, %169 : vector<8x1xf32>
    %171 = vector.broadcast %163 : vector<8x1xf32> to vector<8x128xf32>
    %172 = arith.subf %159, %171 : vector<8x128xf32>
    %cst_67 = arith.constant 9.99999997E-7 : f32
    %173 = vector.broadcast %cst_67 : f32 to vector<8x1xf32>
    %174 = arith.addf %170, %173 : vector<8x1xf32>
    %175 = math.rsqrt %174 : vector<8x1xf32>
    %176 = vector.broadcast %175 : vector<8x1xf32> to vector<8x128xf32>
    %177 = arith.mulf %172, %176 : vector<8x128xf32>
    %c0_68 = arith.constant 0 : index
    %c0_69 = arith.constant 0 : index
    %178 = vector.load %arg13[%c0_68, %c0_69] : memref<1x128xf32, #tpu.memory_space<vmem>>, vector<1x128xf32>
    %179 = vector.broadcast %178 : vector<1x128xf32> to vector<8x128xf32>
    %180 = arith.mulf %177, %179 : vector<8x128xf32>
    %c0_70 = arith.constant 0 : index
    %c0_71 = arith.constant 0 : index
    %181 = vector.load %arg14[%c0_70, %c0_71] : memref<1x128xf32, #tpu.memory_space<vmem>>, vector<1x128xf32>
    %182 = vector.broadcast %181 : vector<1x128xf32> to vector<8x128xf32>
    %183 = arith.addf %180, %182 : vector<8x128xf32>
    %184 = arith.truncf %183 : vector<8x128xf32> to vector<8x128xbf16>
    %c0_72 = arith.constant 0 : index
    %c0_73 = arith.constant 0 : index
    %c0_74 = arith.constant 0 : index
    %185 = vector.load %arg15[%c0_72, %c0_73, %c0_74] : memref<1x8x128xbf16, #tpu.memory_space<vmem>>, vector<1x8x128xbf16>
    %186 = vector.shape_cast %185 : vector<1x8x128xbf16> to vector<8x128xbf16>
    %187 = vector.shape_cast %184 : vector<8x128xbf16> to vector<1x8x128xbf16>
    tpu.vector_store %arg15[%c0_72, %c0_73, %c0_74], %187 {strides = array<i32>} : memref<1x8x128xbf16, #tpu.memory_space<vmem>>, vector<1x8x128xbf16>,
    return
  }
  func.func @transform_0(%arg0: i32) -> (i32, i32, i32) {
    %c0_i32 = arith.constant 0 : i32
    %c0_i32_0 = arith.constant 0 : i32
    %c0_i32_1 = arith.constant 0 : i32
    return %arg0, %c0_i32, %c0_i32_0 : i32, i32, i32
  }
  func.func @transform_1(%arg0: i32) -> (i32, i32, i32) {
    %c0_i32 = arith.constant 0 : i32
    %c0_i32_0 = arith.constant 0 : i32
    %c0_i32_1 = arith.constant 0 : i32
    return %arg0, %c0_i32, %c0_i32_0 : i32, i32, i32
  }
  func.func @transform_2(%arg0: i32) -> (i32, i32) {
    %c0_i32 = arith.constant 0 : i32
    %c0_i32_0 = arith.constant 0 : i32
    %c0_i32_1 = arith.constant 0 : i32
    return %c0_i32, %c0_i32_0 : i32, i32
  }
  func.func @transform_3(%arg0: i32) -> (i32, i32) {
    %c0_i32 = arith.constant 0 : i32
    %c0_i32_0 = arith.constant 0 : i32
    %c0_i32_1 = arith.constant 0 : i32
    return %c0_i32, %c0_i32_0 : i32, i32
  }
  func.func @transform_4(%arg0: i32) -> (i32, i32) {
    %c0_i32 = arith.constant 0 : i32
    %c0_i32_0 = arith.constant 0 : i32
    %c0_i32_1 = arith.constant 0 : i32
    return %c0_i32, %c0_i32_0 : i32, i32
  }
  func.func @transform_5(%arg0: i32) -> (i32, i32) {
    %c0_i32 = arith.constant 0 : i32
    %c0_i32_0 = arith.constant 0 : i32
    %c0_i32_1 = arith.constant 0 : i32
    return %c0_i32, %c0_i32_0 : i32, i32
  }
  func.func @transform_6(%arg0: i32) -> (i32, i32) {
    %c0_i32 = arith.constant 0 : i32
    %c0_i32_0 = arith.constant 0 : i32
    %c0_i32_1 = arith.constant 0 : i32
    return %c0_i32, %c0_i32_0 : i32, i32
  }
  func.func @transform_7(%arg0: i32) -> (i32, i32) {
    %c0_i32 = arith.constant 0 : i32
    %c0_i32_0 = arith.constant 0 : i32
    %c0_i32_1 = arith.constant 0 : i32
    return %c0_i32, %c0_i32_0 : i32, i32
  }
  func.func @transform_8(%arg0: i32) -> (i32, i32) {
    %c0_i32 = arith.constant 0 : i32
    %c0_i32_0 = arith.constant 0 : i32
    %c0_i32_1 = arith.constant 0 : i32
    return %c0_i32, %c0_i32_0 : i32, i32
  }
  func.func @transform_9(%arg0: i32) -> (i32, i32) {
    %c0_i32 = arith.constant 0 : i32
    %c0_i32_0 = arith.constant 0 : i32
    %c0_i32_1 = arith.constant 0 : i32
    return %c0_i32, %c0_i32_0 : i32, i32
  }
  func.func @transform_10(%arg0: i32) -> (i32, i32) {
    %c0_i32 = arith.constant 0 : i32
    %c0_i32_0 = arith.constant 0 : i32
    %c0_i32_1 = arith.constant 0 : i32
    return %c0_i32, %c0_i32_0 : i32, i32
  }
  func.func @transform_11(%arg0: i32) -> (i32, i32) {
    %c0_i32 = arith.constant 0 : i32
    %c0_i32_0 = arith.constant 0 : i32
    %c0_i32_1 = arith.constant 0 : i32
    return %c0_i32, %c0_i32_0 : i32, i32
  }
  func.func @transform_12(%arg0: i32) -> (i32, i32) {
    %c0_i32 = arith.constant 0 : i32
    %c0_i32_0 = arith.constant 0 : i32
    %c0_i32_1 = arith.constant 0 : i32
    return %c0_i32, %c0_i32_0 : i32, i32
  }
  func.func @transform_13(%arg0: i32) -> (i32, i32) {
    %c0_i32 = arith.constant 0 : i32
    %c0_i32_0 = arith.constant 0 : i32
    %c0_i32_1 = arith.constant 0 : i32
    return %c0_i32, %c0_i32_0 : i32, i32
  }
  func.func @transform_14(%arg0: i32) -> (i32, i32, i32) {
    %c0_i32 = arith.constant 0 : i32
    %c0_i32_0 = arith.constant 0 : i32
    %c0_i32_1 = arith.constant 0 : i32
    return %arg0, %c0_i32, %c0_i32_0 : i32, i32, i32
  }
  func.func @transform_15(%arg0: i32) -> (i32, i32, i32, i32) {
    %c0_i32 = arith.constant 0 : i32
    %c0_i32_0 = arith.constant 0 : i32
    %c0_i32_1 = arith.constant 0 : i32
    %c0_i32_2 = arith.constant 0 : i32
    return %arg0, %c0_i32, %c0_i32_0, %c0_i32_1 : i32, i32, i32, i32
  }
}

</mosaic_0001>

<bundles_post_ra>
// kernel: tpu_custom_call.1
= control target key start
LH: loop header
LB: loop body
LE: loop exit
PB: predicated region body
PF: predicated region fallthrough
CT: control target
= control target key end

     0   :  { %7 = vsyncpa [#allocation3], 0  ;;  %s635_s0 = inlined_call_operand.hbm [shape: f32[8,128], index: 0, kind: input, shape index: {}]   ;;  %s636_s1 = inlined_call_operand.hbm [shape: f32[2,8,128], index: 1, kind: input, shape index: {}]   ;;  %s637_s2 = inlined_call_operand.hbm [shape: f32[2,8,128], index: 2, kind: output, shape index: {}]  }
   0x1   :  { %8 = vsyncpa [#allocation6], 0 }
   0x2   :  { %10 = vsyncpa [#allocation6 + $0x1], 0 }
   0x3   :  { %11 = vsyncpa [#allocation4], 0 }
   0x4   :  { %13 = vsyncpa [#allocation4 + $0x1], 0  ;;  %s497_s9 = smov 0   ;;  %s499_s10 = smov 0  }
   0x5   :  { %s501_s11 = smov 0   ;;  %s503_s12 = smov 0  }
   0x6 LB: > { %s518_s13 = sadd.s32 4294967295, %s479_s12   ;;  %s278_s14 = sadd.s32 4294967294, %s479_s12   ;;  %s479_s12 = sphi %s503_s12, %s647_s12   ;;  %s475_s11 = sphi %s501_s11, %s646_s11   ;;  %s471_s10 = sphi %s499_s10, %s645_s10   ;;  %s467_s9 = sphi %s497_s9, %s644_s9  }
   0x7   : > { %p60_p0 = scmp.ne.s32.totalorder %s471_s10, %s467_s9  ;;  %p61_p1 = scmp.eq.s32.totalorder %s518_s13, 0 }
   0x8   : > { %p84_p2 = scmp.eq.s32.totalorder %s518_s13, 1  ;;  %p90_p3 = scmp.eq.s32.totalorder %s278_s14, 1 }
   0x9   : > { %p527_p4 = por %p61_p1, %p60_p0  ;;  %p279_p5 = scmp.ge.s32.totalorder %s479_s12, 1 }
   0xa   : > { %p532_p6 = por %p90_p3, %p60_p0  ;;  %p97_p7 = scmp.lt.s32.totalorder %s479_s12, 3 }
   0xb   : > { %s109_s19 = sshll.u32 %s635_s0, 4  ;;  %s481_s21 = smov [#allocation2]   ;;  %s110_s19 = int_to_ptr.hbm [resolvable:$true] %s109_s19 }
   0xc   : > { %p540_p8 = pnand %p279_p5, %p97_p7  ;;  %s111_s22 = sshll.u32 %s481_s21, 4  ;;  %s112_s22 = int_to_ptr.vmem [resolvable:$true] %s111_s22 }
   0xd   : > { %s550_s23 = sadd.s32 1, %s479_s12   ;;  %s47_s24 = sadd.s32 1, %s475_s11 }
   0xe   : > { %p300_p10 = pneg %p540_p8  ;;  %s44_s25 = ssub.s32 %s479_s12, %s550_s23 }
   0xf   : > { %p45_p12 = scmp.eq.s32.totalorder %s44_s25, 0  ;;  %p54_p13 = scmp.ne.s32.totalorder %s475_s11, %s471_s10 }
  0x10   : > { %p301_p11 = pnand %p300_p10, %p61_p1  ;;  %p55_p0 = scmp.eq.s32.totalorder %s479_s12, 0 }
  0x11   : > { %s559_s26 = scalar_select %p45_p12, %s475_s11, %s47_s24  }
  0x12   : > { %303 = dma.hbm_to_vmem [thread:$0]  (!%p301_p11), %s110_s19, 128, %s112_s22, [#allocation3]  }
  0x13   : > { %p563_p3 = por %p84_p2, %p54_p13  ;;  %p313_p5 = scmp.lt.s32.totalorder %s479_s12, 2 }
  0x14   : > { %s122_s28 = sand.u32 1, %s475_s11   ;;  %s283_s29 = sshll.u32 %s479_s12, 3 }
  0x15   : > { %p56_p7 = por %p55_p0, %p54_p13  ;;  %s282_s30 = sshll.u32 %s122_s28, 3 }
  0x16   : > { %s130_s5 = scalar_lea.hbm %s636_s1, %s283_s29  ;;  %s126_s7 = scalar_lea.vmem [#allocation5], %s282_s30 }
  0x17   : > { %s132_s6 = sshll.u32 %s130_s5, 4  ;;  %s134_s8 = sshll.u32 %s126_s7, 4  ;;  %s133_s6 = int_to_ptr.hbm [resolvable:$true] %s132_s6  ;;  %s135_s8 = int_to_ptr.vmem [resolvable:$true] %s134_s8 }
  0x18   : > { %p573_p10 = pnand %p313_p5, %p56_p7  ;;  %s123_s17 = scalar_lea.sflag [#allocation6], %s122_s28 }
  0x19   : > { %s379_s18 = sshra.s32 %s133_s6, 4  ;;  %s386_s24 = scalar_lea.hbm %s636_s1, 16  ;;  %s380_s18 = int_to_ptr.hbm [resolvable:$true] %s379_s18 }
  0x1a   : > { %s381_s19 = scalar_lea.hbm %s380_s18, 8  ;;  %p383_p11 = pneg %p573_p10 }
  0x1b   : > { %p382_p2 = scmp.ne.s32.totalorder %s380_s18, %s381_s19  ;;  %p387_p0 = scmp.lt.s32.totalorder %s380_s18, %s636_s1 }
  0x1c   : > { %p388_p5 = scmp.lt.s32.totalorder %s386_s24, %s381_s19 }
  0x1d   : > { %p384_p12 = pnand %p383_p11, %p382_p2 }
  0x1e   : > { %p389_p7 = por %p388_p5, %p387_p0 }
  0x1f   : > { %p385_p13 = pneg %p384_p12 }
  0x21   : > { %p390_p9 = pnand %p389_p7, %p385_p13 }
  0x23   : > { %393 = shalt.err (!%p390_p9)
}
  0x24   : > { %307 = dma.hbm_to_vmem [thread:$0]  (!%p573_p10), %s133_s6, 128, %s135_s8, %s123_s17  }
  0x25   : > { %143 = sbr.rel (%p540_p8) target bundleno = 62 (0x3e), region = 28 }
  0x2a   : > { %454 = dma.done.wait (%p61_p1), [#allocation3], 128  }
  0x2b   : > { %456 = vsyncadd (%p61_p1), [#allocation3], 4294967168  ;;  %s594_s28 = sand.u32 1, %s471_s10  }
  0x2c   : > { %s286_s30 = sshll.u32 %s594_s28, 3  ;;  %s151_s3 = scalar_lea.sflag [#allocation6], %s594_s28 }
  0x2d   : > { %s154_s4 = scalar_lea.vmem [#allocation5], %s286_s30 }
  0x2e   : > { %458 = dma.done.wait (%p527_p4), %s151_s3, 128  }
  0x2f   : > { %460 = vsyncadd (%p527_p4), %s151_s3, 4294967168  ;;  %s289_s20 = sshll.u32 %s518_s13, 3  ;;  %s175_s8 = scalar_lea.vmem [#allocation7], %s286_s30  ;;  %v176_v0 = vld [vmem:[%s154_s4] sm:$0xff]  ;;  %v177_v1 = vld [vmem:[#allocation2] sm:$0xff] }
  0x30   : > { %s191_s7 = scalar_lea.hbm %s637_s2, %s289_s20  ;;  %s193_s14 = sshll.u32 %s175_s8, 4  ;;  %v178_v2 = vadd.f32 %v177_v1, %v176_v0  ;;  %s194_s14 = int_to_ptr.vmem [resolvable:$true] %s193_s14 }
  0x31   : > { %s195_s17 = sshll.u32 %s191_s7, 4  ;;  %s181_s18 = scalar_lea.sflag [#allocation4], %s594_s28  ;;  %s196_s17 = int_to_ptr.hbm [resolvable:$true] %s195_s17 }
  0x32   : > { %179 = vst [vmem:[%s175_s8] sm:$0xff] %v178_v2  ;;  %s423_s15 = sshra.s32 %s196_s17, 4  ;;  %s429_s22 = scalar_lea.hbm %s637_s2, 16  ;;  %s424_s15 = int_to_ptr.hbm [resolvable:$true] %s423_s15 }
  0x33   : > { %s425_s19 = scalar_lea.hbm %s424_s15, 8  ;;  %p430_p9 = scmp.lt.s32.totalorder %s424_s15, %s637_s2 }
  0x34   : > { %p426_p1 = scmp.ne.s32.totalorder %s424_s15, %s425_s19  ;;  %p431_p10 = scmp.lt.s32.totalorder %s429_s22, %s425_s19 }
  0x36   : > { %p427_p4 = pnand %p426_p1, %p563_p3  ;;  %p432_p2 = por %p431_p10, %p430_p9 }
  0x38   : > { %p428_p8 = pneg %p427_p4 }
  0x3a   : > { %p433_p11 = pnand %p432_p2, %p428_p8 }
  0x3c   : > { %436 = shalt.err (!%p433_p11)
}
  0x3d   : > { %298 = dma.vmem_to_hbm [thread:$0]  (%p563_p3), %s194_s14, 128, %s196_s17, %s181_s18  }
  0x3e PF: > { %s207_s29 = sand.u32 1, %s467_s9   ;;  %p643_p12 = scmp.ge.s32.totalorder %s479_s12, 2 }
  0x3f   : > { %s208_s28 = scalar_lea.sflag [#allocation4], %s207_s29 }
  0x40   : > { %p309_p13 = pnand %p643_p12, %p532_p6 }
  0x42   : > { %p310_p0 = pneg %p309_p13 }
  0x44   : > { %462 = dma.done.wait (%p310_p0), %s208_s28, 128  }
  0x45   : > { %464 = vsyncadd (%p310_p0), %s208_s28, 4294967168  ;;  %p16_p5 = scmp.ge.s32.totalorder %s550_s23, 4   ;;  %s644_s9 = smov %s471_s10 }
  0x46   : > { %s645_s10 = smov %s475_s11  ;;  %s646_s11 = smov %s559_s26 }
  0x47   : > { %s647_s12 = smov %s550_s23  ;;  %18 = sbr.rel (!%p16_p5) target bundleno = 6 (0x6), region = 78 }
  0x4c   :  { %214 = vsyncpa [#allocation3], 1 }
  0x4d   :  { %216 = vsyncpa [#allocation3 + $0x1], 1 }
  0x4e   :  { %217 = vsyncpa [#allocation6], 1 }
  0x4f   :  { %219 = vsyncpa [#allocation6 + $0x1], 1 }
  0x50   :  { %220 = vsyncpa [#allocation4], 1 }
  0x51   :  { %222 = vsyncpa [#allocation4 + $0x1], 1 }

// kernel: transformer_encoder.3
= control target key start
LH: loop header
LB: loop body
LE: loop exit
PB: predicated region body
PF: predicated region fallthrough
CT: control target
= control target key end

     0   :  { %s2678_s0 = inlined_call_operand.vmem [shape: bf16[2,8,128], index: 0, kind: input, shape index: {}, may-alias: {0,14}]   ;;  %s2679_s1 = inlined_call_operand.vmem [shape: f32[2,1,8], index: 1, kind: input, shape index: {}]   ;;  %s2680_s2 = inlined_call_operand.hbm [shape: bf16[128,384], index: 2, kind: input, shape index: {}]   ;;  %s2681_s3 = inlined_call_operand.vmem [shape: f32[1,384], index: 3, kind: input, shape index: {}]   ;;  %s2682_s4 = inlined_call_operand.hbm [shape: bf16[128,128], index: 4, kind: input, shape index: {}]   ;;  %s2683_s5 = inlined_call_operand.vmem [shape: f32[1,128], index: 5, kind: input, shape index: {}]   ;;  %s2684_s6 = inlined_call_operand.vmem [shape: f32[1,128], index: 6, kind: input, shape index: {}]   ;;  %s2685_s7 = inlined_call_operand.vmem [shape: f32[1,128], index: 7, kind: input, shape index: {}]   ;;  %s2686_s8 = inlined_call_operand.hbm [shape: bf16[128,256], index: 8, kind: input, shape index: {}]   ;;  %s2687_s9 = inlined_call_operand.vmem [shape: f32[1,256], index: 9, kind: input, shape index: {}]   ;;  %s2688_s10 = inlined_call_operand.hbm [shape: bf16[256,128], index: 10, kind: input, shape index: {}]   ;;  %s2689_s11 = inlined_call_operand.vmem [shape: f32[1,128], index: 11, kind: input, shape index: {}]   ;;  %s2690_s12 = inlined_call_operand.vmem [shape: f32[1,128], index: 12, kind: input, shape index: {}]   ;;  %s2691_s13 = inlined_call_operand.vmem [shape: f32[1,128], index: 13, kind: input, shape index: {}]   ;;  %s2692_s14 = inlined_call_operand.vmem [shape: bf16[2,8,128], index: 14, kind: output, shape index: {0}, may-alias: {0,14}]   ;;  %s2693_s15 = inlined_call_operand.hbm [shape: bf16[2,4,8,8], index: 15, kind: output, shape index: {1}]  }
   0x1   :  { %2703 = sst [smem:[#allocation22_spill]] %s2680_s2 }
   0x2   :  { %2704 = sst [smem:[#allocation23_spill]] %s2682_s4 }
   0x3   :  { %2705 = sst [smem:[#allocation24_spill]] %s2689_s11 }
   0x4   :  { %2706 = sst [smem:[#allocation25_spill]] %s2690_s12 }
   0x5   :  { %2707 = sst [smem:[#allocation26_spill]] %s2691_s13 }
   0x6   :  { %2708 = sst [smem:[#allocation27_spill]] %s2692_s14 }
   0x7   :  { %2709 = sst [smem:[#allocation28_spill]] %s2693_s15 }
   0x8   :  { %21 = vsyncpa [#allocation3], 0 }
   0x9   :  { %22 = vsyncpa [#allocation6], 0 }
   0xa   :  { %23 = vsyncpa [#allocation9], 0 }
   0xb   :  { %24 = vsyncpa [#allocation4], 0 }
   0xc   :  { %26 = vsyncpa [#allocation4 + $0x1], 0  ;;  %s2425_s18 = smov 0   ;;  %s2427_s19 = smov 0  }
   0xd   :  { %s2429_s20 = smov 0   ;;  %s2431_s21 = smov 0  }
   0xe LB: > { %2710 = sst [smem:[#allocation15_spill]] %s2316_s18  ;;  %s2446_s22 = sadd.s32 4294967295, %s2328_s21   ;;  %s2328_s21 = sphi %s2431_s21, %s2732_s21   ;;  %s2324_s20 = sphi %s2429_s20, %s2734_s20   ;;  %s2320_s19 = sphi %s2427_s19, %s2736_s19   ;;  %s2316_s18 = sphi %s2425_s18, %s2735_s18  }
   0xf   : > { %2711 = sst [smem:[#allocation16_spill]] %s2324_s20  ;;  %s1662_s23 = sadd.s32 4294967294, %s2328_s21  }
  0x10   : > { %2712 = sst [smem:[#allocation17_spill]] %s2328_s21  ;;  %s2450_s24 = sadd.s32 1, %s2328_s21  }
  0x11   : > { %2713 = sst [smem:[#allocation18_spill]] %s2450_s24  ;;  %s369_s25 = sadd.s32 1, %s2324_s20 }
  0x12   : > { %s366_s26 = ssub.s32 %s2328_s21, %s2450_s24  ;;  %p379_p0 = scmp.ne.s32.totalorder %s2324_s20, %s2320_s19 }
  0x13   : > { %p367_p1 = scmp.eq.s32.totalorder %s366_s26, 0  ;;  %p380_p2 = scmp.eq.s32.totalorder %s2446_s22, 1 }
  0x14   : > { %p385_p3 = scmp.ne.s32.totalorder %s2320_s19, %s2316_s18  ;;  %p386_p4 = scmp.eq.s32.totalorder %s1662_s23, 1 }
  0x15   : > { %s2461_s27 = scalar_select %p367_p1, %s2324_s20, %s369_s25  }
  0x16   : > { %p2463_p5 = por %p380_p2, %p379_p0  ;;  %p2467_p6 = por %p386_p4, %p385_p3 }
  0x17   : > { %2714 = sst [smem:[#allocation19_spill]] %s2461_s27  ;;  %p1663_p7 = scmp.ge.s32.totalorder %s2328_s21, 1 }
  0x18   : > { %s2715_s28 = scalar_select %p2463_p5, 1, 0 }
  0x19   : > { %s2717_s29 = scalar_select %p2467_p6, 1, 0 }
  0x1a   : > { %2716 = sst [smem:[#allocation20_spill]] %s2715_s28  ;;  %p393_p8 = scmp.lt.s32.totalorder %s2328_s21, 3 }
  0x1b   : > { %2718 = sst [smem:[#allocation21_spill]] %s2717_s29  ;;  %p2049_p9 = scmp.eq.s32.totalorder %s2446_s22, 0 }
  0x1c   : > { %p2474_p10 = pnand %p1663_p7, %p393_p8  ;;  %s2720_s4 = sld [smem:[#allocation23_spill]] }
  0x1d   : > { %s2330_s25 = smov [#allocation5]   ;;  %s2722_s2 = sld [smem:[#allocation22_spill]] }
  0x1e   : > { %p2032_p11 = pneg %p2474_p10  ;;  %s423_s26 = sshll.u32 %s2330_s25, 4  ;;  %s424_s26 = int_to_ptr.vmem [resolvable:$true] %s423_s26 }
  0x1f   : > { %s2331_s16 = smov 64   ;;  %s2332_s17 = smov 4  }
  0x20   : > { %p2485_p12 = pnand %p2049_p9, %p2032_p11  ;;  %s2334_s18 = smov 192  }
  0x21   : > { %s2335_s21 = smov 12   ;;  %s444_s20 = sshll.u32 %s2686_s8, 4  ;;  %s445_s20 = int_to_ptr.hbm [resolvable:$true] %s444_s20 }
  0x22   : > { %s421_s23 = sshll.u32 %s2720_s4, 4  ;;  %s2333_s4 = smov [#allocation2]   ;;  %s422_s23 = int_to_ptr.hbm [resolvable:$true] %s421_s23 }
  0x23   : > { %s404_s29 = sshll.u32 %s2722_s2, 4  ;;  %s406_s25 = sshll.u32 %s2333_s4, 4  ;;  %s405_s29 = int_to_ptr.hbm [resolvable:$true] %s404_s29  ;;  %s407_s25 = int_to_ptr.vmem [resolvable:$true] %s406_s25 }
  0x24   : > { %2038 = dma.hbm_to_vmem [thread:$0]  (!%p2485_p12), %s422_s23, 1024, %s424_s26, [#allocation6], %s2331_s16, %s2331_s16, %s2332_s17  }
  0x25   : > { %2035 = dma.hbm_to_vmem [thread:$0]  (!%p2485_p12), %s405_s29, 3072, %s407_s25, [#allocation3], %s2334_s18, %s2334_s18, %s2335_s21  }
  0x26   : > { %s2336_s24 = smov [#allocation7]   ;;  %s461_s23 = sshll.u32 %s2688_s10, 4  ;;  %s462_s23 = int_to_ptr.hbm [resolvable:$true] %s461_s23 }
  0x27   : > { %s446_s2 = sshll.u32 %s2336_s24, 4  ;;  %s2337_s26 = smov 128   ;;  %s447_s2 = int_to_ptr.vmem [resolvable:$true] %s446_s2 }
  0x28   : > { %s2338_s4 = smov 8   ;;  %s2339_s28 = smov [#allocation8]  }
  0x29   : > { %2041 = dma.hbm_to_vmem [thread:$0]  (!%p2485_p12), %s445_s20, 2048, %s447_s2, [#allocation6], %s2337_s26, %s2337_s26, %s2338_s4  }
  0x2a   : > { %s463_s11 = sshll.u32 %s2339_s28, 4  ;;  %501 = sbr.rel (%p2474_p10) target bundleno = 2240 (0x8c0), region = 76  ;;  %s464_s11 = int_to_ptr.vmem [resolvable:$true] %s463_s11 }
  0x2b   : > { %2044 = dma.hbm_to_vmem [thread:$0]  (!%p2485_p12), %s462_s23, 2048, %s464_s11, [#allocation9], %s2331_s16, %s2331_s16, %s2332_s17  }
  0x2f   : > { %2299 = dma.done.wait (%p2049_p9), [#allocation3], 3072  }
  0x30   : > { %2301 = vsyncadd (%p2049_p9), [#allocation3], 4294964224 }
  0x31   : > { %2303 = dma.done.wait (%p2049_p9), [#allocation6], 3072  }
  0x32   : > { %2305 = vsyncadd (%p2049_p9), [#allocation6], 4294964224 }
  0x33   : > { %2307 = dma.done.wait (%p2049_p9), [#allocation9], 2048  }
  0x34   : > { %2309 = vsyncadd (%p2049_p9), [#allocation9], 4294965248  ;;  %v1763_v0 = vld [vmem:[#allocation2 + $0xa8] sm:$0xf]  ;;  %v1971_v1 = vld [vmem:[#allocation2 + $0xb0] sm:$0xf0] }
  0x35   : > { %v1970_v2 = vld [vmem:[#allocation2 + $0xac] sm:$0xf]  ;;  %v1764_v3 = vor.u32 %v1971_v1, %v1763_v0  ;;  %v1765_v4 = vld [vmem:[#allocation2 + $0xb4] sm:$0xf0]  ;;  %v1751_v5 = vld [vmem:[#allocation2 + $0x90] sm:$0xf] }
  0x36   : > { %v1968_v6 = vld [vmem:[#allocation2 + $0x98] sm:$0xf0]  ;;  %v1768_v7 = vor.u32 %v1970_v2, %v1765_v4  ;;  %v1967_v8 = vld [vmem:[#allocation2 + $0x94] sm:$0xf]  ;;  %v1753_v9 = vld [vmem:[#allocation2 + $0x9c] sm:$0xf0] }
  0x37   : > { %754 = vmatpush.bf16.msra.mxu0 %v1764_v3  ;;  %v1752_v10 = vor.u32 %v1968_v6, %v1751_v5  ;;  %v1756_v11 = vor.u32 %v1967_v8, %v1753_v9  ;;  %v1739_v12 = vld [vmem:[#allocation2 + $0x78] sm:$0xf]  ;;  %v1965_v13 = vld [vmem:[#allocation2 + $0x80] sm:$0xf0]  ;;  %v1964_v14 = vld [vmem:[#allocation2 + $0x7c] sm:$0xf] }
  0x38   : > { %767 = vmatpush.bf16.msra.mxu1 %v1768_v7  ;;  %v1741_v15 = vld [vmem:[#allocation2 + $0x84] sm:$0xf0]  ;;  %v1740_v16 = vor.u32 %v1965_v13, %v1739_v12  ;;  %v1727_v18 = vld [vmem:[#allocation2 + $0x60] sm:$0xf]  ;;  %v1962_v19 = vld [vmem:[#allocation2 + $0x68] sm:$0xf0] }
  0x39   : > { %v1744_v17 = vor.u32 %v1964_v14, %v1741_v15  ;;  %v1961_v20 = vld [vmem:[#allocation2 + $0x64] sm:$0xf]  ;;  %v1729_v21 = vld [vmem:[#allocation2 + $0x6c] sm:$0xf0]  ;;  %v1728_v22 = vor.u32 %v1962_v19, %v1727_v18  ;;  %v1972_v24 = vld [vmem:[#allocation2 + $0xb8] sm:$0xf0] }
  0x3a   : > { %v1771_v23 = vld [vmem:[#allocation2 + $0xb0] sm:$0xf]  ;;  %v1759_v25 = vld [vmem:[#allocation2 + $0x98] sm:$0xf]  ;;  %v1732_v26 = vor.u32 %v1961_v20, %v1729_v21  ;;  %v1715_v27 = vld [vmem:[#allocation2 + $0x48] sm:$0xf] }
  0x3b   : > { %755 = vmatpush.bf16.msra.mxu0 %v1752_v10  ;;  %v1959_v28 = vld [vmem:[#allocation2 + $0x50] sm:$0xf0]  ;;  %v1772_v29 = vor.u32 %v1972_v24, %v1771_v23  ;;  %v1969_v30 = vld [vmem:[#allocation2 + $0xa0] sm:$0xf0]  ;;  %v1958_v31 = vld [vmem:[#allocation2 + $0x4c] sm:$0xf] }
  0x3c   : > { %768 = vmatpush.bf16.msra.mxu1 %v1756_v11  ;;  %v1717_v32 = vld [vmem:[#allocation2 + $0x54] sm:$0xf0]  ;;  %p571_p13 = scmp.lt.s32.totalorder %s2446_s22, 1  ;;  %v1760_v33 = vor.u32 %v1969_v30, %v1759_v25  ;;  %v1716_v34 = vor.u32 %v1959_v28, %v1715_v27  ;;  %v1703_v35 = vld [vmem:[#allocation2 + $0x30] sm:$0xf]  ;;  %vm799_vm0 = vcmask 261120  }
  0x3d   : > { %780 = vmatpush.bf16.msra.mxu2 %v1772_v29  ;;  %v1747_v36 = vld [vmem:[#allocation2 + $0x80] sm:$0xf]  ;;  %v1966_v37 = vld [vmem:[#allocation2 + $0x88] sm:$0xf0]  ;;  %v1720_v38 = vor.u32 %v1958_v31, %v1717_v32  ;;  %v1956_v39 = vld [vmem:[#allocation2 + $0x38] sm:$0xf0] }
  0x3e   : > { %v1955_v40 = vld [vmem:[#allocation2 + $0x34] sm:$0xf]  ;;  %v1705_v41 = vld [vmem:[#allocation2 + $0x3c] sm:$0xf0]  ;;  %v1748_v42 = vor.u32 %v1966_v37, %v1747_v36  ;;  %v1704_v43 = vor.u32 %v1956_v39, %v1703_v35  ;;  %v1735_v44 = vld [vmem:[#allocation2 + $0x68] sm:$0xf] }
  0x3f   : > { %756 = vmatpush.bf16.msra.mxu0 %v1740_v16  ;;  %v1963_v45 = vld [vmem:[#allocation2 + $0x70] sm:$0xf0]  ;;  %v1708_v46 = vor.u32 %v1955_v40, %v1705_v41  ;;  %v1691_v47 = vld [vmem:[#allocation2 + $0x18] sm:$0xf]  ;;  %v1953_v48 = vld [vmem:[#allocation2 + $0x20] sm:$0xf0] }
  0x40   : > { %769 = vmatpush.bf16.msra.mxu1 %v1744_v17  ;;  %v1952_v49 = vld [vmem:[#allocation2 + $0x1c] sm:$0xf]  ;;  %v1693_v50 = vld [vmem:[#allocation2 + $0x24] sm:$0xf0]  ;;  %s2524_s2 = scalar_select %p571_p13, %s2446_s22, 1  ;;  %v1736_v51 = vor.u32 %v1963_v45, %v1735_v44  ;;  %v1692_v52 = vor.u32 %v1953_v48, %v1691_v47  ;;  %vm837_vm1 = vcmask 1043456  }
  0x41   : > { %781 = vmatpush.bf16.msra.mxu2 %v1760_v33  ;;  %v1723_v53 = vld [vmem:[#allocation2 + $0x50] sm:$0xf]  ;;  %v1960_v54 = vld [vmem:[#allocation2 + $0x58] sm:$0xf0]  ;;  %v1696_v55 = vor.u32 %v1952_v49, %v1693_v50  ;;  %v1679_v56 = vld [vmem:[#allocation2] sm:$0xf] }
  0x42   : > { %v1950_v57 = vld [vmem:[#allocation2 + $0x8] sm:$0xf0]  ;;  %v1949_v58 = vld [vmem:[#allocation2 + $0x4] sm:$0xf]  ;;  %v1681_v59 = vld [vmem:[#allocation2 + $0xc] sm:$0xf0]  ;;  %v1724_v60 = vor.u32 %v1960_v54, %v1723_v53  ;;  %s577_s30 = scalar_lea.vmem %s2679_s1, %s2524_s2 }
  0x43   : > { %757 = vmatpush.bf16.msra.mxu0 %v1728_v22  ;;  %s1675_s11 = sshll.u32 %s2524_s2, 2  ;;  %v1680_v61 = vor.u32 %v1950_v57, %v1679_v56  ;;  %v1711_v62 = vld [vmem:[#allocation2 + $0x38] sm:$0xf]  ;;  %v1957_v63 = vld [vmem:[#allocation2 + $0x40] sm:$0xf0]  ;;  %v1684_v0 = vor.u32 %v1949_v58, %v1681_v59  ;;  %s2340_s21 = smov 64  }
  0x44   : > { %770 = vmatpush.bf16.msra.mxu1 %v1732_v26  ;;  %s574_s14 = scalar_lea.vmem %s2678_s0, %s1675_s11  ;;  %v1712_v1 = vor.u32 %v1957_v63, %v1711_v62  ;;  %v1699_v3 = vld [vmem:[#allocation2 + $0x20] sm:$0xf]  ;;  %v1954_v4 = vld [vmem:[#allocation2 + $0x28] sm:$0xf0]  ;;  %v1687_v6 = vld [vmem:[#allocation2 + $0x8] sm:$0xf] }
  0x45   : > { %782 = vmatpush.bf16.msra.mxu2 %v1748_v42  ;;  %v2532_v2 = vld [vmem:[%s574_s14] sm:$0xf]  ;;  %v1700_v5 = vor.u32 %v1954_v4, %v1699_v3  ;;  %v1951_v7 = vld [vmem:[#allocation2 + $0x10] sm:$0xf0]  ;;  %s2341_s27 = smov 96   ;;  %s2342_s16 = smov 32  }
  0x46   : > { %v1688_v8 = vor.u32 %v1951_v7, %v1687_v6  ;;  %v618_v9 = vld [vmem:[%s2681_s3] sm:$0x7]  ;;  %vm819_vm2 = vcmask 64512   ;;  %s568_s17 = sand.u32 1, %s2320_s19   ;;  %vm832_vm3 = vcmask 60416   ;;  %vm1053_vm4 = vcmask 523264  }
  0x47   : > { %758 = vmatpush.bf16.msra.mxu0 %v1716_v34  ;;  %v621_v10 = vperm.slane %v618_v9, 1  ;;  %v620_v13 = vperm.slane %v618_v9, 0  ;;  %v622_v22 = vperm.slane %v618_v9, 2  ;;  %v2105_v31 = vld [vmem:[%s577_s30] ss:$0 sm:$0xff]  ;;  %s1674_s25 = sshll.u32 %s568_s17, 4 }
  0x48   : > { %771 = vmatpush.bf16.msra.mxu1 %v1720_v38  ;;  %s2564_s20 = scalar_lea.vmem [#allocation10], %s1674_s25  ;;  %vm1056_vm5 = vcmask 785408   ;;  %s2723_s28 = sld [smem:[#allocation24_spill]] }
  0x49   : > { %783 = vmatpush.bf16.msra.mxu2 %v1736_v51  ;;  %s2013_s30 = sshll.u32 %s2446_s22, 4  ;;  %s2725_s24 = sld [smem:[#allocation28_spill]] }
  0x4a   : > { %s1523_s26 = sshll.u32 %s2564_s20, 4  ;;  %s1508_s12 = scalar_lea.sflag [#allocation4], %s568_s17  ;;  %s1524_s26 = int_to_ptr.vmem [resolvable:$true] %s1523_s26 }
  0x4b   : > { %759 = vmatpush.bf16.msra.mxu0 %v1704_v43 }
  0x4c   : > { %772 = vmatpush.bf16.msra.mxu1 %v1708_v46 }
  0x4d   : > { %784 = vmatpush.bf16.msra.mxu2 %v1724_v60 }
  0x4f   : > { %760 = vmatpush.bf16.msra.mxu0 %v1692_v52  ;;  %s1522_s23 = scalar_lea.hbm %s2725_s24, %s2013_s30  ;;  %s2274_s22 = scalar_lea.hbm %s2725_s24, 32 }
  0x50   : > { %773 = vmatpush.bf16.msra.mxu1 %v1696_v55  ;;  %s1525_s4 = sshll.u32 %s1522_s23, 4  ;;  %s1526_s4 = int_to_ptr.hbm [resolvable:$true] %s1525_s4 }
  0x51   : > { %785 = vmatpush.bf16.msra.mxu2 %v1712_v1  ;;  %s2268_s13 = sshra.s32 %s1526_s4, 4  ;;  %s2269_s13 = int_to_ptr.hbm [resolvable:$true] %s2268_s13 }
  0x52   : > { %s2270_s14 = scalar_lea.hbm %s2269_s13, 16  ;;  %p2275_p3 = scmp.lt.s32.totalorder %s2269_s13, %s2725_s24 }
  0x53   : > { %761 = vmatpush.bf16.msra.mxu0 %v1680_v61  ;;  %p2271_p0 = scmp.ne.s32.totalorder %s2269_s13, %s2270_s14  ;;  %p2276_p4 = scmp.lt.s32.totalorder %s2274_s22, %s2270_s14 }
  0x54   : > { %774 = vmatpush.bf16.msra.mxu1 %v1684_v0 }
  0x55   : > { %786 = vmatpush.bf16.msra.mxu2 %v1700_v5  ;;  %p2272_p1 = pnand %p2271_p0, %p2463_p5  ;;  %p2277_p7 = por %p2276_p4, %p2275_p3 }
  0x56   : > { %762 = vmatmul.bf16.vlgmr.msra.gmra.mxu0 %v2532_v2 }
  0x57   : > { %775 = vmatmul.bf16.vlgmr.msra.gmra.mxu1 %v2532_v2  ;;  %p2273_p2 = pneg %p2272_p1 }
  0x59   : > { %787 = vmatpush.bf16.msra.mxu2 %v1688_v8  ;;  %p2278_p8 = pnand %p2277_p7, %p2273_p2 }
  0x5c   : > { %788 = vmatmul.bf16.vlgmr.msra.gmra.mxu2 %v2532_v2 }
  0xd3   : > { %v763_v11 = vpop.f32.mrf.mxu0 }
  0xd4   : > { %v776_v12 = vpop.f32.mrf.mxu1  ;;  %v764_v16 = vadd.f32 %v763_v11, %v620_v13 }
  0xd5   : > { %v777_v14 = vadd.f32 %v776_v12, %v621_v10 }
  0xd6   : > { %v793_v20 = vpack.c.bf16 %v764_v16, %v764_v16 }
  0xd7   : > { %v794_v15 = vpack.c.bf16 %v777_v14, %v777_v14 }
  0xd9   : > { %919 = vrot.lane.b32.xlu2 %v794_v15, %s2340_s21  ;;  %859 = vrot.lane.b32.xlu1 %v794_v15, %s2341_s27  ;;  %v804_v17 = vsel %vm799_vm0, %v794_v15, 0 }
  0xda   : > { %813 = vmatpush.bf16.xpose.msra.mxu3 %v804_v17 }
  0xdb   : > { %v765_v18 = vpop.f32.mrf.mxu0 }
  0xdc   : > { %v778_v19 = vpop.f32.mrf.mxu1 }
  0xdf   : > { %v789_v21 = vpop.f32.mrf.mxu2 }
  0xe0   : > { %v790_v23 = vadd.f32 %v789_v21, %v622_v22 }
  0xe1   : > { %978 = vrot.lane.b32.xlu2 %v794_v15, %s2342_s16  ;;  %856 = vrot.lane.b32.xlu1 %v793_v20, %s2341_s27 }
  0xe2   : > { %1773 = vmatmul.msk.bf16.vlgmr.msra.gmra.mxu3 %vm799_vm0, %v793_v20  ;;  %v2551_v25 = vpack.c.bf16 %v790_v23, %v790_v23 }
  0xe4   : > { %v839_v26 = vsel %vm837_vm1, %v2551_v25, 0 }
  0xe5   : > { %848 = vmatpush.bf16.msrb.mxu3 %v839_v26 }
  0xe7   : > { %v791_v24 = vpop.f32.mrf.mxu2 }
  0xe9   : > { %976 = vrot.lane.b32.xlu1 %v793_v20, %s2342_s16 }
 0x133   : > { %v920_v27 = vpop.permute.xlu2 %919 }
 0x134   : > { %v925_v28 = vsel %vm799_vm0, %v920_v27, 0 }
 0x135   : > { %934 = vmatpush.bf16.xpose.msrb.mxu2 %v925_v28 }
 0x13b   : > { %v979_v44 = vpop.permute.xlu2 %978 }
 0x13c   : > { %v984_v46 = vsel %vm799_vm0, %v979_v44, 0 }
 0x14b   : > { %v860_v29 = vpop.permute.xlu1 %859 }
 0x14c   : > { %v865_v30 = vsel %vm799_vm0, %v860_v29, 0 }
 0x14d   : > { %874 = vmatpush.bf16.xpose.msra.mxu3 %v865_v30 }
 0x153   : > { %v857_v48 = vpop.permute.xlu1 %856 }
 0x15b   : > { %v977_v49 = vpop.permute.xlu1 %976 }
 0x165   : > { %v815_v32 = vpop.f32.mrf.mxu3 }
 0x166   : > { %v816_v33 = vadd.f32 %v2105_v31, %v815_v32 }
 0x168   : > { %v820_v34 = vsel %vm819_vm2, %v816_v33, -inf }
 0x169   : > { %821 = vmax.xlane.f32.xlu0 %v820_v34 }
 0x16d   : > { %v817_v35 = vpop.f32.mrf.mxu3 }
 0x1dc   : > { %v822_v36 = vpop.xlane.xlu0 %821 }
 0x1dd   : > { %v823_v37 = vsub.f32 %v816_v33, %v822_v36 }
 0x1df   : > { %v824_v38 = vmul.f32 1.442695, %v823_v37 }
 0x1e1   : > { %2112 = vpow2.f32 %v824_v38 }
 0x1e7   : > { %v2113_v39 = vpop.eup %2112 }
 0x1e8   : > { %v826_v40 = vsel %vm819_vm2, %v2113_v39, 0.0 }
 0x1e9   : > { %827 = vadd.xlane.f32.xlu0 %v826_v40 }
 0x1fd   : > { %917 = vrot.lane.b32.xlu0 %v793_v20, %s2340_s21 }
 0x25c   : > { %v828_v41 = vpop.xlane.xlu0 %827 }
 0x25d   : > { %2114 = vrcp.f32 %v828_v41 }
 0x263   : > { %v2115_v42 = vpop.eup %2114 }
 0x264   : > { %v830_v43 = vmul.f32 %v2115_v42, %v2113_v39 }
 0x266   : > { %v831_v45 = vpack.c.bf16 %v830_v43, %v830_v43 }
 0x268   : > { %833 = vst.msk [vmem:[%s2564_s20] sm:$0xf] %vm832_vm3, %v831_v45  ;;  %1774 = vmatmul.msk.bf16.vlgmr.msrb.gmra.mxu3 %vm819_vm2, %v831_v45 }
 0x269   : > { %993 = vmatpush.bf16.xpose.msrb.mxu3 %v984_v46 }
 0x26f   : > { %v918_v47 = vpop.permute.xlu0 %917 }
 0x270   : > { %1778 = vmatmul.msk.bf16.vlgmr.msrb.gmra.mxu2 %vm799_vm0, %v918_v47 }
 0x278   : > { %1775 = vmatmul.msk.bf16.vlgmr.msra.gmra.mxu3 %vm799_vm0, %v857_v48 }
 0x288   : > { %1781 = vmatmul.msk.bf16.vlgmr.msrb.gmra.mxu3 %vm799_vm0, %v977_v49  ;;  %v1980_v49 = vld [vmem:[#allocation5 + $0x38] sm:$0xff] }
 0x289   : > { %1128 = vmatpush.bf16.msrb.mxu1 %v1980_v49  ;;  %v1985_v49 = vld [vmem:[#allocation7 + $0x24] sm:$0xf] }
 0x2eb   : > { %v2572_v50 = vpop.f32.mrf.mxu3 }
 0x2f3   : > { %v852_v51 = vpop.f32.mrf.mxu3  ;;  %v936_v52 = vpop.f32.mrf.mxu2 }
 0x2f4   : > { %v937_v53 = vadd.f32 %v2105_v31, %v936_v52  ;;  %v1979_v51 = vld [vmem:[#allocation5 + $0x30] sm:$0xff]  ;;  %v1978_v52 = vld [vmem:[#allocation5 + $0x28] sm:$0xff] }
 0x2f5   : > { %1129 = vmatpush.bf16.msrb.mxu1 %v1979_v51 }
 0x2f6   : > { %v940_v54 = vsel %vm819_vm2, %v937_v53, -inf }
 0x2f7   : > { %941 = vmax.xlane.f32.xlu1 %v940_v54  ;;  %v1976_v54 = vld [vmem:[#allocation5 + $0x18] sm:$0xff] }
 0x2f9   : > { %1130 = vmatpush.bf16.msrb.mxu1 %v1978_v52  ;;  %v1836_v52 = vld [vmem:[#allocation7 + $0x28] sm:$0xf0] }
 0x2fb   : > { %v876_v55 = vpop.f32.mrf.mxu3  ;;  %v938_v56 = vpop.f32.mrf.mxu2 }
 0x2fc   : > { %v877_v57 = vadd.f32 %v2105_v31, %v876_v55  ;;  %v1975_v55 = vld [vmem:[#allocation5 + $0x10] sm:$0xff]  ;;  %v1974_v56 = vld [vmem:[#allocation5 + $0x8] sm:$0xff] }
 0x2fe   : > { %v880_v58 = vsel %vm819_vm2, %v877_v57, -inf }
 0x2ff   : > { %881 = vmax.xlane.f32.xlu2 %v880_v58 }
 0x303   : > { %v878_v59 = vpop.f32.mrf.mxu3 }
 0x304   : > { %v854_v59 = vpack.c.bf16 %v2572_v50, %v2572_v50 }
 0x30b   : > { %v995_v60 = vpop.f32.mrf.mxu3 }
 0x30c   : > { %v996_v61 = vadd.f32 %v2105_v31, %v995_v60 }
 0x30e   : > { %v999_v62 = vsel %vm819_vm2, %v996_v61, -inf }
 0x30f   : > { %1000 = vmax.xlane.f32.xlu0 %v999_v62 }
 0x313   : > { %v997_v63 = vpop.f32.mrf.mxu3 }
 0x323   : > { %954 = vrot.lane.b32.xlu0 %v2551_v25, %s2340_s21 }
 0x36a   : > { %v942_v0 = vpop.xlane.xlu1 %941 }
 0x36b   : > { %v943_v1 = vsub.f32 %v937_v53, %v942_v0  ;;  %v1977_v53 = vld [vmem:[#allocation5 + $0x20] sm:$0xff] }
 0x36c   : > { %1131 = vmatpush.bf16.msrb.mxu1 %v1977_v53  ;;  %v1839_v53 = vor.u32 %v1985_v49, %v1836_v52 }
 0x36d   : > { %v944_v3 = vmul.f32 1.442695, %v943_v1  ;;  %v2106_v1 = vld [vmem:[%s2683_s5] ss:$0 sm:$0xff] }
 0x36f   : > { %2116 = vpow2.f32 %v944_v3  ;;  %v584_v3 = vunpack.c.l.bf16 %v2532_v2 }
 0x370   : > { %1132 = vmatpush.bf16.msrb.mxu1 %v1976_v54  ;;  %v1826_v54 = vld [vmem:[#allocation7 + $0x10] sm:$0xf] }
 0x372   : > { %v882_v4 = vpop.xlane.xlu2 %881 }
 0x373   : > { %v883_v5 = vsub.f32 %v877_v57, %v882_v4  ;;  %v1973_v57 = vld [vmem:[#allocation5] sm:$0xff] }
 0x374   : > { %1133 = vmatpush.bf16.msrb.mxu1 %v1975_v55  ;;  %v1984_v55 = vld [vmem:[#allocation7 + $0x14] sm:$0xf0] }
 0x375   : > { %v2117_v6 = vpop.eup %2116  ;;  %v884_v7 = vmul.f32 1.442695, %v883_v5 }
 0x376   : > { %v946_v8 = vsel %vm819_vm2, %v2117_v6, 0.0 }
 0x377   : > { %2118 = vpow2.f32 %v884_v7  ;;  %947 = vadd.xlane.f32.xlu1 %v946_v8  ;;  %v2343_v7 = vmov 128.0   ;;  %v1874_v8 = vld [vmem:[#allocation7 + $0x70] sm:$0xf] }
 0x378   : > { %1134 = vmatpush.bf16.msrb.mxu1 %v1974_v56  ;;  %v1983_v56 = vld [vmem:[#allocation7 + $0x14] sm:$0xf] }
 0x37c   : > { %1135 = vmatpush.bf16.msrb.mxu1 %v1973_v57  ;;  %v1827_v57 = vor.u32 %v1984_v55, %v1826_v54 }
 0x37d   : > { %v2119_v9 = vpop.eup %2118 }
 0x37e   : > { %v886_v10 = vsel %vm819_vm2, %v2119_v9, 0.0 }
 0x37f   : > { %887 = vadd.xlane.f32.xlu2 %v886_v10  ;;  %v1995_v10 = vld [vmem:[#allocation7 + $0x74] sm:$0xf] }
 0x382   : > { %v1001_v11 = vpop.xlane.xlu0 %1000 }
 0x383   : > { %v1002_v12 = vsub.f32 %v996_v61, %v1001_v11 }
 0x385   : > { %v1003_v13 = vmul.f32 1.442695, %v1002_v12  ;;  %v1876_v12 = vld [vmem:[#allocation7 + $0x78] sm:$0xf0] }
 0x387   : > { %2120 = vpow2.f32 %v1003_v13  ;;  %v1879_v13 = vor.u32 %v1995_v10, %v1876_v12  ;;  %v2010_v10 = vld [vmem:[#allocation8 + $0x68] sm:$0xff]  ;;  %v2009_v12 = vld [vmem:[#allocation8 + $0x60] sm:$0xff] }
 0x389   : > { %1295 = vmatpush.bf16.msra.mxu3 %v1879_v13 }
 0x38d   : > { %v2121_v14 = vpop.eup %2120 }
 0x38e   : > { %v1005_v15 = vsel %vm819_vm2, %v2121_v14, 0.0 }
 0x38f   : > { %1006 = vadd.xlane.f32.xlu1 %v1005_v15 }
 0x395   : > { %v955_v16 = vpop.permute.xlu0 %954 }
 0x396   : > { %v960_v17 = vsel %vm837_vm1, %v955_v16, 0 }
 0x397   : > { %895 = vrot.lane.b32.xlu2 %v2551_v25, %s2341_s27  ;;  %969 = vmatpush.bf16.msra.mxu2 %v960_v17 }
 0x3a8   : > { %1013 = vrot.lane.b32.xlu1 %v2551_v25, %s2342_s16 }
 0x3ea   : > { %v948_v18 = vpop.xlane.xlu1 %947 }
 0x3eb   : > { %2122 = vrcp.f32 %v948_v18 }
 0x3f1   : > { %v2123_v19 = vpop.eup %2122 }
 0x3f2   : > { %v950_v20 = vmul.f32 %v2123_v19, %v2117_v6  ;;  %v888_v21 = vpop.xlane.xlu2 %887 }
 0x3f3   : > { %2124 = vrcp.f32 %v888_v21 }
 0x3f4   : > { %v951_v22 = vpack.c.bf16 %v950_v20, %v950_v20 }
 0x3f6   : > { %1779 = vst.msk [vmem:[%s2564_s20 + $0x8] sm:$0xf] %vm832_vm3, %v951_v22  ;;  %1780 = vmatmul.msk.bf16.vlgmr.msra.gmra.mxu2 %vm819_vm2, %v951_v22 }
 0x3f9   : > { %v2125_v23 = vpop.eup %2124 }
 0x3fa   : > { %v890_v24 = vmul.f32 %v2125_v23, %v2119_v9  ;;  %v896_v26 = vpop.permute.xlu2 %895  ;;  %v1996_v9 = vld [vmem:[#allocation7 + $0x74] sm:$0xf0]  ;;  %v1866_v23 = vld [vmem:[#allocation7 + $0x60] sm:$0xf] }
 0x3fb   : > { %v901_v27 = vsel %vm837_vm1, %v896_v26, 0  ;;  %v1875_v11 = vor.u32 %v1996_v9, %v1874_v8  ;;  %v1993_v26 = vld [vmem:[#allocation7 + $0x64] sm:$0xf]  ;;  %v2002_v9 = vld [vmem:[#allocation8 + $0x28] sm:$0xff] }
 0x3fc   : > { %910 = vmatpush.bf16.msrb.mxu0 %v901_v27  ;;  %v891_v25 = vpack.c.bf16 %v890_v24, %v890_v24  ;;  %v1994_v24 = vld [vmem:[#allocation7 + $0x64] sm:$0xf0] }
 0x3fd   : > { %1282 = vmatpush.bf16.msrb.mxu2 %v1875_v11  ;;  %v1867_v27 = vor.u32 %v1994_v24, %v1866_v23  ;;  %v2001_v11 = vld [vmem:[#allocation8 + $0x20] sm:$0xff] }
 0x3fe   : > { %1776 = vst.msk [vmem:[%s2564_s20 + $0x4] sm:$0xf] %vm832_vm3, %v891_v25  ;;  %v2107_v24 = vld [vmem:[%s2684_s6] ss:$0 sm:$0xff] }
 0x3ff   : > { %1777 = vmatmul.msk.bf16.vlgmr.msrb.gmra.mxu0 %vm819_vm2, %v891_v25  ;;  %v1868_v25 = vld [vmem:[#allocation7 + $0x68] sm:$0xf0] }
 0x401   : > { %1283 = vmatpush.bf16.msrb.mxu2 %v1867_v27 }
 0x402   : > { %v1007_v28 = vpop.xlane.xlu1 %1006 }
 0x403   : > { %2126 = vrcp.f32 %v1007_v28  ;;  %v1871_v28 = vor.u32 %v1993_v26, %v1868_v25  ;;  %v2108_v25 = vld [vmem:[%s2685_s7] ss:$0 sm:$0xff] }
 0x404   : > { %2128 = vrcp.f32 %v2343_v7  ;;  %v2011_v7 = vld [vmem:[#allocation8 + $0x70] sm:$0xff] }
 0x405   : > { %1296 = vmatpush.bf16.msra.mxu3 %v1871_v28 }
 0x409   : > { %v2127_v29 = vpop.eup %2126 }
 0x40a   : > { %v1009_v30 = vmul.f32 %v2127_v29, %v2121_v14  ;;  %v2129_v14 = vpop.eup %2128  ;;  %v1858_v29 = vld [vmem:[#allocation7 + $0x50] sm:$0xf] }
 0x40b   : > { %v1145_v15 = vmul.f32 128.0, %v2129_v14  ;;  %vm1149_vm6 = vweird.f32 %v2129_v14 }
 0x40c   : > { %v1010_v31 = vpack.c.bf16 %v1009_v30, %v1009_v30  ;;  %v1992_v30 = vld [vmem:[#allocation7 + $0x54] sm:$0xf0] }
 0x40d   : > { %v1146_v16 = vsub.f32 1.0, %v1145_v15  ;;  %v2000_v15 = vld [vmem:[#allocation8 + $0x18] sm:$0xff] }
 0x40e   : > { %1782 = vst.msk [vmem:[%s2564_s20 + $0xc] sm:$0xf] %vm832_vm3, %v1010_v31 }
 0x40f   : > { %v1147_v17 = vmul.f32 %v2129_v14, %v1146_v16  ;;  %v2008_v16 = vld [vmem:[#allocation8 + $0x58] sm:$0xff] }
 0x411   : > { %v1148_v2 = vadd.f32 %v2129_v14, %v1147_v17 }
 0x413   : > { %v2608_v18 = vsel %vm1149_vm6, %v2129_v14, %v1148_v2 }
 0x41a   : > { %v1014_v32 = vpop.permute.xlu1 %1013 }
 0x41b   : > { %v1019_v33 = vsel %vm837_vm1, %v1014_v32, 0  ;;  %v1859_v32 = vor.u32 %v1992_v30, %v1858_v29 }
 0x41c   : > { %1028 = vmatpush.bf16.msra.mxu0 %v1019_v33  ;;  %v1860_v33 = vld [vmem:[#allocation7 + $0x58] sm:$0xf0] }
 0x41d   : > { %1284 = vmatpush.bf16.msrb.mxu2 %v1859_v32  ;;  %v2006_v32 = vld [vmem:[#allocation8 + $0x48] sm:$0xff] }
 0x41f   : > { %1783 = vmatmul.msk.bf16.vlgmr.msra.gmra.mxu0 %vm819_vm2, %v1010_v31  ;;  %v1991_v31 = vld [vmem:[#allocation7 + $0x54] sm:$0xf] }
 0x479   : > { %v971_v34 = vpop.f32.mrf.mxu2 }
 0x47a   : > { %v975_v38 = vpack.c.bf16 %v971_v34, %v971_v34  ;;  %v1863_v34 = vor.u32 %v1991_v31, %v1860_v33  ;;  %v1998_v31 = vld [vmem:[#allocation8 + $0x8] sm:$0xff]  ;;  %v1997_v33 = vld [vmem:[#allocation8] sm:$0xff] }
 0x47c   : > { %v912_v35 = vpop.f32.mrf.mxu0  ;;  %v1041_v42 = vunpack.c.l.b16 %v975_v38  ;;  %1297 = vmatpush.bf16.msra.mxu3 %v1863_v34  ;;  %v2005_v34 = vld [vmem:[#allocation8 + $0x40] sm:$0xff] }
 0x47d   : > { %v916_v36 = vpack.c.bf16 %v912_v35, %v912_v35  ;;  %v1850_v35 = vld [vmem:[#allocation7 + $0x40] sm:$0xf] }
 0x47e   : > { %v1042_v43 = vpack.c.b16 %v1041_v42, %v1041_v42  ;;  %v1988_v42 = vld [vmem:[#allocation7 + $0x34] sm:$0xf0] }
 0x47f   : > { %v1036_v37 = vunpack.c.l.b16 %v916_v36  ;;  %v1990_v36 = vld [vmem:[#allocation7 + $0x44] sm:$0xf0] }
 0x480   : > { %v1851_v38 = vor.u32 %v1990_v36, %v1850_v35 }
 0x481   : > { %v1037_v39 = vpack.c.b16 %v1036_v37, %v1036_v37  ;;  %v973_v40 = vpop.f32.mrf.mxu2  ;;  %v1989_v37 = vld [vmem:[#allocation7 + $0x44] sm:$0xf] }
 0x482   : > { %1285 = vmatpush.bf16.msrb.mxu2 %v1851_v38 }
 0x483   : > { %1038 = vrot.lane.b32.xlu2 %v1037_v39, %s2342_s16  ;;  %v1852_v39 = vld [vmem:[#allocation7 + $0x48] sm:$0xf0] }
 0x484   : > { %v914_v41 = vpop.f32.mrf.mxu0  ;;  %v1855_v40 = vor.u32 %v1989_v37, %v1852_v39 }
 0x485   : > { %v1842_v41 = vld [vmem:[#allocation7 + $0x30] sm:$0xf] }
 0x486   : > { %1298 = vmatpush.bf16.msra.mxu3 %v1855_v40 }
 0x48b   : > { %1043 = vrot.lane.b32.xlu2 %v1042_v43, %s2340_s21  ;;  %v1987_v43 = vld [vmem:[#allocation7 + $0x34] sm:$0xf] }
 0x49c   : > { %v1030_v44 = vpop.f32.mrf.mxu0 }
 0x49d   : > { %v1034_v45 = vpack.c.bf16 %v1030_v44, %v1030_v44  ;;  %v1843_v44 = vor.u32 %v1988_v42, %v1842_v41 }
 0x49f   : > { %v1046_v46 = vunpack.c.l.b16 %v1034_v45  ;;  %v1844_v45 = vld [vmem:[#allocation7 + $0x38] sm:$0xf0]  ;;  %1286 = vmatpush.bf16.msrb.mxu2 %v1843_v44 }
 0x4a1   : > { %v1047_v47 = vpack.c.b16 %v1046_v46, %v1046_v46  ;;  %v1847_v46 = vor.u32 %v1987_v43, %v1844_v45 }
 0x4a3   : > { %1048 = vrot.lane.b32.xlu0 %v1047_v47, %s2341_s27  ;;  %1299 = vmatpush.bf16.msra.mxu3 %v1847_v46  ;;  %v1834_v47 = vld [vmem:[#allocation7 + $0x20] sm:$0xf] }
 0x4a4   : > { %v1032_v48 = vpop.f32.mrf.mxu0 }
 0x4a5   : > { %v1986_v48 = vld [vmem:[#allocation7 + $0x24] sm:$0xf0] }
 0x4a6   : > { %v1835_v51 = vor.u32 %v1986_v48, %v1834_v47  ;;  %v2109_v47 = vld [vmem:[%s2723_s28] ss:$0 sm:$0xff] }
 0x4a7   : > { %1300 = vmatpush.bf16.msra.mxu3 %v1839_v53 }
 0x4a8   : > { %1287 = vmatpush.bf16.msrb.mxu2 %v1835_v51 }
 0x4ac   : > { %1288 = vmatpush.bf16.msrb.mxu2 %v1827_v57 }
 0x4dd   : > { %v1039_v58 = vpop.permute.xlu2 %1038 }
 0x4de   : > { %v1052_v61 = vsel %vm799_vm0, %v854_v59, %v1039_v58  ;;  %v1828_v58 = vld [vmem:[#allocation7 + $0x18] sm:$0xf0]  ;;  %v1818_v59 = vld [vmem:[#allocation7] sm:$0xf] }
 0x4e5   : > { %v1044_v60 = vpop.permute.xlu2 %1043 }
 0x4e6   : > { %v1055_v62 = vsel %vm1053_vm4, %v1052_v61, %v1044_v60  ;;  %v1982_v60 = vld [vmem:[#allocation7 + $0x4] sm:$0xf0]  ;;  %v1831_v61 = vor.u32 %v1983_v56, %v1828_v58 }
 0x4e8   : > { %1301 = vmatpush.bf16.msra.mxu3 %v1831_v61 }
 0x515   : > { %v1049_v63 = vpop.permute.xlu0 %1048 }
 0x516   : > { %v1058_v0 = vsel %vm1056_vm5, %v1055_v62, %v1049_v63  ;;  %v1981_v62 = vld [vmem:[#allocation7 + $0x4] sm:$0xf]  ;;  %v1820_v63 = vld [vmem:[#allocation7 + $0x8] sm:$0xf0] }
 0x517   : > { %1136 = vmatmul.bf16.vlgmr.msrb.gmra.mxu1 %v1058_v0  ;;  %v1819_v0 = vor.u32 %v1982_v60, %v1818_v59 }
 0x519   : > { %1289 = vmatpush.bf16.msrb.mxu2 %v1819_v0 }
 0x594   : > { %v1137_v4 = vpop.f32.mrf.mxu1 }
 0x595   : > { %v1138_v5 = vadd.f32 %v2106_v1, %v1137_v4  ;;  %v1823_v1 = vor.u32 %v1981_v62, %v1820_v63  ;;  %v2012_v4 = vld [vmem:[#allocation8 + $0x78] sm:$0xff] }
 0x596   : > { %1457 = vmatpush.bf16.msra.mxu1 %v2012_v4 }
 0x597   : > { %v1141_v6 = vadd.f32 %v1138_v5, %v584_v3  ;;  %1302 = vmatpush.bf16.msra.mxu3 %v1823_v1  ;;  %v2004_v3 = vld [vmem:[#allocation8 + $0x38] sm:$0xff] }
 0x598   : > { %1444 = vmatpush.bf16.msrb.mxu0 %v2004_v3 }
 0x599   : > { %1142 = vadd.xlane.f32.xlu2 %v1141_v6 }
 0x59a   : > { %1458 = vmatpush.bf16.msra.mxu1 %v2011_v7 }
 0x59c   : > { %v1139_v50 = vpop.f32.mrf.mxu1 }
 0x59d   : > { %v2003_v50 = vld [vmem:[#allocation8 + $0x30] sm:$0xff] }
 0x59e   : > { %1445 = vmatpush.bf16.msrb.mxu0 %v2003_v50  ;;  %1459 = vmatpush.bf16.msra.mxu1 %v2010_v10 }
 0x5a2   : > { %1446 = vmatpush.bf16.msrb.mxu0 %v2002_v9  ;;  %1460 = vmatpush.bf16.msra.mxu1 %v2009_v12 }
 0x5a6   : > { %1447 = vmatpush.bf16.msrb.mxu0 %v2001_v11  ;;  %1461 = vmatpush.bf16.msra.mxu1 %v2008_v16 }
 0x5aa   : > { %1448 = vmatpush.bf16.msrb.mxu0 %v2000_v15 }
 0x60c   : > { %v1143_v19 = vpop.xlane.xlu2 %1142 }
 0x60d   : > { %v1151_v20 = vmul.f32 %v2608_v18, %v1143_v19  ;;  %v1999_v19 = vld [vmem:[#allocation8 + $0x10] sm:$0xff] }
 0x60e   : > { %1449 = vmatpush.bf16.msrb.mxu0 %v1999_v19 }
 0x60f   : > { %v2611_v21 = vsub.f32 %v1141_v6, %v1151_v20  ;;  %v2007_v20 = vld [vmem:[#allocation8 + $0x50] sm:$0xff] }
 0x610   : > { %1462 = vmatpush.bf16.msra.mxu1 %v2007_v20 }
 0x611   : > { %v1153_v22 = vmul.f32 %v2611_v21, %v2611_v21 }
 0x612   : > { %1450 = vmatpush.bf16.msrb.mxu0 %v1998_v31 }
 0x613   : > { %1154 = vadd.xlane.f32.xlu0 %v1153_v22 }
 0x614   : > { %1463 = vmatpush.bf16.msra.mxu1 %v2006_v32 }
 0x616   : > { %1451 = vmatpush.bf16.msrb.mxu0 %v1997_v33 }
 0x618   : > { %1464 = vmatpush.bf16.msra.mxu1 %v2005_v34 }
 0x686   : > { %v1155_v5 = vpop.xlane.xlu0 %1154 }
 0x687   : > { %v1156_v6 = vmul.f32 %v1155_v5, %v2608_v18 }
 0x689   : > { %v1157_v8 = vadd.f32 1e-06, %v1156_v6 }
 0x68b   : > { %2130 = vrsqrt.f32 %v1157_v8  ;;  %vm1164_vm8 = vweird.f32 %v1157_v8 }
 0x691   : > { %v2131_v13 = vpop.eup %2130 }
 0x692   : > { %v1159_v14 = vmul.f32 %v2131_v13, %v1157_v8  ;;  %vm1165_vm7 = vweird.f32 %v2131_v13 }
 0x693   : > { %vm1166_vm9 = vmor %vm1164_vm8, %vm1165_vm7 }
 0x694   : > { %v1160_v17 = vmul.f32 %v2131_v13, %v1159_v14 }
 0x696   : > { %v1161_v2 = vmul.f32 0.5, %v1160_v17 }
 0x698   : > { %v1162_v22 = vsub.f32 1.5, %v1161_v2 }
 0x69a   : > { %v1163_v23 = vmul.f32 %v2131_v13, %v1162_v22 }
 0x69c   : > { %v1167_v26 = vsel %vm1166_vm9, %v2131_v13, %v1163_v23 }
 0x69d   : > { %v1168_v27 = vmul.f32 %v1167_v26, %v2611_v21  ;;  %v1196_v21 = vld [vmem:[%s2687_s9] sm:$0x3] }
 0x69e   : > { %v1198_v35 = vperm.slane %v1196_v21, 0  ;;  %v1199_v36 = vperm.slane %v1196_v21, 1 }
 0x69f   : > { %v1173_v28 = vmul.f32 %v2107_v24, %v1168_v27 }
 0x6a1   : > { %v1178_v29 = vadd.f32 %v2108_v25, %v1173_v28 }
 0x6a3   : > { %v1179_v30 = vpack.c.bf16 %v1178_v29, %v1178_v29 }
 0x6a5   : > { %1290 = vmatmul.bf16.vlgmr.msrb.gmra.mxu2 %v1179_v30  ;;  %1303 = vmatmul.bf16.vlgmr.msra.gmra.mxu3 %v1179_v30 }
 0x728   : > { %v1291_v37 = vpop.f32.mrf.mxu2  ;;  %v1304_v38 = vpop.f32.mrf.mxu3 }
 0x729   : > { %v1292_v39 = vadd.f32 %v1291_v37, %v1198_v35  ;;  %v1305_v40 = vadd.f32 %v1304_v38, %v1199_v36 }
 0x72b   : > { %v1308_v41 = vmax.f32 %v1292_v39, 0.0  ;;  %v1309_v42 = vmax.f32 %v1305_v40, 0.0 }
 0x72d   : > { %v1310_v43 = vpack.c.bf16 %v1308_v41, %v1308_v41  ;;  %v1311_v44 = vpack.c.bf16 %v1309_v42, %v1309_v42 }
 0x72f   : > { %1452 = vmatmul.bf16.vlgmr.msrb.gmra.mxu0 %v1310_v43  ;;  %1465 = vmatmul.bf16.vlgmr.msra.gmra.mxu1 %v1311_v44 }
 0x730   : > { %v1293_v45 = vpop.f32.mrf.mxu2  ;;  %v1306_v46 = vpop.f32.mrf.mxu3 }
 0x7ac   : > { %v1453_v48 = vpop.f32.mrf.mxu0  ;;  %v1466_v49 = vpop.f32.mrf.mxu1 }
 0x7ad   : > { %v1454_v51 = vadd.f32 %v2109_v47, %v1453_v48 }
 0x7af   : > { %v1467_v52 = vadd.f32 %v1466_v49, %v1454_v51 }
 0x7b1   : > { %v1470_v53 = vadd.f32 %v1467_v52, %v1178_v29 }
 0x7b3   : > { %1471 = vadd.xlane.f32.xlu1 %v1470_v53 }
 0x7b4   : > { %v1455_v54 = vpop.f32.mrf.mxu0  ;;  %v1468_v55 = vpop.f32.mrf.mxu1 }
 0x826   : > { %v1472_v56 = vpop.xlane.xlu1 %1471 }
 0x827   : > { %v1473_v57 = vmul.f32 %v1472_v56, %v2608_v18 }
 0x829   : > { %v1474_v58 = vsub.f32 %v1470_v53, %v1473_v57 }
 0x82b   : > { %v1475_v59 = vmul.f32 %v1474_v58, %v1474_v58 }
 0x82d   : > { %1476 = vadd.xlane.f32.xlu2 %v1475_v59 }
 0x82e   : > { %2281 = shalt.err (!%p2278_p8)
}
 0x82f   : > { %s2344_s17 = smov 4   ;;  %s2726_s29 = sld [smem:[#allocation25_spill]] }
 0x830   : > { %2030 = dma.vmem_to_hbm [thread:$0]  (%p2463_p5), %s1524_s26, 256, %s1526_s4, %s1508_s12, %s2340_s21, %s2340_s21, %s2344_s17  }
 0x831   : > { %s2727_s25 = sld [smem:[#allocation26_spill]] }
 0x832   : > { %s2728_s4 = sld [smem:[#allocation27_spill]] }
 0x835   : > { %v2110_v6 = vld [vmem:[%s2726_s29] ss:$0 sm:$0xff] }
 0x838   : > { %s581_s12 = scalar_lea.vmem %s2728_s4, %s1675_s11 }
 0x8a0   : > { %v1477_v60 = vpop.xlane.xlu2 %1476 }
 0x8a1   : > { %v1478_v61 = vmul.f32 %v1477_v60, %v2608_v18  ;;  %v2111_v18 = vld [vmem:[%s2727_s25] ss:$0 sm:$0xff] }
 0x8a3   : > { %v1479_v62 = vadd.f32 1e-06, %v1478_v61 }
 0x8a5   : > { %2132 = vrsqrt.f32 %v1479_v62  ;;  %vm1486_vm11 = vweird.f32 %v1479_v62 }
 0x8ab   : > { %v2133_v63 = vpop.eup %2132 }
 0x8ac   : > { %v1481_v0 = vmul.f32 %v2133_v63, %v1479_v62  ;;  %vm1487_vm10 = vweird.f32 %v2133_v63 }
 0x8ad   : > { %vm1488_vm12 = vmor %vm1486_vm11, %vm1487_vm10 }
 0x8ae   : > { %v1482_v1 = vmul.f32 %v2133_v63, %v1481_v0 }
 0x8b0   : > { %v1483_v3 = vmul.f32 0.5, %v1482_v1 }
 0x8b2   : > { %v1484_v4 = vsub.f32 1.5, %v1483_v3 }
 0x8b4   : > { %v1485_v5 = vmul.f32 %v2133_v63, %v1484_v4 }
 0x8b6   : > { %v1489_v50 = vsel %vm1488_vm12, %v2133_v63, %v1485_v5 }
 0x8b7   : > { %v1490_v7 = vmul.f32 %v1489_v50, %v1474_v58 }
 0x8b9   : > { %v1495_v8 = vmul.f32 %v2110_v6, %v1490_v7 }
 0x8bb   : > { %v1500_v9 = vadd.f32 %v2111_v18, %v1495_v8 }
 0x8bd   : > { %v1501_v10 = vpack.c.bf16 %v1500_v9, %v1500_v9 }
 0x8bf   : > { %1502 = vst [vmem:[%s581_s12] sm:$0xf] %v1501_v10 }
 0x8c0 PF: > { %s2729_s13 = sld [smem:[#allocation17_spill]] }
 0x8c1   : > { %s2730_s14 = sld [smem:[#allocation15_spill]] }
 0x8c6   : > { %p2057_p5 = scmp.ge.s32.totalorder %s2729_s13, 2 }
 0x8c7   : > { %s1547_s18 = sand.u32 1, %s2730_s14  }
 0x8c8   : > { %p2046_p9 = pnand %p2057_p5, %p2467_p6  ;;  %s1548_s22 = scalar_lea.sflag [#allocation4], %s1547_s18 }
 0x8ca   : > { %p2047_p10 = pneg %p2046_p9 }
 0x8cc   : > { %2311 = dma.done.wait (%p2047_p10), %s1548_s22, 256  }
 0x8cd   : > { %2313 = vsyncadd (%p2047_p10), %s1548_s22, 4294967040  ;;  %s2732_s21 = sld [smem:[#allocation18_spill]]  ;;  %s2735_s18 = smov %s2320_s19 }
 0x8ce   : > { %s2733_s2 = sld [smem:[#allocation16_spill]] }
 0x8cf   : > { %s2734_s20 = sld [smem:[#allocation19_spill]] }
 0x8d3   : > { %p29_p11 = scmp.ge.s32.totalorder %s2732_s21, 4  }
 0x8d4   : > { %s2736_s19 = smov %s2733_s2 }
 0x8d5   :  { %31 = sbr.rel (!%p29_p11) target bundleno = 14 (0xe), region = 146 }
 0x8da   :  { %1554 = vsyncpa [#allocation3], 1 }
 0x8db   :  { %1556 = vsyncpa [#allocation3 + $0x1], 1 }
 0x8dc   :  { %1557 = vsyncpa [#allocation6], 1 }
 0x8dd   :  { %1558 = vsyncpa [#allocation9], 1 }
 0x8de   :  { %1559 = vsyncpa [#allocation4], 1 }
 0x8df   :  { %1561 = vsyncpa [#allocation4 + $0x1], 1 }

// kernel: transformer_encoder.2
= control target key start
LH: loop header
LB: loop body
LE: loop exit
PB: predicated region body
PF: predicated region fallthrough
CT: control target
= control target key end

     0   :  { %s2746_s0 = inlined_call_operand.vmem [shape: bf16[2,8,128], index: 0, kind: input, shape index: {}, may-alias: {0,14}]   ;;  %s2747_s1 = inlined_call_operand.vmem [shape: f32[2,1,8], index: 1, kind: input, shape index: {}]   ;;  %s2748_s2 = inlined_call_operand.vmem [shape: bf16[128,384], index: 2, kind: input, shape index: {}]   ;;  %s2749_s3 = inlined_call_operand.vmem [shape: f32[1,384], index: 3, kind: input, shape index: {}]   ;;  %s2750_s4 = inlined_call_operand.hbm [shape: bf16[128,128], index: 4, kind: input, shape index: {}]   ;;  %s2751_s5 = inlined_call_operand.vmem [shape: f32[1,128], index: 5, kind: input, shape index: {}]   ;;  %s2752_s6 = inlined_call_operand.vmem [shape: f32[1,128], index: 6, kind: input, shape index: {}]   ;;  %s2753_s7 = inlined_call_operand.vmem [shape: f32[1,128], index: 7, kind: input, shape index: {}]   ;;  %s2754_s8 = inlined_call_operand.vmem [shape: bf16[128,256], index: 8, kind: input, shape index: {}]   ;;  %s2755_s9 = inlined_call_operand.vmem [shape: f32[1,256], index: 9, kind: input, shape index: {}]   ;;  %s2756_s10 = inlined_call_operand.hbm [shape: bf16[256,128], index: 10, kind: input, shape index: {}]   ;;  %s2757_s11 = inlined_call_operand.vmem [shape: f32[1,128], index: 11, kind: input, shape index: {}]   ;;  %s2758_s12 = inlined_call_operand.vmem [shape: f32[1,128], index: 12, kind: input, shape index: {}]   ;;  %s2759_s13 = inlined_call_operand.vmem [shape: f32[1,128], index: 13, kind: input, shape index: {}]   ;;  %s2760_s14 = inlined_call_operand.vmem [shape: bf16[2,8,128], index: 14, kind: output, shape index: {0}, may-alias: {0,14}]   ;;  %s2761_s15 = inlined_call_operand.hbm [shape: bf16[2,4,8,8], index: 15, kind: output, shape index: {1}]  }
   0x1   :  { %2771 = sst [smem:[#allocation17_spill]] %s2746_s0 }
   0x2   :  { %2772 = sst [smem:[#allocation18_spill]] %s2747_s1 }
   0x3   :  { %2773 = sst [smem:[#allocation19_spill]] %s2748_s2 }
   0x4   :  { %21 = vsyncpa [#allocation3], 0 }
   0x5   :  { %22 = vsyncpa [#allocation6], 0 }
   0x6   :  { %23 = vsyncpa [#allocation4], 0 }
   0x7   :  { %25 = vsyncpa [#allocation4 + $0x1], 0  ;;  %s2275_s18 = smov 0   ;;  %s2277_s19 = smov 0  }
   0x8   :  { %s2279_s20 = smov 0   ;;  %s2281_s21 = smov 0  }
   0x9 LB: > { %2774 = sst [smem:[#allocation11_spill]] %s2172_s18  ;;  %s2296_s22 = sadd.s32 4294967295, %s2184_s21   ;;  %s2184_s21 = sphi %s2281_s21, %s2792_s21   ;;  %s2180_s20 = sphi %s2279_s20, %s2797_s20   ;;  %s2176_s19 = sphi %s2277_s19, %s2796_s19   ;;  %s2172_s18 = sphi %s2275_s18, %s2795_s18  }
   0xa   : > { %2775 = sst [smem:[#allocation12_spill]] %s2180_s20  ;;  %s1610_s23 = sadd.s32 4294967294, %s2184_s21  }
   0xb   : > { %2776 = sst [smem:[#allocation13_spill]] %s2184_s21  ;;  %s2300_s24 = sadd.s32 1, %s2184_s21  }
   0xc   : > { %2777 = sst [smem:[#allocation14_spill]] %s2300_s24  ;;  %s368_s25 = sadd.s32 1, %s2180_s20 }
   0xd   : > { %s365_s26 = ssub.s32 %s2184_s21, %s2300_s24  ;;  %p378_p0 = scmp.ne.s32.totalorder %s2180_s20, %s2176_s19 }
   0xe   : > { %p366_p1 = scmp.eq.s32.totalorder %s365_s26, 0  ;;  %p379_p2 = scmp.eq.s32.totalorder %s2296_s22, 1 }
   0xf   : > { %p384_p3 = scmp.ne.s32.totalorder %s2176_s19, %s2172_s18  ;;  %p385_p4 = scmp.eq.s32.totalorder %s1610_s23, 1 }
  0x10   : > { %s2311_s27 = scalar_select %p366_p1, %s2180_s20, %s368_s25  }
  0x11   : > { %p2313_p5 = por %p379_p2, %p378_p0  ;;  %p2317_p6 = por %p385_p4, %p384_p3 }
  0x12   : > { %2778 = sst [smem:[#allocation15_spill]] %s2311_s27  ;;  %p1611_p7 = scmp.ge.s32.totalorder %s2184_s21, 1 }
  0x13   : > { %s2780_s29 = scalar_select %p2317_p6, 1, 0 }
  0x14   : > { %p392_p8 = scmp.lt.s32.totalorder %s2184_s21, 3  ;;  %p1979_p9 = scmp.eq.s32.totalorder %s2296_s22, 0 }
  0x15   : > { %2781 = sst [smem:[#allocation16_spill]] %s2780_s29  ;;  %s409_s23 = sshll.u32 %s2750_s4, 4  ;;  %s410_s23 = int_to_ptr.hbm [resolvable:$true] %s409_s23 }
  0x16   : > { %p2324_p10 = pnand %p1611_p7, %p392_p8  ;;  %s2186_s25 = smov [#allocation2]  }
  0x17   : > { %s411_s26 = sshll.u32 %s2186_s25, 4  ;;  %s438_s24 = sshll.u32 %s2756_s10, 4  ;;  %s412_s26 = int_to_ptr.vmem [resolvable:$true] %s411_s26  ;;  %s439_s24 = int_to_ptr.hbm [resolvable:$true] %s438_s24 }
  0x18   : > { %p1968_p11 = pneg %p2324_p10  ;;  %s2187_s29 = smov 64  }
  0x19   : > { %s2188_s18 = smov 4   ;;  %s2189_s21 = smov [#allocation5]  }
  0x1a   : > { %p1969_p12 = pnand %p1979_p9, %p1968_p11  ;;  %s440_s16 = sshll.u32 %s2189_s21, 4  ;;  %s441_s16 = int_to_ptr.vmem [resolvable:$true] %s440_s16 }
  0x1b   : > { %478 = sbr.rel (%p2324_p10) target bundleno = 2229 (0x8b5), region = 76 }
  0x1c   : > { %1971 = dma.hbm_to_vmem [thread:$0]  (!%p1969_p12), %s410_s23, 1024, %s412_s26, [#allocation3], %s2187_s29, %s2187_s29, %s2188_s18  }
  0x1d   : > { %1974 = dma.hbm_to_vmem [thread:$0]  (!%p1969_p12), %s439_s24, 2048, %s441_s16, [#allocation6], %s2187_s29, %s2187_s29, %s2188_s18  }
  0x20   : > { %2159 = dma.done.wait (%p1979_p9), [#allocation3], 1024  }
  0x21   : > { %2161 = vsyncadd (%p1979_p9), [#allocation3], 4294966272 }
  0x22   : > { %2163 = dma.done.wait (%p1979_p9), [#allocation6], 2048  }
  0x23   : > { %2165 = vsyncadd (%p1979_p9), [#allocation6], 4294965248  ;;  %s2783_s2 = sld [smem:[#allocation19_spill]]  ;;  %p538_p13 = scmp.lt.s32.totalorder %s2296_s22, 1  ;;  %vm766_vm0 = vcmask 261120   ;;  %vm804_vm1 = vcmask 1043456  }
  0x24   : > { %s2784_s0 = sld [smem:[#allocation17_spill]]  ;;  %s2769_s26 = smov 64   ;;  %vm786_vm2 = vcmask 64512   ;;  %vm799_vm3 = vcmask 60416   ;;  %vm1020_vm4 = vcmask 523264   ;;  %vm1023_vm5 = vcmask 785408  }
  0x25   : > { %s2460_s20 = scalar_select %p538_p13, %s2296_s22, 1 }
  0x26   : > { %s2191_s16 = smov 96   ;;  %s2785_s1 = sld [smem:[#allocation18_spill]] }
  0x27   : > { %s2768_s18 = sshll.u32 %s2460_s20, 2  ;;  %s2192_s29 = smov 32  }
  0x28   : > { %s2770_s30 = sand.u32 1, %s2176_s19   ;;  %s1957_s21 = sshll.u32 %s2296_s22, 4 }
  0x29   : > { %v1707_v0 = vld [vmem:[%s2783_s2 + $0xa8] sm:$0xf]  ;;  %v1915_v1 = vld [vmem:[%s2783_s2 + $0xb0] sm:$0xf0]  ;;  %v1914_v2 = vld [vmem:[%s2783_s2 + $0xac] sm:$0xf] }
  0x2a   : > { %v1708_v3 = vor.u32 %v1915_v1, %v1707_v0  ;;  %v1709_v4 = vld [vmem:[%s2783_s2 + $0xb4] sm:$0xf0]  ;;  %v1695_v5 = vld [vmem:[%s2783_s2 + $0x90] sm:$0xf]  ;;  %v1912_v6 = vld [vmem:[%s2783_s2 + $0x98] sm:$0xf0]  ;;  %s541_s25 = scalar_lea.vmem %s2784_s0, %s2768_s18  ;;  %s1489_s0 = scalar_lea.hbm %s2761_s15, %s1957_s21 }
  0x2b   : > { %v1712_v7 = vor.u32 %v1914_v2, %v1709_v4  ;;  %v1911_v8 = vld [vmem:[%s2783_s2 + $0x94] sm:$0xf]  ;;  %v1697_v9 = vld [vmem:[%s2783_s2 + $0x9c] sm:$0xf0]  ;;  %v1696_v10 = vor.u32 %v1912_v6, %v1695_v5  ;;  %v1683_v12 = vld [vmem:[%s2783_s2 + $0x78] sm:$0xf] }
  0x2c   : > { %721 = vmatpush.bf16.msra.mxu0 %v1708_v3  ;;  %v1700_v11 = vor.u32 %v1911_v8, %v1697_v9  ;;  %v1909_v13 = vld [vmem:[%s2783_s2 + $0x80] sm:$0xf0]  ;;  %v1908_v14 = vld [vmem:[%s2783_s2 + $0x7c] sm:$0xf]  ;;  %v1685_v15 = vld [vmem:[%s2783_s2 + $0x84] sm:$0xf0]  ;;  %s544_s24 = scalar_lea.vmem %s2785_s1, %s2460_s20 }
  0x2d   : > { %734 = vmatpush.bf16.msra.mxu1 %v1712_v7  ;;  %v1684_v16 = vor.u32 %v1909_v13, %v1683_v12  ;;  %v1688_v17 = vor.u32 %v1908_v14, %v1685_v15  ;;  %v1671_v18 = vld [vmem:[%s2783_s2 + $0x60] sm:$0xf]  ;;  %v1906_v19 = vld [vmem:[%s2783_s2 + $0x68] sm:$0xf0]  ;;  %v1905_v20 = vld [vmem:[%s2783_s2 + $0x64] sm:$0xf] }
  0x2e   : > { %v1673_v21 = vld [vmem:[%s2783_s2 + $0x6c] sm:$0xf0]  ;;  %v1672_v22 = vor.u32 %v1906_v19, %v1671_v18  ;;  %v1916_v24 = vld [vmem:[%s2783_s2 + $0xb8] sm:$0xf0]  ;;  %v1703_v25 = vld [vmem:[%s2783_s2 + $0x98] sm:$0xf] }
  0x2f   : > { %v1715_v23 = vld [vmem:[%s2783_s2 + $0xb0] sm:$0xf]  ;;  %v1676_v26 = vor.u32 %v1905_v20, %v1673_v21  ;;  %v1659_v27 = vld [vmem:[%s2783_s2 + $0x48] sm:$0xf]  ;;  %v1903_v28 = vld [vmem:[%s2783_s2 + $0x50] sm:$0xf0] }
  0x30   : > { %722 = vmatpush.bf16.msra.mxu0 %v1696_v10  ;;  %v1716_v29 = vor.u32 %v1916_v24, %v1715_v23  ;;  %v1913_v30 = vld [vmem:[%s2783_s2 + $0xa0] sm:$0xf0]  ;;  %v1902_v31 = vld [vmem:[%s2783_s2 + $0x4c] sm:$0xf]  ;;  %v1661_v32 = vld [vmem:[%s2783_s2 + $0x54] sm:$0xf0]  ;;  %v1660_v34 = vor.u32 %v1903_v28, %v1659_v27 }
  0x31   : > { %735 = vmatpush.bf16.msra.mxu1 %v1700_v11  ;;  %v1704_v33 = vor.u32 %v1913_v30, %v1703_v25  ;;  %v1647_v35 = vld [vmem:[%s2783_s2 + $0x30] sm:$0xf]  ;;  %v1691_v36 = vld [vmem:[%s2783_s2 + $0x80] sm:$0xf]  ;;  %v1910_v37 = vld [vmem:[%s2783_s2 + $0x88] sm:$0xf0]  ;;  %v1664_v38 = vor.u32 %v1902_v31, %v1661_v32 }
  0x32   : > { %747 = vmatpush.bf16.msra.mxu2 %v1716_v29  ;;  %v1900_v39 = vld [vmem:[%s2783_s2 + $0x38] sm:$0xf0]  ;;  %v1899_v40 = vld [vmem:[%s2783_s2 + $0x34] sm:$0xf]  ;;  %v1649_v41 = vld [vmem:[%s2783_s2 + $0x3c] sm:$0xf0]  ;;  %v1692_v42 = vor.u32 %v1910_v37, %v1691_v36 }
  0x33   : > { %v1648_v43 = vor.u32 %v1900_v39, %v1647_v35  ;;  %v1679_v44 = vld [vmem:[%s2783_s2 + $0x68] sm:$0xf]  ;;  %v1907_v45 = vld [vmem:[%s2783_s2 + $0x70] sm:$0xf0]  ;;  %v1652_v46 = vor.u32 %v1899_v40, %v1649_v41  ;;  %v1635_v47 = vld [vmem:[%s2783_s2 + $0x18] sm:$0xf] }
  0x34   : > { %723 = vmatpush.bf16.msra.mxu0 %v1684_v16  ;;  %v1897_v48 = vld [vmem:[%s2783_s2 + $0x20] sm:$0xf0]  ;;  %v1896_v49 = vld [vmem:[%s2783_s2 + $0x1c] sm:$0xf]  ;;  %v1637_v50 = vld [vmem:[%s2783_s2 + $0x24] sm:$0xf0]  ;;  %v1680_v51 = vor.u32 %v1907_v45, %v1679_v44 }
  0x35   : > { %736 = vmatpush.bf16.msra.mxu1 %v1688_v17  ;;  %v1636_v52 = vor.u32 %v1897_v48, %v1635_v47  ;;  %v1667_v53 = vld [vmem:[%s2783_s2 + $0x50] sm:$0xf]  ;;  %v1904_v54 = vld [vmem:[%s2783_s2 + $0x58] sm:$0xf0]  ;;  %v1640_v55 = vor.u32 %v1896_v49, %v1637_v50  ;;  %v1623_v56 = vld [vmem:[%s2783_s2] sm:$0xf] }
  0x36   : > { %748 = vmatpush.bf16.msra.mxu2 %v1704_v33  ;;  %v1894_v57 = vld [vmem:[%s2783_s2 + $0x8] sm:$0xf0]  ;;  %v1893_v58 = vld [vmem:[%s2783_s2 + $0x4] sm:$0xf]  ;;  %v1625_v59 = vld [vmem:[%s2783_s2 + $0xc] sm:$0xf0]  ;;  %v1668_v60 = vor.u32 %v1904_v54, %v1667_v53 }
  0x37   : > { %v1624_v61 = vor.u32 %v1894_v57, %v1623_v56  ;;  %v1655_v62 = vld [vmem:[%s2783_s2 + $0x38] sm:$0xf]  ;;  %v1901_v63 = vld [vmem:[%s2783_s2 + $0x40] sm:$0xf0]  ;;  %v1628_v0 = vor.u32 %v1893_v58, %v1625_v59  ;;  %v2492_v2 = vld [vmem:[%s541_s25] sm:$0xf] }
  0x38   : > { %724 = vmatpush.bf16.msra.mxu0 %v1672_v22  ;;  %v1656_v1 = vor.u32 %v1901_v63, %v1655_v62  ;;  %v1643_v3 = vld [vmem:[%s2783_s2 + $0x20] sm:$0xf]  ;;  %v1898_v4 = vld [vmem:[%s2783_s2 + $0x28] sm:$0xf0]  ;;  %v1631_v6 = vld [vmem:[%s2783_s2 + $0x8] sm:$0xf] }
  0x39   : > { %737 = vmatpush.bf16.msra.mxu1 %v1676_v26  ;;  %v1644_v5 = vor.u32 %v1898_v4, %v1643_v3  ;;  %v1895_v7 = vld [vmem:[%s2783_s2 + $0x10] sm:$0xf0]  ;;  %v585_v9 = vld [vmem:[%s2749_s3] sm:$0x7]  ;;  %s1618_s17 = sshll.u32 %s2770_s30, 4  ;;  %s1492_s25 = sshll.u32 %s1489_s0, 4  ;;  %s1493_s25 = int_to_ptr.hbm [resolvable:$true] %s1492_s25 }
  0x3a   : > { %749 = vmatpush.bf16.msra.mxu2 %v1692_v42  ;;  %v1632_v8 = vor.u32 %v1895_v7, %v1631_v6  ;;  %v588_v10 = vperm.slane %v585_v9, 1  ;;  %v587_v13 = vperm.slane %v585_v9, 0  ;;  %v589_v22 = vperm.slane %v585_v9, 2  ;;  %v2025_v31 = vld [vmem:[%s544_s24] ss:$0 sm:$0xff]  ;;  %s2536_s23 = scalar_lea.vmem [#allocation7], %s1618_s17 }
  0x3b   : > { %s1490_s17 = sshll.u32 %s2536_s23, 4  ;;  %s2128_s30 = sshra.s32 %s1493_s25, 4  ;;  %s1491_s17 = int_to_ptr.vmem [resolvable:$true] %s1490_s17  ;;  %s2129_s30 = int_to_ptr.hbm [resolvable:$true] %s2128_s30 }
  0x3c   : > { %725 = vmatpush.bf16.msra.mxu0 %v1660_v34  ;;  %s2130_s18 = scalar_lea.hbm %s2129_s30, 16  ;;  %s2134_s22 = scalar_lea.hbm %s2761_s15, 32 }
  0x3d   : > { %738 = vmatpush.bf16.msra.mxu1 %v1664_v38  ;;  %p2131_p0 = scmp.ne.s32.totalorder %s2129_s30, %s2130_s18  ;;  %p2135_p3 = scmp.lt.s32.totalorder %s2129_s30, %s2761_s15 }
  0x3e   : > { %750 = vmatpush.bf16.msra.mxu2 %v1680_v51  ;;  %p2136_p4 = scmp.lt.s32.totalorder %s2134_s22, %s2130_s18 }
  0x3f   : > { %p2132_p1 = pnand %p2131_p0, %p2313_p5 }
  0x40   : > { %726 = vmatpush.bf16.msra.mxu0 %v1648_v43  ;;  %p2137_p7 = por %p2136_p4, %p2135_p3 }
  0x41   : > { %739 = vmatpush.bf16.msra.mxu1 %v1652_v46  ;;  %p2133_p2 = pneg %p2132_p1 }
  0x42   : > { %751 = vmatpush.bf16.msra.mxu2 %v1668_v60 }
  0x43   : > { %p2138_p8 = pnand %p2137_p7, %p2133_p2 }
  0x44   : > { %727 = vmatpush.bf16.msra.mxu0 %v1636_v52 }
  0x45   : > { %740 = vmatpush.bf16.msra.mxu1 %v1640_v55 }
  0x46   : > { %752 = vmatpush.bf16.msra.mxu2 %v1656_v1 }
  0x48   : > { %728 = vmatpush.bf16.msra.mxu0 %v1624_v61 }
  0x49   : > { %741 = vmatpush.bf16.msra.mxu1 %v1628_v0 }
  0x4a   : > { %753 = vmatpush.bf16.msra.mxu2 %v1644_v5 }
  0x4b   : > { %729 = vmatmul.bf16.vlgmr.msra.gmra.mxu0 %v2492_v2 }
  0x4c   : > { %742 = vmatmul.bf16.vlgmr.msra.gmra.mxu1 %v2492_v2 }
  0x4e   : > { %754 = vmatpush.bf16.msra.mxu2 %v1632_v8 }
  0x51   : > { %755 = vmatmul.bf16.vlgmr.msra.gmra.mxu2 %v2492_v2 }
  0xc8   : > { %v730_v11 = vpop.f32.mrf.mxu0 }
  0xc9   : > { %v743_v12 = vpop.f32.mrf.mxu1  ;;  %v731_v16 = vadd.f32 %v730_v11, %v587_v13 }
  0xca   : > { %v744_v14 = vadd.f32 %v743_v12, %v588_v10 }
  0xcb   : > { %v760_v20 = vpack.c.bf16 %v731_v16, %v731_v16 }
  0xcc   : > { %v761_v15 = vpack.c.bf16 %v744_v14, %v744_v14 }
  0xce   : > { %886 = vrot.lane.b32.xlu2 %v761_v15, %s2769_s26  ;;  %826 = vrot.lane.b32.xlu1 %v761_v15, %s2191_s16  ;;  %v771_v17 = vsel %vm766_vm0, %v761_v15, 0 }
  0xcf   : > { %780 = vmatpush.bf16.xpose.msra.mxu3 %v771_v17 }
  0xd0   : > { %v732_v18 = vpop.f32.mrf.mxu0 }
  0xd1   : > { %v745_v19 = vpop.f32.mrf.mxu1 }
  0xd4   : > { %v756_v21 = vpop.f32.mrf.mxu2 }
  0xd5   : > { %v757_v23 = vadd.f32 %v756_v21, %v589_v22 }
  0xd6   : > { %945 = vrot.lane.b32.xlu2 %v761_v15, %s2192_s29  ;;  %823 = vrot.lane.b32.xlu1 %v760_v20, %s2191_s16 }
  0xd7   : > { %1717 = vmatmul.msk.bf16.vlgmr.msra.gmra.mxu3 %vm766_vm0, %v760_v20  ;;  %v2523_v25 = vpack.c.bf16 %v757_v23, %v757_v23 }
  0xd9   : > { %v806_v26 = vsel %vm804_vm1, %v2523_v25, 0 }
  0xda   : > { %815 = vmatpush.bf16.msrb.mxu3 %v806_v26 }
  0xdc   : > { %v758_v24 = vpop.f32.mrf.mxu2 }
  0xde   : > { %943 = vrot.lane.b32.xlu1 %v760_v20, %s2192_s29 }
 0x128   : > { %v887_v27 = vpop.permute.xlu2 %886 }
 0x129   : > { %v892_v28 = vsel %vm766_vm0, %v887_v27, 0 }
 0x12a   : > { %901 = vmatpush.bf16.xpose.msrb.mxu2 %v892_v28 }
 0x130   : > { %v946_v44 = vpop.permute.xlu2 %945 }
 0x131   : > { %v951_v46 = vsel %vm766_vm0, %v946_v44, 0 }
 0x140   : > { %v827_v29 = vpop.permute.xlu1 %826 }
 0x141   : > { %v832_v30 = vsel %vm766_vm0, %v827_v29, 0 }
 0x142   : > { %841 = vmatpush.bf16.xpose.msra.mxu3 %v832_v30 }
 0x148   : > { %v824_v48 = vpop.permute.xlu1 %823 }
 0x150   : > { %v944_v49 = vpop.permute.xlu1 %943 }
 0x15a   : > { %v782_v32 = vpop.f32.mrf.mxu3 }
 0x15b   : > { %v783_v33 = vadd.f32 %v2025_v31, %v782_v32 }
 0x15d   : > { %v787_v34 = vsel %vm786_vm2, %v783_v33, -inf }
 0x15e   : > { %788 = vmax.xlane.f32.xlu0 %v787_v34 }
 0x162   : > { %v784_v35 = vpop.f32.mrf.mxu3 }
 0x1d1   : > { %v789_v36 = vpop.xlane.xlu0 %788 }
 0x1d2   : > { %v790_v37 = vsub.f32 %v783_v33, %v789_v36 }
 0x1d4   : > { %v791_v38 = vmul.f32 1.442695, %v790_v37 }
 0x1d6   : > { %2032 = vpow2.f32 %v791_v38 }
 0x1dc   : > { %v2033_v39 = vpop.eup %2032 }
 0x1dd   : > { %v793_v40 = vsel %vm786_vm2, %v2033_v39, 0.0 }
 0x1de   : > { %794 = vadd.xlane.f32.xlu0 %v793_v40 }
 0x1f2   : > { %884 = vrot.lane.b32.xlu0 %v760_v20, %s2769_s26 }
 0x251   : > { %v795_v41 = vpop.xlane.xlu0 %794 }
 0x252   : > { %2034 = vrcp.f32 %v795_v41 }
 0x258   : > { %v2035_v42 = vpop.eup %2034 }
 0x259   : > { %v797_v43 = vmul.f32 %v2035_v42, %v2033_v39 }
 0x25b   : > { %v798_v45 = vpack.c.bf16 %v797_v43, %v797_v43 }
 0x25d   : > { %800 = vst.msk [vmem:[%s2536_s23] sm:$0xf] %vm799_vm3, %v798_v45  ;;  %1718 = vmatmul.msk.bf16.vlgmr.msrb.gmra.mxu3 %vm786_vm2, %v798_v45 }
 0x25e   : > { %960 = vmatpush.bf16.xpose.msrb.mxu3 %v951_v46 }
 0x264   : > { %v885_v47 = vpop.permute.xlu0 %884 }
 0x265   : > { %1722 = vmatmul.msk.bf16.vlgmr.msrb.gmra.mxu2 %vm766_vm0, %v885_v47 }
 0x26d   : > { %1719 = vmatmul.msk.bf16.vlgmr.msra.gmra.mxu3 %vm766_vm0, %v824_v48 }
 0x27d   : > { %1725 = vmatmul.msk.bf16.vlgmr.msrb.gmra.mxu3 %vm766_vm0, %v944_v49  ;;  %v1924_v49 = vld [vmem:[#allocation2 + $0x38] sm:$0xff] }
 0x27e   : > { %1095 = vmatpush.bf16.msrb.mxu1 %v1924_v49  ;;  %v1929_v49 = vld [vmem:[%s2754_s8 + $0x24] sm:$0xf] }
 0x2e0   : > { %v2544_v50 = vpop.f32.mrf.mxu3 }
 0x2e8   : > { %v819_v51 = vpop.f32.mrf.mxu3  ;;  %v903_v52 = vpop.f32.mrf.mxu2 }
 0x2e9   : > { %v904_v53 = vadd.f32 %v2025_v31, %v903_v52  ;;  %v1923_v51 = vld [vmem:[#allocation2 + $0x30] sm:$0xff]  ;;  %v1922_v52 = vld [vmem:[#allocation2 + $0x28] sm:$0xff] }
 0x2ea   : > { %1096 = vmatpush.bf16.msrb.mxu1 %v1923_v51 }
 0x2eb   : > { %v907_v54 = vsel %vm786_vm2, %v904_v53, -inf }
 0x2ec   : > { %908 = vmax.xlane.f32.xlu1 %v907_v54  ;;  %v1920_v54 = vld [vmem:[#allocation2 + $0x18] sm:$0xff] }
 0x2ee   : > { %1097 = vmatpush.bf16.msrb.mxu1 %v1922_v52  ;;  %v1780_v52 = vld [vmem:[%s2754_s8 + $0x28] sm:$0xf0] }
 0x2f0   : > { %v843_v55 = vpop.f32.mrf.mxu3  ;;  %v905_v56 = vpop.f32.mrf.mxu2 }
 0x2f1   : > { %v844_v57 = vadd.f32 %v2025_v31, %v843_v55  ;;  %v1919_v55 = vld [vmem:[#allocation2 + $0x10] sm:$0xff]  ;;  %v1918_v56 = vld [vmem:[#allocation2 + $0x8] sm:$0xff] }
 0x2f3   : > { %v847_v58 = vsel %vm786_vm2, %v844_v57, -inf }
 0x2f4   : > { %848 = vmax.xlane.f32.xlu2 %v847_v58 }
 0x2f8   : > { %v845_v59 = vpop.f32.mrf.mxu3 }
 0x2f9   : > { %v821_v59 = vpack.c.bf16 %v2544_v50, %v2544_v50 }
 0x300   : > { %v962_v60 = vpop.f32.mrf.mxu3 }
 0x301   : > { %v963_v61 = vadd.f32 %v2025_v31, %v962_v60 }
 0x303   : > { %v966_v62 = vsel %vm786_vm2, %v963_v61, -inf }
 0x304   : > { %967 = vmax.xlane.f32.xlu0 %v966_v62 }
 0x308   : > { %v964_v63 = vpop.f32.mrf.mxu3 }
 0x318   : > { %921 = vrot.lane.b32.xlu0 %v2523_v25, %s2769_s26 }
 0x35f   : > { %v909_v0 = vpop.xlane.xlu1 %908 }
 0x360   : > { %v910_v1 = vsub.f32 %v904_v53, %v909_v0  ;;  %v1921_v53 = vld [vmem:[#allocation2 + $0x20] sm:$0xff] }
 0x361   : > { %1098 = vmatpush.bf16.msrb.mxu1 %v1921_v53  ;;  %v1783_v53 = vor.u32 %v1929_v49, %v1780_v52 }
 0x362   : > { %v911_v3 = vmul.f32 1.442695, %v910_v1  ;;  %v2026_v1 = vld [vmem:[%s2751_s5] ss:$0 sm:$0xff] }
 0x364   : > { %2036 = vpow2.f32 %v911_v3  ;;  %v551_v3 = vunpack.c.l.bf16 %v2492_v2 }
 0x365   : > { %1099 = vmatpush.bf16.msrb.mxu1 %v1920_v54  ;;  %v1770_v54 = vld [vmem:[%s2754_s8 + $0x10] sm:$0xf] }
 0x367   : > { %v849_v4 = vpop.xlane.xlu2 %848 }
 0x368   : > { %v850_v5 = vsub.f32 %v844_v57, %v849_v4  ;;  %v1917_v57 = vld [vmem:[#allocation2] sm:$0xff] }
 0x369   : > { %1100 = vmatpush.bf16.msrb.mxu1 %v1919_v55  ;;  %v1928_v55 = vld [vmem:[%s2754_s8 + $0x14] sm:$0xf0] }
 0x36a   : > { %v2037_v6 = vpop.eup %2036  ;;  %v851_v7 = vmul.f32 1.442695, %v850_v5 }
 0x36b   : > { %v913_v8 = vsel %vm786_vm2, %v2037_v6, 0.0 }
 0x36c   : > { %2038 = vpow2.f32 %v851_v7  ;;  %914 = vadd.xlane.f32.xlu1 %v913_v8  ;;  %v2193_v7 = vmov 128.0   ;;  %v1818_v8 = vld [vmem:[%s2754_s8 + $0x70] sm:$0xf] }
 0x36d   : > { %1101 = vmatpush.bf16.msrb.mxu1 %v1918_v56  ;;  %v1927_v56 = vld [vmem:[%s2754_s8 + $0x14] sm:$0xf] }
 0x371   : > { %1102 = vmatpush.bf16.msrb.mxu1 %v1917_v57  ;;  %v1771_v57 = vor.u32 %v1928_v55, %v1770_v54 }
 0x372   : > { %v2039_v9 = vpop.eup %2038 }
 0x373   : > { %v853_v10 = vsel %vm786_vm2, %v2039_v9, 0.0 }
 0x374   : > { %854 = vadd.xlane.f32.xlu2 %v853_v10  ;;  %v1939_v10 = vld [vmem:[%s2754_s8 + $0x74] sm:$0xf] }
 0x377   : > { %v968_v11 = vpop.xlane.xlu0 %967 }
 0x378   : > { %v969_v12 = vsub.f32 %v963_v61, %v968_v11  ;;  %v1820_v11 = vld [vmem:[%s2754_s8 + $0x78] sm:$0xf0] }
 0x37a   : > { %v970_v13 = vmul.f32 1.442695, %v969_v12  ;;  %v1823_v12 = vor.u32 %v1939_v10, %v1820_v11  ;;  %v1954_v10 = vld [vmem:[#allocation5 + $0x68] sm:$0xff]  ;;  %v1953_v11 = vld [vmem:[#allocation5 + $0x60] sm:$0xff] }
 0x37c   : > { %2040 = vpow2.f32 %v970_v13  ;;  %1262 = vmatpush.bf16.msra.mxu3 %v1823_v12 }
 0x382   : > { %v2041_v14 = vpop.eup %2040 }
 0x383   : > { %v972_v15 = vsel %vm786_vm2, %v2041_v14, 0.0 }
 0x384   : > { %973 = vadd.xlane.f32.xlu1 %v972_v15 }
 0x38a   : > { %v922_v16 = vpop.permute.xlu0 %921 }
 0x38b   : > { %v927_v17 = vsel %vm804_vm1, %v922_v16, 0 }
 0x38c   : > { %862 = vrot.lane.b32.xlu2 %v2523_v25, %s2191_s16  ;;  %936 = vmatpush.bf16.msra.mxu2 %v927_v17 }
 0x39d   : > { %980 = vrot.lane.b32.xlu1 %v2523_v25, %s2192_s29 }
 0x3df   : > { %v915_v18 = vpop.xlane.xlu1 %914 }
 0x3e0   : > { %2042 = vrcp.f32 %v915_v18 }
 0x3e6   : > { %v2043_v19 = vpop.eup %2042 }
 0x3e7   : > { %v917_v20 = vmul.f32 %v2043_v19, %v2037_v6  ;;  %v855_v21 = vpop.xlane.xlu2 %854 }
 0x3e8   : > { %2044 = vrcp.f32 %v855_v21 }
 0x3e9   : > { %v918_v22 = vpack.c.bf16 %v917_v20, %v917_v20 }
 0x3eb   : > { %1723 = vst.msk [vmem:[%s2536_s23 + $0x8] sm:$0xf] %vm799_vm3, %v918_v22  ;;  %1724 = vmatmul.msk.bf16.vlgmr.msra.gmra.mxu2 %vm786_vm2, %v918_v22 }
 0x3ee   : > { %v2045_v23 = vpop.eup %2044 }
 0x3ef   : > { %v857_v24 = vmul.f32 %v2045_v23, %v2039_v9  ;;  %v863_v26 = vpop.permute.xlu2 %862  ;;  %v1940_v9 = vld [vmem:[%s2754_s8 + $0x74] sm:$0xf0]  ;;  %v1810_v23 = vld [vmem:[%s2754_s8 + $0x60] sm:$0xf] }
 0x3f0   : > { %v868_v27 = vsel %vm804_vm1, %v863_v26, 0  ;;  %v1819_v2 = vor.u32 %v1940_v9, %v1818_v8  ;;  %v1937_v26 = vld [vmem:[%s2754_s8 + $0x64] sm:$0xf]  ;;  %v1946_v9 = vld [vmem:[#allocation5 + $0x28] sm:$0xff] }
 0x3f1   : > { %877 = vmatpush.bf16.msrb.mxu0 %v868_v27  ;;  %v858_v25 = vpack.c.bf16 %v857_v24, %v857_v24  ;;  %v1938_v24 = vld [vmem:[%s2754_s8 + $0x64] sm:$0xf0] }
 0x3f2   : > { %1249 = vmatpush.bf16.msrb.mxu2 %v1819_v2  ;;  %v1811_v27 = vor.u32 %v1938_v24, %v1810_v23  ;;  %v1945_v2 = vld [vmem:[#allocation5 + $0x20] sm:$0xff] }
 0x3f3   : > { %1720 = vst.msk [vmem:[%s2536_s23 + $0x4] sm:$0xf] %vm799_vm3, %v858_v25  ;;  %v2027_v24 = vld [vmem:[%s2752_s6] ss:$0 sm:$0xff] }
 0x3f4   : > { %1721 = vmatmul.msk.bf16.vlgmr.msrb.gmra.mxu0 %vm786_vm2, %v858_v25  ;;  %v1812_v25 = vld [vmem:[%s2754_s8 + $0x68] sm:$0xf0] }
 0x3f6   : > { %1250 = vmatpush.bf16.msrb.mxu2 %v1811_v27 }
 0x3f7   : > { %v974_v28 = vpop.xlane.xlu1 %973 }
 0x3f8   : > { %2046 = vrcp.f32 %v974_v28  ;;  %v1815_v28 = vor.u32 %v1937_v26, %v1812_v25  ;;  %v2028_v25 = vld [vmem:[%s2753_s7] ss:$0 sm:$0xff] }
 0x3f9   : > { %2048 = vrcp.f32 %v2193_v7  ;;  %v1955_v7 = vld [vmem:[#allocation5 + $0x70] sm:$0xff] }
 0x3fa   : > { %1263 = vmatpush.bf16.msra.mxu3 %v1815_v28 }
 0x3fe   : > { %v2047_v29 = vpop.eup %2046 }
 0x3ff   : > { %v976_v30 = vmul.f32 %v2047_v29, %v2041_v14  ;;  %v2049_v13 = vpop.eup %2048  ;;  %v1802_v29 = vld [vmem:[%s2754_s8 + $0x50] sm:$0xf] }
 0x400   : > { %v1112_v14 = vmul.f32 128.0, %v2049_v13  ;;  %vm1116_vm6 = vweird.f32 %v2049_v13 }
 0x401   : > { %v977_v31 = vpack.c.bf16 %v976_v30, %v976_v30  ;;  %v1936_v30 = vld [vmem:[%s2754_s8 + $0x54] sm:$0xf0] }
 0x402   : > { %v1113_v15 = vsub.f32 1.0, %v1112_v14  ;;  %v1944_v14 = vld [vmem:[#allocation5 + $0x18] sm:$0xff] }
 0x403   : > { %1726 = vst.msk [vmem:[%s2536_s23 + $0xc] sm:$0xf] %vm799_vm3, %v977_v31 }
 0x404   : > { %v1114_v16 = vmul.f32 %v2049_v13, %v1113_v15  ;;  %v1952_v15 = vld [vmem:[#allocation5 + $0x58] sm:$0xff] }
 0x406   : > { %v1115_v17 = vadd.f32 %v2049_v13, %v1114_v16 }
 0x408   : > { %v2592_v18 = vsel %vm1116_vm6, %v2049_v13, %v1115_v17 }
 0x40f   : > { %v981_v32 = vpop.permute.xlu1 %980 }
 0x410   : > { %v986_v33 = vsel %vm804_vm1, %v981_v32, 0  ;;  %v1803_v32 = vor.u32 %v1936_v30, %v1802_v29 }
 0x411   : > { %995 = vmatpush.bf16.msra.mxu0 %v986_v33  ;;  %v1804_v33 = vld [vmem:[%s2754_s8 + $0x58] sm:$0xf0] }
 0x412   : > { %1251 = vmatpush.bf16.msrb.mxu2 %v1803_v32  ;;  %v1950_v32 = vld [vmem:[#allocation5 + $0x48] sm:$0xff] }
 0x414   : > { %1727 = vmatmul.msk.bf16.vlgmr.msra.gmra.mxu0 %vm786_vm2, %v977_v31  ;;  %v1935_v31 = vld [vmem:[%s2754_s8 + $0x54] sm:$0xf] }
 0x46e   : > { %v938_v34 = vpop.f32.mrf.mxu2 }
 0x46f   : > { %v942_v38 = vpack.c.bf16 %v938_v34, %v938_v34  ;;  %v1807_v34 = vor.u32 %v1935_v31, %v1804_v33  ;;  %v1942_v31 = vld [vmem:[#allocation5 + $0x8] sm:$0xff]  ;;  %v1941_v33 = vld [vmem:[#allocation5] sm:$0xff] }
 0x471   : > { %v879_v35 = vpop.f32.mrf.mxu0  ;;  %v1008_v42 = vunpack.c.l.b16 %v942_v38  ;;  %1264 = vmatpush.bf16.msra.mxu3 %v1807_v34  ;;  %v1949_v34 = vld [vmem:[#allocation5 + $0x40] sm:$0xff] }
 0x472   : > { %v883_v36 = vpack.c.bf16 %v879_v35, %v879_v35  ;;  %v1794_v35 = vld [vmem:[%s2754_s8 + $0x40] sm:$0xf] }
 0x473   : > { %v1009_v43 = vpack.c.b16 %v1008_v42, %v1008_v42  ;;  %v1932_v42 = vld [vmem:[%s2754_s8 + $0x34] sm:$0xf0] }
 0x474   : > { %v1003_v37 = vunpack.c.l.b16 %v883_v36  ;;  %v1934_v36 = vld [vmem:[%s2754_s8 + $0x44] sm:$0xf0] }
 0x475   : > { %v1795_v38 = vor.u32 %v1934_v36, %v1794_v35 }
 0x476   : > { %v1004_v39 = vpack.c.b16 %v1003_v37, %v1003_v37  ;;  %v940_v40 = vpop.f32.mrf.mxu2  ;;  %v1933_v37 = vld [vmem:[%s2754_s8 + $0x44] sm:$0xf] }
 0x477   : > { %1252 = vmatpush.bf16.msrb.mxu2 %v1795_v38 }
 0x478   : > { %1005 = vrot.lane.b32.xlu2 %v1004_v39, %s2192_s29  ;;  %v1796_v39 = vld [vmem:[%s2754_s8 + $0x48] sm:$0xf0] }
 0x479   : > { %v881_v41 = vpop.f32.mrf.mxu0  ;;  %v1799_v40 = vor.u32 %v1933_v37, %v1796_v39 }
 0x47a   : > { %v1786_v41 = vld [vmem:[%s2754_s8 + $0x30] sm:$0xf] }
 0x47b   : > { %1265 = vmatpush.bf16.msra.mxu3 %v1799_v40 }
 0x480   : > { %1010 = vrot.lane.b32.xlu2 %v1009_v43, %s2769_s26  ;;  %v1931_v43 = vld [vmem:[%s2754_s8 + $0x34] sm:$0xf] }
 0x491   : > { %v997_v44 = vpop.f32.mrf.mxu0 }
 0x492   : > { %v1001_v45 = vpack.c.bf16 %v997_v44, %v997_v44  ;;  %v1787_v44 = vor.u32 %v1932_v42, %v1786_v41 }
 0x494   : > { %v1013_v46 = vunpack.c.l.b16 %v1001_v45  ;;  %v1788_v45 = vld [vmem:[%s2754_s8 + $0x38] sm:$0xf0]  ;;  %1253 = vmatpush.bf16.msrb.mxu2 %v1787_v44 }
 0x496   : > { %v1014_v47 = vpack.c.b16 %v1013_v46, %v1013_v46  ;;  %v1791_v46 = vor.u32 %v1931_v43, %v1788_v45 }
 0x498   : > { %1015 = vrot.lane.b32.xlu0 %v1014_v47, %s2191_s16  ;;  %1266 = vmatpush.bf16.msra.mxu3 %v1791_v46  ;;  %v1778_v47 = vld [vmem:[%s2754_s8 + $0x20] sm:$0xf]  ;;  %s2786_s16 = sand.u32 1, %s2176_s19  }
 0x499   : > { %v999_v48 = vpop.f32.mrf.mxu0  ;;  %s1475_s26 = scalar_lea.sflag [#allocation4], %s2786_s16 }
 0x49a   : > { %v1930_v48 = vld [vmem:[%s2754_s8 + $0x24] sm:$0xf0] }
 0x49b   : > { %v1779_v51 = vor.u32 %v1930_v48, %v1778_v47  ;;  %v2029_v47 = vld [vmem:[%s2757_s11] ss:$0 sm:$0xff] }
 0x49c   : > { %1267 = vmatpush.bf16.msra.mxu3 %v1783_v53 }
 0x49d   : > { %1254 = vmatpush.bf16.msrb.mxu2 %v1779_v51 }
 0x4a1   : > { %1255 = vmatpush.bf16.msrb.mxu2 %v1771_v57 }
 0x4d2   : > { %v1006_v58 = vpop.permute.xlu2 %1005 }
 0x4d3   : > { %v1019_v61 = vsel %vm766_vm0, %v821_v59, %v1006_v58  ;;  %v1772_v58 = vld [vmem:[%s2754_s8 + $0x18] sm:$0xf0]  ;;  %v1762_v59 = vld [vmem:[%s2754_s8] sm:$0xf] }
 0x4da   : > { %v1011_v60 = vpop.permute.xlu2 %1010 }
 0x4db   : > { %v1022_v62 = vsel %vm1020_vm4, %v1019_v61, %v1011_v60  ;;  %v1926_v60 = vld [vmem:[%s2754_s8 + $0x4] sm:$0xf0]  ;;  %v1775_v61 = vor.u32 %v1927_v56, %v1772_v58 }
 0x4dd   : > { %1268 = vmatpush.bf16.msra.mxu3 %v1775_v61 }
 0x50a   : > { %v1016_v63 = vpop.permute.xlu0 %1015 }
 0x50b   : > { %v1025_v0 = vsel %vm1023_vm5, %v1022_v62, %v1016_v63  ;;  %v1925_v62 = vld [vmem:[%s2754_s8 + $0x4] sm:$0xf]  ;;  %v1764_v63 = vld [vmem:[%s2754_s8 + $0x8] sm:$0xf0] }
 0x50c   : > { %1103 = vmatmul.bf16.vlgmr.msrb.gmra.mxu1 %v1025_v0  ;;  %v1763_v0 = vor.u32 %v1926_v60, %v1762_v59 }
 0x50e   : > { %1256 = vmatpush.bf16.msrb.mxu2 %v1763_v0 }
 0x589   : > { %v1104_v4 = vpop.f32.mrf.mxu1 }
 0x58a   : > { %v1105_v5 = vadd.f32 %v2026_v1, %v1104_v4  ;;  %v1767_v1 = vor.u32 %v1925_v62, %v1764_v63  ;;  %v1956_v4 = vld [vmem:[#allocation5 + $0x78] sm:$0xff] }
 0x58b   : > { %1424 = vmatpush.bf16.msra.mxu1 %v1956_v4 }
 0x58c   : > { %v1108_v6 = vadd.f32 %v1105_v5, %v551_v3  ;;  %1269 = vmatpush.bf16.msra.mxu3 %v1767_v1  ;;  %v1948_v3 = vld [vmem:[#allocation5 + $0x38] sm:$0xff] }
 0x58d   : > { %1411 = vmatpush.bf16.msrb.mxu0 %v1948_v3 }
 0x58e   : > { %1109 = vadd.xlane.f32.xlu2 %v1108_v6 }
 0x58f   : > { %1425 = vmatpush.bf16.msra.mxu1 %v1955_v7 }
 0x591   : > { %v1106_v50 = vpop.f32.mrf.mxu1 }
 0x592   : > { %v1947_v50 = vld [vmem:[#allocation5 + $0x30] sm:$0xff] }
 0x593   : > { %1412 = vmatpush.bf16.msrb.mxu0 %v1947_v50  ;;  %1426 = vmatpush.bf16.msra.mxu1 %v1954_v10 }
 0x597   : > { %1413 = vmatpush.bf16.msrb.mxu0 %v1946_v9  ;;  %1427 = vmatpush.bf16.msra.mxu1 %v1953_v11 }
 0x59b   : > { %1414 = vmatpush.bf16.msrb.mxu0 %v1945_v2  ;;  %1428 = vmatpush.bf16.msra.mxu1 %v1952_v15 }
 0x59f   : > { %1415 = vmatpush.bf16.msrb.mxu0 %v1944_v14 }
 0x601   : > { %v1110_v19 = vpop.xlane.xlu2 %1109 }
 0x602   : > { %v1118_v20 = vmul.f32 %v2592_v18, %v1110_v19  ;;  %v1943_v19 = vld [vmem:[#allocation5 + $0x10] sm:$0xff] }
 0x603   : > { %1416 = vmatpush.bf16.msrb.mxu0 %v1943_v19 }
 0x604   : > { %v2595_v21 = vsub.f32 %v1108_v6, %v1118_v20  ;;  %v1951_v20 = vld [vmem:[#allocation5 + $0x50] sm:$0xff] }
 0x605   : > { %1429 = vmatpush.bf16.msra.mxu1 %v1951_v20 }
 0x606   : > { %v1120_v22 = vmul.f32 %v2595_v21, %v2595_v21 }
 0x607   : > { %1417 = vmatpush.bf16.msrb.mxu0 %v1942_v31 }
 0x608   : > { %1121 = vadd.xlane.f32.xlu0 %v1120_v22 }
 0x609   : > { %1430 = vmatpush.bf16.msra.mxu1 %v1950_v32 }
 0x60b   : > { %1418 = vmatpush.bf16.msrb.mxu0 %v1941_v33 }
 0x60d   : > { %1431 = vmatpush.bf16.msra.mxu1 %v1949_v34 }
 0x67b   : > { %v1122_v5 = vpop.xlane.xlu0 %1121 }
 0x67c   : > { %v1123_v6 = vmul.f32 %v1122_v5, %v2592_v18 }
 0x67e   : > { %v1124_v8 = vadd.f32 1e-06, %v1123_v6 }
 0x680   : > { %2050 = vrsqrt.f32 %v1124_v8  ;;  %vm1131_vm8 = vweird.f32 %v1124_v8 }
 0x686   : > { %v2051_v12 = vpop.eup %2050 }
 0x687   : > { %v1126_v13 = vmul.f32 %v2051_v12, %v1124_v8  ;;  %vm1132_vm7 = vweird.f32 %v2051_v12 }
 0x688   : > { %vm1133_vm9 = vmor %vm1131_vm8, %vm1132_vm7 }
 0x689   : > { %v1127_v16 = vmul.f32 %v2051_v12, %v1126_v13 }
 0x68b   : > { %v1128_v17 = vmul.f32 0.5, %v1127_v16 }
 0x68d   : > { %v1129_v22 = vsub.f32 1.5, %v1128_v17 }
 0x68f   : > { %v1130_v23 = vmul.f32 %v2051_v12, %v1129_v22 }
 0x691   : > { %v1134_v26 = vsel %vm1133_vm9, %v2051_v12, %v1130_v23 }
 0x692   : > { %v1135_v27 = vmul.f32 %v1134_v26, %v2595_v21  ;;  %v1163_v21 = vld [vmem:[%s2755_s9] sm:$0x3] }
 0x693   : > { %v1165_v35 = vperm.slane %v1163_v21, 0  ;;  %v1166_v36 = vperm.slane %v1163_v21, 1 }
 0x694   : > { %v1140_v28 = vmul.f32 %v2027_v24, %v1135_v27 }
 0x696   : > { %v1145_v29 = vadd.f32 %v2028_v25, %v1140_v28 }
 0x698   : > { %v1146_v30 = vpack.c.bf16 %v1145_v29, %v1145_v29 }
 0x69a   : > { %1257 = vmatmul.bf16.vlgmr.msrb.gmra.mxu2 %v1146_v30  ;;  %1270 = vmatmul.bf16.vlgmr.msra.gmra.mxu3 %v1146_v30 }
 0x71d   : > { %v1258_v37 = vpop.f32.mrf.mxu2  ;;  %v1271_v38 = vpop.f32.mrf.mxu3 }
 0x71e   : > { %v1259_v39 = vadd.f32 %v1258_v37, %v1165_v35  ;;  %v1272_v40 = vadd.f32 %v1271_v38, %v1166_v36 }
 0x720   : > { %v1275_v41 = vmax.f32 %v1259_v39, 0.0  ;;  %v1276_v42 = vmax.f32 %v1272_v40, 0.0 }
 0x722   : > { %v1277_v43 = vpack.c.bf16 %v1275_v41, %v1275_v41  ;;  %v1278_v44 = vpack.c.bf16 %v1276_v42, %v1276_v42 }
 0x724   : > { %1419 = vmatmul.bf16.vlgmr.msrb.gmra.mxu0 %v1277_v43  ;;  %1432 = vmatmul.bf16.vlgmr.msra.gmra.mxu1 %v1278_v44 }
 0x725   : > { %v1260_v45 = vpop.f32.mrf.mxu2  ;;  %v1273_v46 = vpop.f32.mrf.mxu3 }
 0x7a1   : > { %v1420_v48 = vpop.f32.mrf.mxu0  ;;  %v1433_v49 = vpop.f32.mrf.mxu1 }
 0x7a2   : > { %v1421_v51 = vadd.f32 %v2029_v47, %v1420_v48 }
 0x7a4   : > { %v1434_v52 = vadd.f32 %v1433_v49, %v1421_v51 }
 0x7a6   : > { %v1437_v53 = vadd.f32 %v1434_v52, %v1145_v29 }
 0x7a8   : > { %1438 = vadd.xlane.f32.xlu1 %v1437_v53 }
 0x7a9   : > { %v1422_v54 = vpop.f32.mrf.mxu0  ;;  %v1435_v55 = vpop.f32.mrf.mxu1 }
 0x81b   : > { %v1439_v56 = vpop.xlane.xlu1 %1438 }
 0x81c   : > { %v1440_v57 = vmul.f32 %v1439_v56, %v2592_v18 }
 0x81e   : > { %v1441_v58 = vsub.f32 %v1437_v53, %v1440_v57 }
 0x820   : > { %v1442_v59 = vmul.f32 %v1441_v58, %v1441_v58 }
 0x822   : > { %1443 = vadd.xlane.f32.xlu2 %v1442_v59 }
 0x823   : > { %2141 = shalt.err (!%p2138_p8)
}
 0x824   : > { %s2194_s23 = smov 4   ;;  %s2787_s21 = smov 64   ;;  %v2030_v6 = vld [vmem:[%s2758_s12] ss:$0 sm:$0xff] }
 0x825   : > { %1966 = dma.vmem_to_hbm [thread:$0]  (%p2313_p5), %s1491_s17, 256, %s1493_s25, %s1475_s26, %s2787_s21, %s2787_s21, %s2194_s23  }
 0x826   : > { %s2788_s0 = sshll.u32 %s2460_s20, 2 }
 0x827   : > { %s548_s16 = scalar_lea.vmem %s2760_s14, %s2788_s0 }
 0x895   : > { %v1444_v60 = vpop.xlane.xlu2 %1443 }
 0x896   : > { %v1445_v61 = vmul.f32 %v1444_v60, %v2592_v18  ;;  %v2031_v18 = vld [vmem:[%s2759_s13] ss:$0 sm:$0xff] }
 0x898   : > { %v1446_v62 = vadd.f32 1e-06, %v1445_v61 }
 0x89a   : > { %2052 = vrsqrt.f32 %v1446_v62  ;;  %vm1453_vm11 = vweird.f32 %v1446_v62 }
 0x8a0   : > { %v2053_v63 = vpop.eup %2052 }
 0x8a1   : > { %v1448_v0 = vmul.f32 %v2053_v63, %v1446_v62  ;;  %vm1454_vm10 = vweird.f32 %v2053_v63 }
 0x8a2   : > { %vm1455_vm12 = vmor %vm1453_vm11, %vm1454_vm10 }
 0x8a3   : > { %v1449_v1 = vmul.f32 %v2053_v63, %v1448_v0 }
 0x8a5   : > { %v1450_v3 = vmul.f32 0.5, %v1449_v1 }
 0x8a7   : > { %v1451_v4 = vsub.f32 1.5, %v1450_v3 }
 0x8a9   : > { %v1452_v5 = vmul.f32 %v2053_v63, %v1451_v4 }
 0x8ab   : > { %v1456_v50 = vsel %vm1455_vm12, %v2053_v63, %v1452_v5 }
 0x8ac   : > { %v1457_v7 = vmul.f32 %v1456_v50, %v1441_v58 }
 0x8ae   : > { %v1462_v8 = vmul.f32 %v2030_v6, %v1457_v7 }
 0x8b0   : > { %v1467_v9 = vadd.f32 %v2031_v18, %v1462_v8 }
 0x8b2   : > { %v1468_v10 = vpack.c.bf16 %v1467_v9, %v1467_v9 }
 0x8b4   : > { %1469 = vst [vmem:[%s548_s16] sm:$0xf] %v1468_v10 }
 0x8b5 PF: > { %s2789_s26 = sld [smem:[#allocation13_spill]] }
 0x8b6   : > { %s2790_s30 = sld [smem:[#allocation11_spill]] }
 0x8bb   : > { %p1983_p5 = scmp.ge.s32.totalorder %s2789_s26, 2 }
 0x8bc   : > { %s1514_s27 = sand.u32 1, %s2790_s30  }
 0x8bd   : > { %p1976_p9 = pnand %p1983_p5, %p2317_p6  ;;  %s1515_s22 = scalar_lea.sflag [#allocation4], %s1514_s27 }
 0x8bf   : > { %p1977_p10 = pneg %p1976_p9 }
 0x8c1   : > { %2167 = dma.done.wait (%p1977_p10), %s1515_s22, 256  }
 0x8c2   : > { %2169 = vsyncadd (%p1977_p10), %s1515_s22, 4294967040  ;;  %s2792_s21 = sld [smem:[#allocation14_spill]]  ;;  %s2795_s18 = smov %s2176_s19 }
 0x8c3   : > { %s2793_s20 = sld [smem:[#allocation12_spill]] }
 0x8c4   : > { %s2794_s24 = sld [smem:[#allocation15_spill]] }
 0x8c8   : > { %p28_p11 = scmp.ge.s32.totalorder %s2792_s21, 4  }
 0x8c9   : > { %s2796_s19 = smov %s2793_s20 }
 0x8ca   : > { %s2797_s20 = smov %s2794_s24  ;;  %30 = sbr.rel (!%p28_p11) target bundleno = 9 (0x9), region = 138 }
 0x8cf   :  { %1521 = vsyncpa [#allocation3], 1 }
 0x8d0   :  { %1523 = vsyncpa [#allocation3 + $0x1], 1 }
 0x8d1   :  { %1524 = vsyncpa [#allocation6], 1 }
 0x8d2   :  { %1525 = vsyncpa [#allocation4], 1 }
 0x8d3   :  { %1527 = vsyncpa [#allocation4 + $0x1], 1 }

</bundles_post_ra>
